<compile_context>
chip_gen: v5e
topology: v5e:2x2
jax: 0.10.0
libtpu: 0.0.40
codegen_flags: <defaults>
</compile_context>

<pallas_src>
import functools
import inspect

import jax
import jax.numpy as jnp
from jax import lax
from jax.experimental import pallas as pl
from jax.experimental.pallas import tpu as pltpu


def _round_up(x, m):
    return ((x + m - 1) // m) * m


def _largest_divisor_leq(n, target):
    target = max(1, min(n, target))
    best = 1
    for d in range(1, target + 1):
        if n % d == 0:
            best = d
    return best


try:
    _HAS_PIPELINE_MODE = (
        hasattr(pl, "Buffered")
        and "pipeline_mode" in inspect.signature(pl.BlockSpec).parameters)
except (TypeError, ValueError):  # pragma: no cover
    _HAS_PIPELINE_MODE = False


def _const_spec(block_shape, index_map):
    """BlockSpec for a block whose index never changes along the serial axis.

    Single-buffered (pl.Buffered(1)) when supported, so resident weights are
    not double-buffered by default -- halves their VMEM footprint (the headroom
    that matters on v7x's 64 MiB physical and v5e's 16 MiB scoped default).
    """
    if _HAS_PIPELINE_MODE:
        return pl.BlockSpec(block_shape, index_map,
                            pipeline_mode=pl.Buffered(1))
    return pl.BlockSpec(block_shape, index_map)


def _maybe_vmem_limit(bytes_estimate):
    """Pin vmem_limit_bytes only when the default scoped limit is at risk."""
    need = 2 * int(bytes_estimate) + (4 << 20)
    if need <= (24 << 20):
        return None  # small shapes: compiler defaults are fine
    # Stay below v7x's 64 MiB physical VMEM; at larger footprints shrink
    # timesteps_per_block / target_rows instead of raising this further.
    return min(need, 56 << 20)


# -----------------------------------------------------------------------------
# Phase 1: batched projection  y = x @ w + b  (parallel over row blocks)
# -----------------------------------------------------------------------------
def _proj_kernel(x_ref, w_ref, b_ref, y_ref):
    y_ref[...] = (
        jnp.dot(x_ref[...], w_ref[...], preferred_element_type=jnp.float32)
        + b_ref[...]
    ).astype(y_ref.dtype)


def _batched_projection(x2d, w, b, *, t_steps, rows_per_step, out_dtype,
                        target_rows=1024):
    M, K = x2d.shape
    N = w.shape[1]
    tt = _largest_divisor_leq(t_steps, max(1, target_rows // rows_per_step))
    rm = tt * rows_per_step                      # multiple of 8, divides M
    est = (2 * rm * K * x2d.dtype.itemsize       # activation block, 2x buffered
           + K * N * w.dtype.itemsize            # weights, single-buffered
           + N * b.dtype.itemsize
           + 2 * rm * N * jnp.dtype(out_dtype).itemsize)
    return pl.pallas_call(
        _proj_kernel,
        out_shape=jax.ShapeDtypeStruct((M, N), out_dtype),
        grid_spec=pltpu.PrefetchScalarGridSpec(
            num_scalar_prefetch=0,
            grid=(M // rm,),
            in_specs=[
                pl.BlockSpec((rm, K), lambda i: (i, 0)),
                _const_spec((K, N), lambda i: (0, 0)),
                _const_spec((1, N), lambda i: (0, 0)),
            ],
            out_specs=pl.BlockSpec((rm, N), lambda i: (i, 0)),
        ),
        compiler_params=pltpu.CompilerParams(
            dimension_semantics=("parallel",),
            vmem_limit_bytes=_maybe_vmem_limit(est)),
    )(x2d, w, b)


# -----------------------------------------------------------------------------
# Phase 2: serial LSTM recurrence (+ fused output Linear as block epilogue)
# -----------------------------------------------------------------------------
def _make_recurrent_kernel(tt, bsub, hp, fp, *, t_last, capture_in_loop):
    last_blk = t_last // tt
    t_in_blk = t_last % tt

    def kernel(gx_ref, whh_ref, wout_ref, bout_ref,     # inputs
               y_ref, hn_ref, cn_ref,                   # outputs
               h_sc, c_sc, hblk_sc):                    # scratch
        ti = pl.program_id(1)                           # serial time-block axis

        @pl.when(ti == 0)
        def _():
            # hidden=None in the torch module -> zero (h0, c0)
            h_sc[...] = jnp.zeros_like(h_sc)
            c_sc[...] = jnp.zeros_like(c_sc)

        whh = whh_ref[...]            # (hp, 4hp): resident, single-buffered
        wd = whh.dtype

        def step(t, carry):
            h, c = carry              # f32 (bsub, hp) register carries
            gx = gx_ref[t]            # (bsub, 4hp) f32, precomputed in phase 1
            gates = gx + jnp.dot(h.astype(wd), whh,
                                 preferred_element_type=jnp.float32)
            # gate slices are 128-lane aligned (hp % 128 == 0) -> free views;
            # gate math stays f32 (v5e VPU/EUP have no bf16 path).
            i_g = jax.nn.sigmoid(gates[:, 0 * hp:1 * hp])
            f_g = jax.nn.sigmoid(gates[:, 1 * hp:2 * hp])
            g_g = jnp.tanh(gates[:, 2 * hp:3 * hp])
            o_g = jax.nn.sigmoid(gates[:, 3 * hp:4 * hp])
            c_new = f_g * c + i_g * g_g
            h_new = o_g * jnp.tanh(c_new)
            off = pl.multiple_of(t * bsub, bsub)
            hblk_sc[pl.ds(off, bsub), :] = h_new.astype(hblk_sc.dtype)
            if capture_in_loop:
                # T was padded: the true last timestep sits inside this block.
                @pl.when(jnp.logical_and(ti == last_blk, t == t_in_blk))
                def _():
                    hn_ref[...] = h_new.astype(hn_ref.dtype)
                    cn_ref[...] = c_new.astype(cn_ref.dtype)
            return (h_new, c_new)

        h_fin, c_fin = lax.fori_loop(
            0, tt, step, (h_sc[...], c_sc[...]),
            unroll=True if tt <= 32 else 8)

        # spill the register carry to VMEM scratch only once per block
        h_sc[...] = h_fin
        c_sc[...] = c_fin

        if not capture_in_loop:
            @pl.when(ti == pl.num_programs(1) - 1)
            def _():
                hn_ref[...] = h_fin.astype(hn_ref.dtype)
                cn_ref[...] = c_fin.astype(cn_ref.dtype)

        # Fused deferred Linear (phase 3) as a block epilogue: a single
        # (tt*bsub, hp) @ (hp, fp) matmul per block keeps MXU rows high and
        # eliminates the h_all HBM round trip entirely.
        yblk = (jnp.dot(hblk_sc[...], wout_ref[...],
                        preferred_element_type=jnp.float32)
                + bout_ref[...])
        y_ref[...] = yblk.reshape(tt, bsub, fp).astype(y_ref.dtype)

    return kernel


def _lstm_decoder_recurrence(gates_x3, w_hh_p, w_out_p, b_out_p, *,
                             t_true, tt, bsub, out_dtype,
                             state_dtype=jnp.float32):
    t_pad, bp, four_hp = gates_x3.shape
    hp = four_hp // 4
    fp = w_out_p.shape[1]
    nt = t_pad // tt
    nb = bp // bsub
    capture_in_loop = (t_pad != t_true)

    kernel = _make_recurrent_kernel(tt, bsub, hp, fp,
                                    t_last=t_true - 1,
                                    capture_in_loop=capture_in_loop)
    wd_sz = w_hh_p.dtype.itemsize
    est = (2 * tt * bsub * 4 * hp * gates_x3.dtype.itemsize  # gx, 2x buffered
           + hp * 4 * hp * wd_sz + hp * fp * wd_sz + fp * 4  # resident weights
           + 2 * tt * bsub * fp * jnp.dtype(out_dtype).itemsize  # y, 2x buffered
           + 4 * bsub * hp * 4                               # h/c carry + h_n/c_n
           + tt * bsub * hp * wd_sz)                         # h block scratch
    return pl.pallas_call(
        kernel,
        out_shape=(
            jax.ShapeDtypeStruct((t_pad, bp, fp), out_dtype),  # y (padded)
            jax.ShapeDtypeStruct((bp, hp), state_dtype),       # h_n (f32)
            jax.ShapeDtypeStruct((bp, hp), state_dtype),       # c_n (f32)
        ),
        grid_spec=pltpu.PrefetchScalarGridSpec(
            num_scalar_prefetch=0,
            grid=(nb, nt),   # batch axis parallel (v7x megacore), time serial
            in_specs=[
                pl.BlockSpec((tt, bsub, 4 * hp), lambda b, i: (i, b, 0)),
                _const_spec((hp, 4 * hp), lambda b, i: (0, 0)),
                _const_spec((hp, fp), lambda b, i: (0, 0)),
                _const_spec((1, fp), lambda b, i: (0, 0)),
            ],
            out_specs=[
                pl.BlockSpec((tt, bsub, fp), lambda b, i: (i, b, 0)),
                _const_spec((bsub, hp), lambda b, i: (b, 0)),
                _const_spec((bsub, hp), lambda b, i: (b, 0)),
            ],
            scratch_shapes=[
                pltpu.VMEM((bsub, hp), jnp.float32),         # h carry
                pltpu.VMEM((bsub, hp), jnp.float32),         # c carry
                pltpu.VMEM((tt * bsub, hp), w_hh_p.dtype),   # h block (epilogue)
            ],
        ),
        compiler_params=pltpu.CompilerParams(
            dimension_semantics=("parallel", "arbitrary"),
            vmem_limit_bytes=_maybe_vmem_limit(est)),
    )(gates_x3, w_hh_p, w_out_p, b_out_p)


# -----------------------------------------------------------------------------
# Wrapper (matches torch Decoder.forward: 1-layer unidirectional LSTM + Linear)
# -----------------------------------------------------------------------------
def decoder_forward(x, params, *, timesteps_per_block=32, target_rows=1024,
                    weight_dtype=None, batch_block=None):
    """x: (T, B, F).  Returns (y, (h_n, c_n)): y (T,B,F) in x.dtype,
    h_n/c_n (1,B,H) in float32 (matching the f32 torch reference states)."""
    T, B, F = x.shape
    H = params["w_hh_t"].shape[0]
    Fp = _round_up(F, 128)
    Hp = _round_up(H, 128)
    Bp = _round_up(B, 8)
    wd = weight_dtype if weight_dtype is not None else x.dtype  # bf16 on v6e/v7x

    # Time tiling: pad T so the block length tt always divides it (avoids
    # degenerate 1-timestep tiles for awkward/prime T).  Padded timesteps are
    # sliced away and h_n/c_n are captured at the true last step.
    tt = min(T, max(1, int(timesteps_per_block)))
    T_pad = _round_up(T, tt)

    # Batch tiling: one block by default (best for single-TensorCore v5e/v6e).
    # On v7x pass batch_block (e.g. ceil(B/2) rounded to 8) to shard the serial
    # recurrence across both TensorCores via the parallel batch grid axis.
    if batch_block is None:
        bsub = Bp
    else:
        bsub = 8 * _largest_divisor_leq(Bp // 8, max(1, int(batch_block) // 8))

    # gate-blocked, lane-aligned weight layout (padding is all-zero => exact)
    def pad_gate_cols(w2d, rows, rows_p):
        out = jnp.zeros((rows_p, 4 * Hp), w2d.dtype)
        for g in range(4):
            out = out.at[:rows, g * Hp:g * Hp + H].set(w2d[:, g * H:(g + 1) * H])
        return out

    w_ih_p = pad_gate_cols(params["w_ih_t"], F, Fp).astype(wd)    # (Fp, 4Hp)
    w_hh_p = pad_gate_cols(params["w_hh_t"], H, Hp).astype(wd)    # (Hp, 4Hp)
    b_g_p = pad_gate_cols(params["b_gate"], 1, 1)                 # (1, 4Hp) f32
    w_out_p = jnp.zeros((Hp, Fp), params["w_out_t"].dtype
                        ).at[:H, :F].set(params["w_out_t"]).astype(wd)
    b_out_p = jnp.zeros((1, Fp), params["b_out"].dtype
                        ).at[:, :F].set(params["b_out"])

    # pad + flatten input to a lane-dense (T_pad*Bp, Fp) slab
    x_p = jnp.zeros((T_pad, Bp, Fp), x.dtype).at[:T, :B, :F].set(x)
    x2d = x_p.reshape(T_pad * Bp, Fp).astype(wd)

    # Phase 1 (parallel): input projection for ALL timesteps (f32 gates for
    # exactness; bf16 gates_x is a v6e-only bandwidth option).
    gates_x = _batched_projection(x2d, w_ih_p, b_g_p, t_steps=T_pad,
                                  rows_per_step=Bp, out_dtype=jnp.float32,
                                  target_rows=target_rows)
    gates_x3 = gates_x.reshape(T_pad, Bp, 4 * Hp)   # free (bitcast) reshape

    # Phase 2 (serial): recurrence with the output Linear fused per block.
    y3, h_n, c_n = _lstm_decoder_recurrence(
        gates_x3, w_hh_p, w_out_p, b_out_p,
        t_true=T, tt=tt, bsub=bsub, out_dtype=x.dtype)

    y = y3[:T, :B, :F]
    return y, (h_n[:B, :H][None], c_n[:B, :H][None])


def init_decoder_params(key, num_features, num_units):
    """Synthetic init matching the torch module's shapes:
       LSTM(num_features -> num_units, 1 layer) + Linear(num_units -> num_features)."""
    F, H = num_features, num_units
    ks = jax.random.split(key, 6)
    s = 0.1
    w_ih = jax.random.normal(ks[0], (4 * H, F), jnp.float32) * s   # gate order i,f,g,o
    w_hh = jax.random.normal(ks[1], (4 * H, H), jnp.float32) * s
    b_ih = jax.random.normal(ks[2], (4 * H,), jnp.float32) * s
    b_hh = jax.random.normal(ks[3], (4 * H,), jnp.float32) * s
    w_out = jax.random.normal(ks[4], (F, H), jnp.float32) * s
    b_out = jax.random.normal(ks[5], (F,), jnp.float32) * s
    return {
        "w_ih_t": w_ih.T,                          # (F, 4H)
        "w_hh_t": w_hh.T,                          # (H, 4H)
        "b_gate": (b_ih + b_hh).reshape(1, 4 * H),
        "w_out_t": w_out.T,                        # (H, F)
        "b_out": b_out.reshape(1, F),
    }


def _reference_forward(x, params):
    """Pure-JAX reference (lax.scan) of the same LSTM + Linear, for validation."""
    T, B, F = x.shape
    H = params["w_hh_t"].shape[0]

    def step(carry, x_t):
        h, c = carry
        gates = x_t @ params["w_ih_t"] + h @ params["w_hh_t"] + params["b_gate"]
        i = jax.nn.sigmoid(gates[:, 0 * H:1 * H])
        f = jax.nn.sigmoid(gates[:, 1 * H:2 * H])
        g = jnp.tanh(gates[:, 2 * H:3 * H])
        o = jax.nn.sigmoid(gates[:, 3 * H:4 * H])
        c_new = f * c + i * g
        h_new = o * jnp.tanh(c_new)
        y = h_new @ params["w_out_t"] + params["b_out"]
        return (h_new, c_new), y

    init = (jnp.zeros((B, H), jnp.float32), jnp.zeros((B, H), jnp.float32))
    (h_n, c_n), ys = lax.scan(step, init, x)
    return ys, (h_n[None], c_n[None])


if __name__ == "__main__":
    key = jax.random.PRNGKey(0)

    # case 1: small, evenly tiled (seq=8, batch=8, num_features=32, num_units=32)
    T, B, F, H = 8, 8, 32, 32
    k_x, k_p = jax.random.split(key)
    x = jax.random.normal(k_x, (T, B, F), jnp.float32)
    params = init_decoder_params(k_p, num_features=F, num_units=H)

    fwd = jax.jit(decoder_forward)
    y, (h_n, c_n) = fwd(x, params)
    jax.block_until_ready((y, h_n, c_n))

    y_ref, (h_ref, c_ref) = _reference_forward(x, params)
    assert y.shape == (T, B, F) and h_n.shape == (1, B, H) and c_n.shape == (1, B, H)
    assert jnp.allclose(y, y_ref, atol=1e-3, rtol=1e-3)
    assert jnp.allclose(h_n, h_ref, atol=1e-3, rtol=1e-3)
    assert jnp.allclose(c_n, c_ref, atol=1e-3, rtol=1e-3)

    # case 2: awkward (prime) T exercising the padded-tail recurrence path
    T2, B2 = 13, 4
    k_x2, _ = jax.random.split(k_x)
    x2 = jax.random.normal(k_x2, (T2, B2, F), jnp.float32)
    fwd2 = jax.jit(functools.partial(decoder_forward, timesteps_per_block=8))
    y2, (h_n2, c_n2) = fwd2(x2, params)
    jax.block_until_ready((y2, h_n2, c_n2))
    y2_ref, (h2_ref, c2_ref) = _reference_forward(x2, params)
    assert y2.shape == (T2, B2, F)
    assert jnp.allclose(y2, y2_ref, atol=1e-3, rtol=1e-3)
    assert jnp.allclose(h_n2, h2_ref, atol=1e-3, rtol=1e-3)
    assert jnp.allclose(c_n2, c2_ref, atol=1e-3, rtol=1e-3)

    print("KERNEL_OK")
</pallas_src>

<mosaic_0001>
module attributes {stable_mosaic.version = 11 : i64} {
  func.func @_proj_kernel(%arg0: i32, %arg1: memref<64x128xf32, #tpu.memory_space<vmem>>, %arg2: memref<128x512xf32, #tpu.memory_space<vmem>>, %arg3: memref<1x512xf32, #tpu.memory_space<vmem>>, %arg4: memref<64x512xf32, #tpu.memory_space<vmem>>) attributes {dimension_semantics = [#tpu.dimension_semantics<parallel>], iteration_bounds = array<i64: 1>, scalar_prefetch = 0 : i64, scratch_operands = 0 : i64, tpu.core_type = #tpu.core_type<tc>, window_params = [{transform_indices = @transform_0, window_bounds = array<i64: 64, 128>}, {pipeline_mode = #tpu.pipeline_mode<synchronous>, transform_indices = @transform_1, window_bounds = array<i64: 128, 512>}, {pipeline_mode = #tpu.pipeline_mode<synchronous>, transform_indices = @transform_2, window_bounds = array<i64: 1, 512>}, {transform_indices = @transform_3, window_bounds = array<i64: 64, 512>}]} {
    %c0 = arith.constant 0 : index
    %c0_0 = arith.constant 0 : index
    %0 = vector.load %arg1[%c0, %c0_0] : memref<64x128xf32, #tpu.memory_space<vmem>>, vector<64x128xf32>
    %c0_1 = arith.constant 0 : index
    %c0_2 = arith.constant 0 : index
    %1 = vector.load %arg2[%c0_1, %c0_2] : memref<128x512xf32, #tpu.memory_space<vmem>>, vector<128x512xf32>
    %cst = arith.constant dense<0.000000e+00> : vector<64x512xf32>
    %2 = tpu.matmul %0, %1, %cst {dimension_numbers = #tpu.dot_dimension_numbers<[1], [0], [0], [1], [0, 0, 1, 1], [], []>} : vector<64x128xf32>, vector<128x512xf32>, vector<64x512xf32> -> vector<64x512xf32>
    %c0_3 = arith.constant 0 : index
    %c0_4 = arith.constant 0 : index
    %3 = vector.load %arg3[%c0_3, %c0_4] : memref<1x512xf32, #tpu.memory_space<vmem>>, vector<1x512xf32>
    %4 = vector.broadcast %3 : vector<1x512xf32> to vector<64x512xf32>
    %5 = arith.addf %2, %4 : vector<64x512xf32>
    %c0_5 = arith.constant 0 : index
    %c0_6 = arith.constant 0 : index
    %6 = vector.load %arg4[%c0_5, %c0_6] : memref<64x512xf32, #tpu.memory_space<vmem>>, vector<64x512xf32>
    tpu.vector_store %arg4[%c0_5, %c0_6], %5 {strides = array<i32>} : memref<64x512xf32, #tpu.memory_space<vmem>>, vector<64x512xf32>,
    return
  }
  func.func @transform_0(%arg0: i32) -> (i32, i32) {
    %c0_i32 = arith.constant 0 : i32
    %c0_i32_0 = arith.constant 0 : i32
    return %arg0, %c0_i32 : i32, i32
  }
  func.func @transform_1(%arg0: i32) -> (i32, i32) {
    %c0_i32 = arith.constant 0 : i32
    %c0_i32_0 = arith.constant 0 : i32
    %c0_i32_1 = arith.constant 0 : i32
    return %c0_i32, %c0_i32_0 : i32, i32
  }
  func.func @transform_2(%arg0: i32) -> (i32, i32) {
    %c0_i32 = arith.constant 0 : i32
    %c0_i32_0 = arith.constant 0 : i32
    %c0_i32_1 = arith.constant 0 : i32
    return %c0_i32, %c0_i32_0 : i32, i32
  }
  func.func @transform_3(%arg0: i32) -> (i32, i32) {
    %c0_i32 = arith.constant 0 : i32
    %c0_i32_0 = arith.constant 0 : i32
    return %arg0, %c0_i32 : i32, i32
  }
}

module attributes {stable_mosaic.version = 11 : i64} {
  func.func @kernel(%arg0: i32, %arg1: i32, %arg2: memref<8x8x512xf32, #tpu.memory_space<vmem>>, %arg3: memref<128x512xf32, #tpu.memory_space<vmem>>, %arg4: memref<128x128xf32, #tpu.memory_space<vmem>>, %arg5: memref<1x128xf32, #tpu.memory_space<vmem>>, %arg6: memref<8x8x128xf32, #tpu.memory_space<vmem>>, %arg7: memref<8x128xf32, #tpu.memory_space<vmem>>, %arg8: memref<8x128xf32, #tpu.memory_space<vmem>>, %arg9: memref<8x128xf32, #tpu.memory_space<vmem>>, %arg10: memref<8x128xf32, #tpu.memory_space<vmem>>, %arg11: memref<64x128xf32, #tpu.memory_space<vmem>>) attributes {dimension_semantics = [#tpu.dimension_semantics<parallel>, #tpu.dimension_semantics<arbitrary>], iteration_bounds = array<i64: 1, 1>, scalar_prefetch = 0 : i64, scratch_operands = 3 : i64, tpu.core_type = #tpu.core_type<tc>, window_params = [{transform_indices = @transform_0, window_bounds = array<i64: 8, 8, 512>}, {pipeline_mode = #tpu.pipeline_mode<synchronous>, transform_indices = @transform_1, window_bounds = array<i64: 128, 512>}, {pipeline_mode = #tpu.pipeline_mode<synchronous>, transform_indices = @transform_2, window_bounds = array<i64: 128, 128>}, {pipeline_mode = #tpu.pipeline_mode<synchronous>, transform_indices = @transform_3, window_bounds = array<i64: 1, 128>}, {transform_indices = @transform_4, window_bounds = array<i64: 8, 8, 128>}, {pipeline_mode = #tpu.pipeline_mode<synchronous>, transform_indices = @transform_5, window_bounds = array<i64: 8, 128>}, {pipeline_mode = #tpu.pipeline_mode<synchronous>, transform_indices = @transform_6, window_bounds = array<i64: 8, 128>}]} {
    %c0_i32 = arith.constant 0 : i32
    %0 = arith.cmpi eq, %arg1, %c0_i32 : i32
    %1 = arith.extui %0 : i1 to i32
    %c0_i32_0 = arith.constant 0 : i32
    %2 = arith.cmpi ne, %1, %c0_i32_0 : i32
    scf.if %2 {
      %cst_86 = arith.constant 0.000000e+00 : f32
      %291 = vector.broadcast %cst_86 : f32 to vector<8x128xf32>
      %c0_87 = arith.constant 0 : index
      %c0_88 = arith.constant 0 : index
      %292 = vector.load %arg9[%c0_87, %c0_88] : memref<8x128xf32, #tpu.memory_space<vmem>>, vector<8x128xf32>
      tpu.vector_store %arg9[%c0_87, %c0_88], %291 {strides = array<i32>} : memref<8x128xf32, #tpu.memory_space<vmem>>, vector<8x128xf32>,
      %cst_89 = arith.constant 0.000000e+00 : f32
      %293 = vector.broadcast %cst_89 : f32 to vector<8x128xf32>
      %c0_90 = arith.constant 0 : index
      %c0_91 = arith.constant 0 : index
      %294 = vector.load %arg10[%c0_90, %c0_91] : memref<8x128xf32, #tpu.memory_space<vmem>>, vector<8x128xf32>
      tpu.vector_store %arg10[%c0_90, %c0_91], %293 {strides = array<i32>} : memref<8x128xf32, #tpu.memory_space<vmem>>, vector<8x128xf32>,
    } else {
    }
    %c0 = arith.constant 0 : index
    %c0_1 = arith.constant 0 : index
    %3 = vector.load %arg3[%c0, %c0_1] : memref<128x512xf32, #tpu.memory_space<vmem>>, vector<128x512xf32>
    %c0_2 = arith.constant 0 : index
    %c0_3 = arith.constant 0 : index
    %4 = vector.load %arg9[%c0_2, %c0_3] : memref<8x128xf32, #tpu.memory_space<vmem>>, vector<8x128xf32>
    %c0_4 = arith.constant 0 : index
    %c0_5 = arith.constant 0 : index
    %5 = vector.load %arg10[%c0_4, %c0_5] : memref<8x128xf32, #tpu.memory_space<vmem>>, vector<8x128xf32>
    %c0_i32_6 = arith.constant 0 : i32
    %6 = arith.index_cast %c0_i32_6 : i32 to index
    %c0_7 = arith.constant 0 : index
    %c0_8 = arith.constant 0 : index
    %7 = vector.load %arg2[%6, %c0_7, %c0_8] : memref<8x8x512xf32, #tpu.memory_space<vmem>>, vector<1x8x512xf32>
    %8 = vector.shape_cast %7 : vector<1x8x512xf32> to vector<8x512xf32>
    %cst = arith.constant dense<0.000000e+00> : vector<8x512xf32>
    %9 = tpu.matmul %4, %3, %cst {dimension_numbers = #tpu.dot_dimension_numbers<[1], [0], [0], [1], [0, 0, 1, 1], [], []>} : vector<8x128xf32>, vector<128x512xf32>, vector<8x512xf32> -> vector<8x512xf32>
    %10 = arith.addf %8, %9 : vector<8x512xf32>
    %11 = vector.extract_strided_slice %10 {offsets = [0, 0], sizes = [8, 128], strides = [1, 1]} : vector<8x512xf32> to vector<8x128xf32>
    %12 = arith.negf %11 : vector<8x128xf32>
    %13 = math.exp %12 : vector<8x128xf32>
    %cst_9 = arith.constant 1.000000e+00 : f32
    %14 = vector.broadcast %cst_9 : f32 to vector<8x128xf32>
    %15 = arith.addf %14, %13 : vector<8x128xf32>
    %16 = arith.divf %14, %15 : vector<8x128xf32>
    %17 = vector.extract_strided_slice %10 {offsets = [0, 128], sizes = [8, 128], strides = [1, 1]} : vector<8x512xf32> to vector<8x128xf32>
    %18 = arith.negf %17 : vector<8x128xf32>
    %19 = math.exp %18 : vector<8x128xf32>
    %cst_10 = arith.constant 1.000000e+00 : f32
    %20 = vector.broadcast %cst_10 : f32 to vector<8x128xf32>
    %21 = arith.addf %20, %19 : vector<8x128xf32>
    %22 = arith.divf %20, %21 : vector<8x128xf32>
    %23 = vector.extract_strided_slice %10 {offsets = [0, 256], sizes = [8, 128], strides = [1, 1]} : vector<8x512xf32> to vector<8x128xf32>
    %24 = math.tanh %23 : vector<8x128xf32>
    %25 = vector.extract_strided_slice %10 {offsets = [0, 384], sizes = [8, 128], strides = [1, 1]} : vector<8x512xf32> to vector<8x128xf32>
    %26 = arith.negf %25 : vector<8x128xf32>
    %27 = math.exp %26 : vector<8x128xf32>
    %cst_11 = arith.constant 1.000000e+00 : f32
    %28 = vector.broadcast %cst_11 : f32 to vector<8x128xf32>
    %29 = arith.addf %28, %27 : vector<8x128xf32>
    %30 = arith.divf %28, %29 : vector<8x128xf32>
    %31 = arith.mulf %22, %5 : vector<8x128xf32>
    %32 = arith.mulf %16, %24 : vector<8x128xf32>
    %33 = arith.addf %31, %32 : vector<8x128xf32>
    %34 = math.tanh %33 : vector<8x128xf32>
    %35 = arith.mulf %30, %34 : vector<8x128xf32>
    %c8_i32 = arith.constant 8 : i32
    %36 = arith.muli %c0_i32_6, %c8_i32 : i32
    %37 = tpu.assume_multiple %36, 8 : i32
    %38 = arith.index_cast %37 : i32 to index
    %c0_12 = arith.constant 0 : index
    %39 = vector.load %arg11[%38, %c0_12] : memref<64x128xf32, #tpu.memory_space<vmem>>, vector<8x128xf32>
    tpu.vector_store %arg11[%38, %c0_12], %35 {strides = array<i32>} : memref<64x128xf32, #tpu.memory_space<vmem>>, vector<8x128xf32>,
    %c1_i32 = arith.constant 1 : i32
    %40 = arith.index_cast %c1_i32 : i32 to index
    %c0_13 = arith.constant 0 : index
    %c0_14 = arith.constant 0 : index
    %41 = vector.load %arg2[%40, %c0_13, %c0_14] : memref<8x8x512xf32, #tpu.memory_space<vmem>>, vector<1x8x512xf32>
    %42 = vector.shape_cast %41 : vector<1x8x512xf32> to vector<8x512xf32>
    %cst_15 = arith.constant dense<0.000000e+00> : vector<8x512xf32>
    %43 = tpu.matmul %35, %3, %cst_15 {dimension_numbers = #tpu.dot_dimension_numbers<[1], [0], [0], [1], [0, 0, 1, 1], [], []>} : vector<8x128xf32>, vector<128x512xf32>, vector<8x512xf32> -> vector<8x512xf32>
    %44 = arith.addf %42, %43 : vector<8x512xf32>
    %45 = vector.extract_strided_slice %44 {offsets = [0, 0], sizes = [8, 128], strides = [1, 1]} : vector<8x512xf32> to vector<8x128xf32>
    %46 = arith.negf %45 : vector<8x128xf32>
    %47 = math.exp %46 : vector<8x128xf32>
    %cst_16 = arith.constant 1.000000e+00 : f32
    %48 = vector.broadcast %cst_16 : f32 to vector<8x128xf32>
    %49 = arith.addf %48, %47 : vector<8x128xf32>
    %50 = arith.divf %48, %49 : vector<8x128xf32>
    %51 = vector.extract_strided_slice %44 {offsets = [0, 128], sizes = [8, 128], strides = [1, 1]} : vector<8x512xf32> to vector<8x128xf32>
    %52 = arith.negf %51 : vector<8x128xf32>
    %53 = math.exp %52 : vector<8x128xf32>
    %cst_17 = arith.constant 1.000000e+00 : f32
    %54 = vector.broadcast %cst_17 : f32 to vector<8x128xf32>
    %55 = arith.addf %54, %53 : vector<8x128xf32>
    %56 = arith.divf %54, %55 : vector<8x128xf32>
    %57 = vector.extract_strided_slice %44 {offsets = [0, 256], sizes = [8, 128], strides = [1, 1]} : vector<8x512xf32> to vector<8x128xf32>
    %58 = math.tanh %57 : vector<8x128xf32>
    %59 = vector.extract_strided_slice %44 {offsets = [0, 384], sizes = [8, 128], strides = [1, 1]} : vector<8x512xf32> to vector<8x128xf32>
    %60 = arith.negf %59 : vector<8x128xf32>
    %61 = math.exp %60 : vector<8x128xf32>
    %cst_18 = arith.constant 1.000000e+00 : f32
    %62 = vector.broadcast %cst_18 : f32 to vector<8x128xf32>
    %63 = arith.addf %62, %61 : vector<8x128xf32>
    %64 = arith.divf %62, %63 : vector<8x128xf32>
    %65 = arith.mulf %56, %33 : vector<8x128xf32>
    %66 = arith.mulf %50, %58 : vector<8x128xf32>
    %67 = arith.addf %65, %66 : vector<8x128xf32>
    %68 = math.tanh %67 : vector<8x128xf32>
    %69 = arith.mulf %64, %68 : vector<8x128xf32>
    %c8_i32_19 = arith.constant 8 : i32
    %70 = arith.muli %c1_i32, %c8_i32_19 : i32
    %71 = tpu.assume_multiple %70, 8 : i32
    %72 = arith.index_cast %71 : i32 to index
    %c0_20 = arith.constant 0 : index
    %73 = vector.load %arg11[%72, %c0_20] : memref<64x128xf32, #tpu.memory_space<vmem>>, vector<8x128xf32>
    tpu.vector_store %arg11[%72, %c0_20], %69 {strides = array<i32>} : memref<64x128xf32, #tpu.memory_space<vmem>>, vector<8x128xf32>,
    %c2_i32 = arith.constant 2 : i32
    %74 = arith.index_cast %c2_i32 : i32 to index
    %c0_21 = arith.constant 0 : index
    %c0_22 = arith.constant 0 : index
    %75 = vector.load %arg2[%74, %c0_21, %c0_22] : memref<8x8x512xf32, #tpu.memory_space<vmem>>, vector<1x8x512xf32>
    %76 = vector.shape_cast %75 : vector<1x8x512xf32> to vector<8x512xf32>
    %cst_23 = arith.constant dense<0.000000e+00> : vector<8x512xf32>
    %77 = tpu.matmul %69, %3, %cst_23 {dimension_numbers = #tpu.dot_dimension_numbers<[1], [0], [0], [1], [0, 0, 1, 1], [], []>} : vector<8x128xf32>, vector<128x512xf32>, vector<8x512xf32> -> vector<8x512xf32>
    %78 = arith.addf %76, %77 : vector<8x512xf32>
    %79 = vector.extract_strided_slice %78 {offsets = [0, 0], sizes = [8, 128], strides = [1, 1]} : vector<8x512xf32> to vector<8x128xf32>
    %80 = arith.negf %79 : vector<8x128xf32>
    %81 = math.exp %80 : vector<8x128xf32>
    %cst_24 = arith.constant 1.000000e+00 : f32
    %82 = vector.broadcast %cst_24 : f32 to vector<8x128xf32>
    %83 = arith.addf %82, %81 : vector<8x128xf32>
    %84 = arith.divf %82, %83 : vector<8x128xf32>
    %85 = vector.extract_strided_slice %78 {offsets = [0, 128], sizes = [8, 128], strides = [1, 1]} : vector<8x512xf32> to vector<8x128xf32>
    %86 = arith.negf %85 : vector<8x128xf32>
    %87 = math.exp %86 : vector<8x128xf32>
    %cst_25 = arith.constant 1.000000e+00 : f32
    %88 = vector.broadcast %cst_25 : f32 to vector<8x128xf32>
    %89 = arith.addf %88, %87 : vector<8x128xf32>
    %90 = arith.divf %88, %89 : vector<8x128xf32>
    %91 = vector.extract_strided_slice %78 {offsets = [0, 256], sizes = [8, 128], strides = [1, 1]} : vector<8x512xf32> to vector<8x128xf32>
    %92 = math.tanh %91 : vector<8x128xf32>
    %93 = vector.extract_strided_slice %78 {offsets = [0, 384], sizes = [8, 128], strides = [1, 1]} : vector<8x512xf32> to vector<8x128xf32>
    %94 = arith.negf %93 : vector<8x128xf32>
    %95 = math.exp %94 : vector<8x128xf32>
    %cst_26 = arith.constant 1.000000e+00 : f32
    %96 = vector.broadcast %cst_26 : f32 to vector<8x128xf32>
    %97 = arith.addf %96, %95 : vector<8x128xf32>
    %98 = arith.divf %96, %97 : vector<8x128xf32>
    %99 = arith.mulf %90, %67 : vector<8x128xf32>
    %100 = arith.mulf %84, %92 : vector<8x128xf32>
    %101 = arith.addf %99, %100 : vector<8x128xf32>
    %102 = math.tanh %101 : vector<8x128xf32>
    %103 = arith.mulf %98, %102 : vector<8x128xf32>
    %c8_i32_27 = arith.constant 8 : i32
    %104 = arith.muli %c2_i32, %c8_i32_27 : i32
    %105 = tpu.assume_multiple %104, 8 : i32
    %106 = arith.index_cast %105 : i32 to index
    %c0_28 = arith.constant 0 : index
    %107 = vector.load %arg11[%106, %c0_28] : memref<64x128xf32, #tpu.memory_space<vmem>>, vector<8x128xf32>
    tpu.vector_store %arg11[%106, %c0_28], %103 {strides = array<i32>} : memref<64x128xf32, #tpu.memory_space<vmem>>, vector<8x128xf32>,
    %c3_i32 = arith.constant 3 : i32
    %108 = arith.index_cast %c3_i32 : i32 to index
    %c0_29 = arith.constant 0 : index
    %c0_30 = arith.constant 0 : index
    %109 = vector.load %arg2[%108, %c0_29, %c0_30] : memref<8x8x512xf32, #tpu.memory_space<vmem>>, vector<1x8x512xf32>
    %110 = vector.shape_cast %109 : vector<1x8x512xf32> to vector<8x512xf32>
    %cst_31 = arith.constant dense<0.000000e+00> : vector<8x512xf32>
    %111 = tpu.matmul %103, %3, %cst_31 {dimension_numbers = #tpu.dot_dimension_numbers<[1], [0], [0], [1], [0, 0, 1, 1], [], []>} : vector<8x128xf32>, vector<128x512xf32>, vector<8x512xf32> -> vector<8x512xf32>
    %112 = arith.addf %110, %111 : vector<8x512xf32>
    %113 = vector.extract_strided_slice %112 {offsets = [0, 0], sizes = [8, 128], strides = [1, 1]} : vector<8x512xf32> to vector<8x128xf32>
    %114 = arith.negf %113 : vector<8x128xf32>
    %115 = math.exp %114 : vector<8x128xf32>
    %cst_32 = arith.constant 1.000000e+00 : f32
    %116 = vector.broadcast %cst_32 : f32 to vector<8x128xf32>
    %117 = arith.addf %116, %115 : vector<8x128xf32>
    %118 = arith.divf %116, %117 : vector<8x128xf32>
    %119 = vector.extract_strided_slice %112 {offsets = [0, 128], sizes = [8, 128], strides = [1, 1]} : vector<8x512xf32> to vector<8x128xf32>
    %120 = arith.negf %119 : vector<8x128xf32>
    %121 = math.exp %120 : vector<8x128xf32>
    %cst_33 = arith.constant 1.000000e+00 : f32
    %122 = vector.broadcast %cst_33 : f32 to vector<8x128xf32>
    %123 = arith.addf %122, %121 : vector<8x128xf32>
    %124 = arith.divf %122, %123 : vector<8x128xf32>
    %125 = vector.extract_strided_slice %112 {offsets = [0, 256], sizes = [8, 128], strides = [1, 1]} : vector<8x512xf32> to vector<8x128xf32>
    %126 = math.tanh %125 : vector<8x128xf32>
    %127 = vector.extract_strided_slice %112 {offsets = [0, 384], sizes = [8, 128], strides = [1, 1]} : vector<8x512xf32> to vector<8x128xf32>
    %128 = arith.negf %127 : vector<8x128xf32>
    %129 = math.exp %128 : vector<8x128xf32>
    %cst_34 = arith.constant 1.000000e+00 : f32
    %130 = vector.broadcast %cst_34 : f32 to vector<8x128xf32>
    %131 = arith.addf %130, %129 : vector<8x128xf32>
    %132 = arith.divf %130, %131 : vector<8x128xf32>
    %133 = arith.mulf %124, %101 : vector<8x128xf32>
    %134 = arith.mulf %118, %126 : vector<8x128xf32>
    %135 = arith.addf %133, %134 : vector<8x128xf32>
    %136 = math.tanh %135 : vector<8x128xf32>
    %137 = arith.mulf %132, %136 : vector<8x128xf32>
    %c8_i32_35 = arith.constant 8 : i32
    %138 = arith.muli %c3_i32, %c8_i32_35 : i32
    %139 = tpu.assume_multiple %138, 8 : i32
    %140 = arith.index_cast %139 : i32 to index
    %c0_36 = arith.constant 0 : index
    %141 = vector.load %arg11[%140, %c0_36] : memref<64x128xf32, #tpu.memory_space<vmem>>, vector<8x128xf32>
    tpu.vector_store %arg11[%140, %c0_36], %137 {strides = array<i32>} : memref<64x128xf32, #tpu.memory_space<vmem>>, vector<8x128xf32>,
    %c4_i32 = arith.constant 4 : i32
    %142 = arith.index_cast %c4_i32 : i32 to index
    %c0_37 = arith.constant 0 : index
    %c0_38 = arith.constant 0 : index
    %143 = vector.load %arg2[%142, %c0_37, %c0_38] : memref<8x8x512xf32, #tpu.memory_space<vmem>>, vector<1x8x512xf32>
    %144 = vector.shape_cast %143 : vector<1x8x512xf32> to vector<8x512xf32>
    %cst_39 = arith.constant dense<0.000000e+00> : vector<8x512xf32>
    %145 = tpu.matmul %137, %3, %cst_39 {dimension_numbers = #tpu.dot_dimension_numbers<[1], [0], [0], [1], [0, 0, 1, 1], [], []>} : vector<8x128xf32>, vector<128x512xf32>, vector<8x512xf32> -> vector<8x512xf32>
    %146 = arith.addf %144, %145 : vector<8x512xf32>
    %147 = vector.extract_strided_slice %146 {offsets = [0, 0], sizes = [8, 128], strides = [1, 1]} : vector<8x512xf32> to vector<8x128xf32>
    %148 = arith.negf %147 : vector<8x128xf32>
    %149 = math.exp %148 : vector<8x128xf32>
    %cst_40 = arith.constant 1.000000e+00 : f32
    %150 = vector.broadcast %cst_40 : f32 to vector<8x128xf32>
    %151 = arith.addf %150, %149 : vector<8x128xf32>
    %152 = arith.divf %150, %151 : vector<8x128xf32>
    %153 = vector.extract_strided_slice %146 {offsets = [0, 128], sizes = [8, 128], strides = [1, 1]} : vector<8x512xf32> to vector<8x128xf32>
    %154 = arith.negf %153 : vector<8x128xf32>
    %155 = math.exp %154 : vector<8x128xf32>
    %cst_41 = arith.constant 1.000000e+00 : f32
    %156 = vector.broadcast %cst_41 : f32 to vector<8x128xf32>
    %157 = arith.addf %156, %155 : vector<8x128xf32>
    %158 = arith.divf %156, %157 : vector<8x128xf32>
    %159 = vector.extract_strided_slice %146 {offsets = [0, 256], sizes = [8, 128], strides = [1, 1]} : vector<8x512xf32> to vector<8x128xf32>
    %160 = math.tanh %159 : vector<8x128xf32>
    %161 = vector.extract_strided_slice %146 {offsets = [0, 384], sizes = [8, 128], strides = [1, 1]} : vector<8x512xf32> to vector<8x128xf32>
    %162 = arith.negf %161 : vector<8x128xf32>
    %163 = math.exp %162 : vector<8x128xf32>
    %cst_42 = arith.constant 1.000000e+00 : f32
    %164 = vector.broadcast %cst_42 : f32 to vector<8x128xf32>
    %165 = arith.addf %164, %163 : vector<8x128xf32>
    %166 = arith.divf %164, %165 : vector<8x128xf32>
    %167 = arith.mulf %158, %135 : vector<8x128xf32>
    %168 = arith.mulf %152, %160 : vector<8x128xf32>
    %169 = arith.addf %167, %168 : vector<8x128xf32>
    %170 = math.tanh %169 : vector<8x128xf32>
    %171 = arith.mulf %166, %170 : vector<8x128xf32>
    %c8_i32_43 = arith.constant 8 : i32
    %172 = arith.muli %c4_i32, %c8_i32_43 : i32
    %173 = tpu.assume_multiple %172, 8 : i32
    %174 = arith.index_cast %173 : i32 to index
    %c0_44 = arith.constant 0 : index
    %175 = vector.load %arg11[%174, %c0_44] : memref<64x128xf32, #tpu.memory_space<vmem>>, vector<8x128xf32>
    tpu.vector_store %arg11[%174, %c0_44], %171 {strides = array<i32>} : memref<64x128xf32, #tpu.memory_space<vmem>>, vector<8x128xf32>,
    %c5_i32 = arith.constant 5 : i32
    %176 = arith.index_cast %c5_i32 : i32 to index
    %c0_45 = arith.constant 0 : index
    %c0_46 = arith.constant 0 : index
    %177 = vector.load %arg2[%176, %c0_45, %c0_46] : memref<8x8x512xf32, #tpu.memory_space<vmem>>, vector<1x8x512xf32>
    %178 = vector.shape_cast %177 : vector<1x8x512xf32> to vector<8x512xf32>
    %cst_47 = arith.constant dense<0.000000e+00> : vector<8x512xf32>
    %179 = tpu.matmul %171, %3, %cst_47 {dimension_numbers = #tpu.dot_dimension_numbers<[1], [0], [0], [1], [0, 0, 1, 1], [], []>} : vector<8x128xf32>, vector<128x512xf32>, vector<8x512xf32> -> vector<8x512xf32>
    %180 = arith.addf %178, %179 : vector<8x512xf32>
    %181 = vector.extract_strided_slice %180 {offsets = [0, 0], sizes = [8, 128], strides = [1, 1]} : vector<8x512xf32> to vector<8x128xf32>
    %182 = arith.negf %181 : vector<8x128xf32>
    %183 = math.exp %182 : vector<8x128xf32>
    %cst_48 = arith.constant 1.000000e+00 : f32
    %184 = vector.broadcast %cst_48 : f32 to vector<8x128xf32>
    %185 = arith.addf %184, %183 : vector<8x128xf32>
    %186 = arith.divf %184, %185 : vector<8x128xf32>
    %187 = vector.extract_strided_slice %180 {offsets = [0, 128], sizes = [8, 128], strides = [1, 1]} : vector<8x512xf32> to vector<8x128xf32>
    %188 = arith.negf %187 : vector<8x128xf32>
    %189 = math.exp %188 : vector<8x128xf32>
    %cst_49 = arith.constant 1.000000e+00 : f32
    %190 = vector.broadcast %cst_49 : f32 to vector<8x128xf32>
    %191 = arith.addf %190, %189 : vector<8x128xf32>
    %192 = arith.divf %190, %191 : vector<8x128xf32>
    %193 = vector.extract_strided_slice %180 {offsets = [0, 256], sizes = [8, 128], strides = [1, 1]} : vector<8x512xf32> to vector<8x128xf32>
    %194 = math.tanh %193 : vector<8x128xf32>
    %195 = vector.extract_strided_slice %180 {offsets = [0, 384], sizes = [8, 128], strides = [1, 1]} : vector<8x512xf32> to vector<8x128xf32>
    %196 = arith.negf %195 : vector<8x128xf32>
    %197 = math.exp %196 : vector<8x128xf32>
    %cst_50 = arith.constant 1.000000e+00 : f32
    %198 = vector.broadcast %cst_50 : f32 to vector<8x128xf32>
    %199 = arith.addf %198, %197 : vector<8x128xf32>
    %200 = arith.divf %198, %199 : vector<8x128xf32>
    %201 = arith.mulf %192, %169 : vector<8x128xf32>
    %202 = arith.mulf %186, %194 : vector<8x128xf32>
    %203 = arith.addf %201, %202 : vector<8x128xf32>
    %204 = math.tanh %203 : vector<8x128xf32>
    %205 = arith.mulf %200, %204 : vector<8x128xf32>
    %c8_i32_51 = arith.constant 8 : i32
    %206 = arith.muli %c5_i32, %c8_i32_51 : i32
    %207 = tpu.assume_multiple %206, 8 : i32
    %208 = arith.index_cast %207 : i32 to index
    %c0_52 = arith.constant 0 : index
    %209 = vector.load %arg11[%208, %c0_52] : memref<64x128xf32, #tpu.memory_space<vmem>>, vector<8x128xf32>
    tpu.vector_store %arg11[%208, %c0_52], %205 {strides = array<i32>} : memref<64x128xf32, #tpu.memory_space<vmem>>, vector<8x128xf32>,
    %c6_i32 = arith.constant 6 : i32
    %210 = arith.index_cast %c6_i32 : i32 to index
    %c0_53 = arith.constant 0 : index
    %c0_54 = arith.constant 0 : index
    %211 = vector.load %arg2[%210, %c0_53, %c0_54] : memref<8x8x512xf32, #tpu.memory_space<vmem>>, vector<1x8x512xf32>
    %212 = vector.shape_cast %211 : vector<1x8x512xf32> to vector<8x512xf32>
    %cst_55 = arith.constant dense<0.000000e+00> : vector<8x512xf32>
    %213 = tpu.matmul %205, %3, %cst_55 {dimension_numbers = #tpu.dot_dimension_numbers<[1], [0], [0], [1], [0, 0, 1, 1], [], []>} : vector<8x128xf32>, vector<128x512xf32>, vector<8x512xf32> -> vector<8x512xf32>
    %214 = arith.addf %212, %213 : vector<8x512xf32>
    %215 = vector.extract_strided_slice %214 {offsets = [0, 0], sizes = [8, 128], strides = [1, 1]} : vector<8x512xf32> to vector<8x128xf32>
    %216 = arith.negf %215 : vector<8x128xf32>
    %217 = math.exp %216 : vector<8x128xf32>
    %cst_56 = arith.constant 1.000000e+00 : f32
    %218 = vector.broadcast %cst_56 : f32 to vector<8x128xf32>
    %219 = arith.addf %218, %217 : vector<8x128xf32>
    %220 = arith.divf %218, %219 : vector<8x128xf32>
    %221 = vector.extract_strided_slice %214 {offsets = [0, 128], sizes = [8, 128], strides = [1, 1]} : vector<8x512xf32> to vector<8x128xf32>
    %222 = arith.negf %221 : vector<8x128xf32>
    %223 = math.exp %222 : vector<8x128xf32>
    %cst_57 = arith.constant 1.000000e+00 : f32
    %224 = vector.broadcast %cst_57 : f32 to vector<8x128xf32>
    %225 = arith.addf %224, %223 : vector<8x128xf32>
    %226 = arith.divf %224, %225 : vector<8x128xf32>
    %227 = vector.extract_strided_slice %214 {offsets = [0, 256], sizes = [8, 128], strides = [1, 1]} : vector<8x512xf32> to vector<8x128xf32>
    %228 = math.tanh %227 : vector<8x128xf32>
    %229 = vector.extract_strided_slice %214 {offsets = [0, 384], sizes = [8, 128], strides = [1, 1]} : vector<8x512xf32> to vector<8x128xf32>
    %230 = arith.negf %229 : vector<8x128xf32>
    %231 = math.exp %230 : vector<8x128xf32>
    %cst_58 = arith.constant 1.000000e+00 : f32
    %232 = vector.broadcast %cst_58 : f32 to vector<8x128xf32>
    %233 = arith.addf %232, %231 : vector<8x128xf32>
    %234 = arith.divf %232, %233 : vector<8x128xf32>
    %235 = arith.mulf %226, %203 : vector<8x128xf32>
    %236 = arith.mulf %220, %228 : vector<8x128xf32>
    %237 = arith.addf %235, %236 : vector<8x128xf32>
    %238 = math.tanh %237 : vector<8x128xf32>
    %239 = arith.mulf %234, %238 : vector<8x128xf32>
    %c8_i32_59 = arith.constant 8 : i32
    %240 = arith.muli %c6_i32, %c8_i32_59 : i32
    %241 = tpu.assume_multiple %240, 8 : i32
    %242 = arith.index_cast %241 : i32 to index
    %c0_60 = arith.constant 0 : index
    %243 = vector.load %arg11[%242, %c0_60] : memref<64x128xf32, #tpu.memory_space<vmem>>, vector<8x128xf32>
    tpu.vector_store %arg11[%242, %c0_60], %239 {strides = array<i32>} : memref<64x128xf32, #tpu.memory_space<vmem>>, vector<8x128xf32>,
    %c7_i32 = arith.constant 7 : i32
    %244 = arith.index_cast %c7_i32 : i32 to index
    %c0_61 = arith.constant 0 : index
    %c0_62 = arith.constant 0 : index
    %245 = vector.load %arg2[%244, %c0_61, %c0_62] : memref<8x8x512xf32, #tpu.memory_space<vmem>>, vector<1x8x512xf32>
    %246 = vector.shape_cast %245 : vector<1x8x512xf32> to vector<8x512xf32>
    %cst_63 = arith.constant dense<0.000000e+00> : vector<8x512xf32>
    %247 = tpu.matmul %239, %3, %cst_63 {dimension_numbers = #tpu.dot_dimension_numbers<[1], [0], [0], [1], [0, 0, 1, 1], [], []>} : vector<8x128xf32>, vector<128x512xf32>, vector<8x512xf32> -> vector<8x512xf32>
    %248 = arith.addf %246, %247 : vector<8x512xf32>
    %249 = vector.extract_strided_slice %248 {offsets = [0, 0], sizes = [8, 128], strides = [1, 1]} : vector<8x512xf32> to vector<8x128xf32>
    %250 = arith.negf %249 : vector<8x128xf32>
    %251 = math.exp %250 : vector<8x128xf32>
    %cst_64 = arith.constant 1.000000e+00 : f32
    %252 = vector.broadcast %cst_64 : f32 to vector<8x128xf32>
    %253 = arith.addf %252, %251 : vector<8x128xf32>
    %254 = arith.divf %252, %253 : vector<8x128xf32>
    %255 = vector.extract_strided_slice %248 {offsets = [0, 128], sizes = [8, 128], strides = [1, 1]} : vector<8x512xf32> to vector<8x128xf32>
    %256 = arith.negf %255 : vector<8x128xf32>
    %257 = math.exp %256 : vector<8x128xf32>
    %cst_65 = arith.constant 1.000000e+00 : f32
    %258 = vector.broadcast %cst_65 : f32 to vector<8x128xf32>
    %259 = arith.addf %258, %257 : vector<8x128xf32>
    %260 = arith.divf %258, %259 : vector<8x128xf32>
    %261 = vector.extract_strided_slice %248 {offsets = [0, 256], sizes = [8, 128], strides = [1, 1]} : vector<8x512xf32> to vector<8x128xf32>
    %262 = math.tanh %261 : vector<8x128xf32>
    %263 = vector.extract_strided_slice %248 {offsets = [0, 384], sizes = [8, 128], strides = [1, 1]} : vector<8x512xf32> to vector<8x128xf32>
    %264 = arith.negf %263 : vector<8x128xf32>
    %265 = math.exp %264 : vector<8x128xf32>
    %cst_66 = arith.constant 1.000000e+00 : f32
    %266 = vector.broadcast %cst_66 : f32 to vector<8x128xf32>
    %267 = arith.addf %266, %265 : vector<8x128xf32>
    %268 = arith.divf %266, %267 : vector<8x128xf32>
    %269 = arith.mulf %260, %237 : vector<8x128xf32>
    %270 = arith.mulf %254, %262 : vector<8x128xf32>
    %271 = arith.addf %269, %270 : vector<8x128xf32>
    %272 = math.tanh %271 : vector<8x128xf32>
    %273 = arith.mulf %268, %272 : vector<8x128xf32>
    %c8_i32_67 = arith.constant 8 : i32
    %274 = arith.muli %c7_i32, %c8_i32_67 : i32
    %275 = tpu.assume_multiple %274, 8 : i32
    %276 = arith.index_cast %275 : i32 to index
    %c0_68 = arith.constant 0 : index
    %277 = vector.load %arg11[%276, %c0_68] : memref<64x128xf32, #tpu.memory_space<vmem>>, vector<8x128xf32>
    tpu.vector_store %arg11[%276, %c0_68], %273 {strides = array<i32>} : memref<64x128xf32, #tpu.memory_space<vmem>>, vector<8x128xf32>,
    %c8_i32_69 = arith.constant 8 : i32
    %c0_70 = arith.constant 0 : index
    %c0_71 = arith.constant 0 : index
    %278 = vector.load %arg9[%c0_70, %c0_71] : memref<8x128xf32, #tpu.memory_space<vmem>>, vector<8x128xf32>
    tpu.vector_store %arg9[%c0_70, %c0_71], %273 {strides = array<i32>} : memref<8x128xf32, #tpu.memory_space<vmem>>, vector<8x128xf32>,
    %c0_72 = arith.constant 0 : index
    %c0_73 = arith.constant 0 : index
    %279 = vector.load %arg10[%c0_72, %c0_73] : memref<8x128xf32, #tpu.memory_space<vmem>>, vector<8x128xf32>
    tpu.vector_store %arg10[%c0_72, %c0_73], %271 {strides = array<i32>} : memref<8x128xf32, #tpu.memory_space<vmem>>, vector<8x128xf32>,
    %c0_i32_74 = arith.constant 0 : i32
    %280 = arith.cmpi eq, %arg1, %c0_i32_74 : i32
    %281 = arith.extui %280 : i1 to i32
    %c0_i32_75 = arith.constant 0 : i32
    %282 = arith.cmpi ne, %281, %c0_i32_75 : i32
    scf.if %282 {
      %c0_86 = arith.constant 0 : index
      %c0_87 = arith.constant 0 : index
      %291 = vector.load %arg7[%c0_86, %c0_87] : memref<8x128xf32, #tpu.memory_space<vmem>>, vector<8x128xf32>
      tpu.vector_store %arg7[%c0_86, %c0_87], %273 {strides = array<i32>} : memref<8x128xf32, #tpu.memory_space<vmem>>, vector<8x128xf32>,
      %c0_88 = arith.constant 0 : index
      %c0_89 = arith.constant 0 : index
      %292 = vector.load %arg8[%c0_88, %c0_89] : memref<8x128xf32, #tpu.memory_space<vmem>>, vector<8x128xf32>
      tpu.vector_store %arg8[%c0_88, %c0_89], %271 {strides = array<i32>} : memref<8x128xf32, #tpu.memory_space<vmem>>, vector<8x128xf32>,
    } else {
    }
    %c0_76 = arith.constant 0 : index
    %c0_77 = arith.constant 0 : index
    %283 = vector.load %arg11[%c0_76, %c0_77] : memref<64x128xf32, #tpu.memory_space<vmem>>, vector<64x128xf32>
    %c0_78 = arith.constant 0 : index
    %c0_79 = arith.constant 0 : index
    %284 = vector.load %arg4[%c0_78, %c0_79] : memref<128x128xf32, #tpu.memory_space<vmem>>, vector<128x128xf32>
    %cst_80 = arith.constant dense<0.000000e+00> : vector<64x128xf32>
    %285 = tpu.matmul %283, %284, %cst_80 {dimension_numbers = #tpu.dot_dimension_numbers<[1], [0], [0], [1], [0, 0, 1, 1], [], []>} : vector<64x128xf32>, vector<128x128xf32>, vector<64x128xf32> -> vector<64x128xf32>
    %c0_81 = arith.constant 0 : index
    %c0_82 = arith.constant 0 : index
    %286 = vector.load %arg5[%c0_81, %c0_82] : memref<1x128xf32, #tpu.memory_space<vmem>>, vector<1x128xf32>
    %287 = vector.broadcast %286 : vector<1x128xf32> to vector<64x128xf32>
    %288 = arith.addf %285, %287 : vector<64x128xf32>
    %289 = vector.shape_cast %288 : vector<64x128xf32> to vector<8x8x128xf32>
    %c0_83 = arith.constant 0 : index
    %c0_84 = arith.constant 0 : index
    %c0_85 = arith.constant 0 : index
    %290 = vector.load %arg6[%c0_83, %c0_84, %c0_85] : memref<8x8x128xf32, #tpu.memory_space<vmem>>, vector<8x8x128xf32>
    tpu.vector_store %arg6[%c0_83, %c0_84, %c0_85], %289 {strides = array<i32>} : memref<8x8x128xf32, #tpu.memory_space<vmem>>, vector<8x8x128xf32>,
    return
  }
  func.func @transform_0(%arg0: i32, %arg1: i32) -> (i32, i32, i32) {
    %c0_i32 = arith.constant 0 : i32
    %c0_i32_0 = arith.constant 0 : i32
    return %arg1, %arg0, %c0_i32 : i32, i32, i32
  }
  func.func @transform_1(%arg0: i32, %arg1: i32) -> (i32, i32) {
    %c0_i32 = arith.constant 0 : i32
    %c0_i32_0 = arith.constant 0 : i32
    %c0_i32_1 = arith.constant 0 : i32
    return %c0_i32, %c0_i32_0 : i32, i32
  }
  func.func @transform_2(%arg0: i32, %arg1: i32) -> (i32, i32) {
    %c0_i32 = arith.constant 0 : i32
    %c0_i32_0 = arith.constant 0 : i32
    %c0_i32_1 = arith.constant 0 : i32
    return %c0_i32, %c0_i32_0 : i32, i32
  }
  func.func @transform_3(%arg0: i32, %arg1: i32) -> (i32, i32) {
    %c0_i32 = arith.constant 0 : i32
    %c0_i32_0 = arith.constant 0 : i32
    %c0_i32_1 = arith.constant 0 : i32
    return %c0_i32, %c0_i32_0 : i32, i32
  }
  func.func @transform_4(%arg0: i32, %arg1: i32) -> (i32, i32, i32) {
    %c0_i32 = arith.constant 0 : i32
    %c0_i32_0 = arith.constant 0 : i32
    return %arg1, %arg0, %c0_i32 : i32, i32, i32
  }
  func.func @transform_5(%arg0: i32, %arg1: i32) -> (i32, i32) {
    %c0_i32 = arith.constant 0 : i32
    %c0_i32_0 = arith.constant 0 : i32
    return %arg0, %c0_i32 : i32, i32
  }
  func.func @transform_6(%arg0: i32, %arg1: i32) -> (i32, i32) {
    %c0_i32 = arith.constant 0 : i32
    %c0_i32_0 = arith.constant 0 : i32
    return %arg0, %c0_i32 : i32, i32
  }
}

</mosaic_0001>

<bundles_post_ra>
// kernel: decoder_forward.2
= control target key start
LH: loop header
LB: loop body
LE: loop exit
PB: predicated region body
PF: predicated region fallthrough
CT: control target
= control target key end

     0   :  { %s671_s1 = inlined_call_operand.vmem [shape: f32[128,512], index: 1, kind: input, shape index: {}]   ;;  %s672_s0 = inlined_call_operand.vmem [shape: f32[64,128], index: 0, kind: input, shape index: {}]   ;;  %s673_s2 = inlined_call_operand.vmem [shape: f32[1,512], index: 2, kind: input, shape index: {}]   ;;  %s674_s3 = inlined_call_operand.vmem [shape: f32[64,512], index: 3, kind: output, shape index: {}]  }
   0x1   :  { %v84_v0 = vld [vmem:[%s671_s1 + $0x1f0] sm:$0xff]  ;;  %v85_v1 = vld [vmem:[%s671_s1 + $0x1f8] sm:$0xff]  ;;  %v82_v6 = vld [vmem:[%s671_s1 + $0x1e0] sm:$0xff] }
   0x2   :  { %v80_v2 = vld [vmem:[%s671_s1 + $0x1d0] sm:$0xff]  ;;  %178 = vmatpush.msra.mxu2 %v84_v0  ;;  %219 = vmatpush.msra.mxu3 %v85_v1  ;;  %v81_v3 = vld [vmem:[%s671_s1 + $0x1d8] sm:$0xff]  ;;  %v83_v7 = vld [vmem:[%s671_s1 + $0x1e8] sm:$0xff] }
   0x3   :  { %v76_v4 = vld [vmem:[%s671_s1 + $0x1b0] sm:$0xff]  ;;  %v77_v5 = vld [vmem:[%s671_s1 + $0x1b8] sm:$0xff]  ;;  %v78_v8 = vld [vmem:[%s671_s1 + $0x1c0] sm:$0xff]  ;;  %96 = vmatpush.msra.mxu0 %v82_v6  ;;  %137 = vmatpush.msra.mxu1 %v83_v7 }
   0x4   :  { %179 = vmatpush.msra.mxu2 %v80_v2  ;;  %220 = vmatpush.msra.mxu3 %v81_v3  ;;  %v79_v9 = vld [vmem:[%s671_s1 + $0x1c8] sm:$0xff]  ;;  %v72_v10 = vld [vmem:[%s671_s1 + $0x190] sm:$0xff]  ;;  %v73_v11 = vld [vmem:[%s671_s1 + $0x198] sm:$0xff] }
   0x5   :  { %v74_v12 = vld [vmem:[%s671_s1 + $0x1a0] sm:$0xff]  ;;  %v75_v13 = vld [vmem:[%s671_s1 + $0x1a8] sm:$0xff]  ;;  %97 = vmatpush.msra.mxu0 %v78_v8  ;;  %138 = vmatpush.msra.mxu1 %v79_v9  ;;  %v68_v14 = vld [vmem:[%s671_s1 + $0x170] sm:$0xff] }
   0x6   :  { %180 = vmatpush.msra.mxu2 %v76_v4  ;;  %221 = vmatpush.msra.mxu3 %v77_v5  ;;  %v69_v15 = vld [vmem:[%s671_s1 + $0x178] sm:$0xff]  ;;  %v70_v16 = vld [vmem:[%s671_s1 + $0x180] sm:$0xff]  ;;  %v71_v17 = vld [vmem:[%s671_s1 + $0x188] sm:$0xff] }
   0x7   :  { %98 = vmatpush.msra.mxu0 %v74_v12  ;;  %139 = vmatpush.msra.mxu1 %v75_v13  ;;  %v64_v18 = vld [vmem:[%s671_s1 + $0x150] sm:$0xff]  ;;  %v65_v19 = vld [vmem:[%s671_s1 + $0x158] sm:$0xff]  ;;  %v66_v20 = vld [vmem:[%s671_s1 + $0x160] sm:$0xff] }
   0x8   :  { %181 = vmatpush.msra.mxu2 %v72_v10  ;;  %222 = vmatpush.msra.mxu3 %v73_v11  ;;  %v67_v21 = vld [vmem:[%s671_s1 + $0x168] sm:$0xff]  ;;  %v60_v22 = vld [vmem:[%s671_s1 + $0x130] sm:$0xff]  ;;  %v61_v23 = vld [vmem:[%s671_s1 + $0x138] sm:$0xff] }
   0x9   :  { %99 = vmatpush.msra.mxu0 %v70_v16  ;;  %140 = vmatpush.msra.mxu1 %v71_v17  ;;  %v62_v24 = vld [vmem:[%s671_s1 + $0x140] sm:$0xff]  ;;  %v63_v25 = vld [vmem:[%s671_s1 + $0x148] sm:$0xff]  ;;  %v56_v26 = vld [vmem:[%s671_s1 + $0x110] sm:$0xff] }
   0xa   :  { %182 = vmatpush.msra.mxu2 %v68_v14  ;;  %223 = vmatpush.msra.mxu3 %v69_v15  ;;  %v57_v27 = vld [vmem:[%s671_s1 + $0x118] sm:$0xff]  ;;  %v58_v28 = vld [vmem:[%s671_s1 + $0x120] sm:$0xff]  ;;  %v59_v29 = vld [vmem:[%s671_s1 + $0x128] sm:$0xff] }
   0xb   :  { %100 = vmatpush.msra.mxu0 %v66_v20  ;;  %141 = vmatpush.msra.mxu1 %v67_v21  ;;  %v52_v30 = vld [vmem:[%s671_s1 + $0xf0] sm:$0xff]  ;;  %v53_v31 = vld [vmem:[%s671_s1 + $0xf8] sm:$0xff]  ;;  %v54_v32 = vld [vmem:[%s671_s1 + $0x100] sm:$0xff] }
   0xc   :  { %183 = vmatpush.msra.mxu2 %v64_v18  ;;  %224 = vmatpush.msra.mxu3 %v65_v19  ;;  %v55_v33 = vld [vmem:[%s671_s1 + $0x108] sm:$0xff]  ;;  %v48_v34 = vld [vmem:[%s671_s1 + $0xd0] sm:$0xff]  ;;  %v49_v35 = vld [vmem:[%s671_s1 + $0xd8] sm:$0xff] }
   0xd   :  { %101 = vmatpush.msra.mxu0 %v62_v24  ;;  %142 = vmatpush.msra.mxu1 %v63_v25  ;;  %v50_v36 = vld [vmem:[%s671_s1 + $0xe0] sm:$0xff]  ;;  %v51_v37 = vld [vmem:[%s671_s1 + $0xe8] sm:$0xff]  ;;  %v44_v38 = vld [vmem:[%s671_s1 + $0xb0] sm:$0xff] }
   0xe   :  { %184 = vmatpush.msra.mxu2 %v60_v22  ;;  %225 = vmatpush.msra.mxu3 %v61_v23  ;;  %v45_v39 = vld [vmem:[%s671_s1 + $0xb8] sm:$0xff]  ;;  %v46_v40 = vld [vmem:[%s671_s1 + $0xc0] sm:$0xff]  ;;  %v47_v41 = vld [vmem:[%s671_s1 + $0xc8] sm:$0xff] }
   0xf   :  { %102 = vmatpush.msra.mxu0 %v58_v28  ;;  %143 = vmatpush.msra.mxu1 %v59_v29  ;;  %v40_v42 = vld [vmem:[%s671_s1 + $0x90] sm:$0xff]  ;;  %v41_v43 = vld [vmem:[%s671_s1 + $0x98] sm:$0xff]  ;;  %v42_v44 = vld [vmem:[%s671_s1 + $0xa0] sm:$0xff] }
  0x10   :  { %185 = vmatpush.msra.mxu2 %v56_v26  ;;  %226 = vmatpush.msra.mxu3 %v57_v27  ;;  %v43_v45 = vld [vmem:[%s671_s1 + $0xa8] sm:$0xff]  ;;  %v36_v46 = vld [vmem:[%s671_s1 + $0x70] sm:$0xff]  ;;  %v37_v47 = vld [vmem:[%s671_s1 + $0x78] sm:$0xff] }
  0x11   :  { %103 = vmatpush.msra.mxu0 %v54_v32  ;;  %144 = vmatpush.msra.mxu1 %v55_v33  ;;  %v38_v48 = vld [vmem:[%s671_s1 + $0x80] sm:$0xff]  ;;  %v39_v49 = vld [vmem:[%s671_s1 + $0x88] sm:$0xff]  ;;  %v32_v50 = vld [vmem:[%s671_s1 + $0x50] sm:$0xff] }
  0x12   :  { %186 = vmatpush.msra.mxu2 %v52_v30  ;;  %227 = vmatpush.msra.mxu3 %v53_v31  ;;  %v33_v51 = vld [vmem:[%s671_s1 + $0x58] sm:$0xff]  ;;  %v34_v52 = vld [vmem:[%s671_s1 + $0x60] sm:$0xff]  ;;  %v35_v53 = vld [vmem:[%s671_s1 + $0x68] sm:$0xff] }
  0x13   :  { %104 = vmatpush.msra.mxu0 %v50_v36  ;;  %145 = vmatpush.msra.mxu1 %v51_v37  ;;  %v28_v54 = vld [vmem:[%s671_s1 + $0x30] sm:$0xff]  ;;  %v29_v55 = vld [vmem:[%s671_s1 + $0x38] sm:$0xff]  ;;  %v30_v56 = vld [vmem:[%s671_s1 + $0x40] sm:$0xff] }
  0x14   :  { %187 = vmatpush.msra.mxu2 %v48_v34  ;;  %228 = vmatpush.msra.mxu3 %v49_v35  ;;  %v31_v57 = vld [vmem:[%s671_s1 + $0x48] sm:$0xff]  ;;  %v24_v58 = vld [vmem:[%s671_s1 + $0x10] sm:$0xff]  ;;  %v25_v59 = vld [vmem:[%s671_s1 + $0x18] sm:$0xff] }
  0x15   :  { %105 = vmatpush.msra.mxu0 %v46_v40  ;;  %146 = vmatpush.msra.mxu1 %v47_v41  ;;  %v14_v60 = vld [vmem:[%s672_s0] sm:$0xff]  ;;  %v27_v62 = vld [vmem:[%s671_s1 + $0x28] sm:$0xff]  ;;  %v16_v2 = vld [vmem:[%s672_s0 + $0x10] sm:$0xff] }
  0x16   :  { %188 = vmatpush.msra.mxu2 %v44_v38  ;;  %229 = vmatpush.msra.mxu3 %v45_v39  ;;  %v26_v61 = vld [vmem:[%s671_s1 + $0x20] sm:$0xff]  ;;  %v23_v0 = vld [vmem:[%s671_s1 + $0x8] sm:$0xff]  ;;  %v17_v3 = vld [vmem:[%s672_s0 + $0x18] sm:$0xff] }
  0x17   :  { %106 = vmatpush.msra.mxu0 %v42_v44  ;;  %147 = vmatpush.msra.mxu1 %v43_v45  ;;  %v22_v63 = vld [vmem:[%s671_s1] sm:$0xff]  ;;  %v15_v1 = vld [vmem:[%s672_s0 + $0x8] sm:$0xff]  ;;  %v20_v6 = vld [vmem:[%s672_s0 + $0x30] sm:$0xff] }
  0x18   :  { %189 = vmatpush.msra.mxu2 %v40_v42  ;;  %230 = vmatpush.msra.mxu3 %v41_v43  ;;  %v18_v4 = vld [vmem:[%s672_s0 + $0x20] sm:$0xff]  ;;  %v19_v5 = vld [vmem:[%s672_s0 + $0x28] sm:$0xff]  ;;  %v21_v7 = vld [vmem:[%s672_s0 + $0x38] sm:$0xff] }
  0x19   :  { %107 = vmatpush.msra.mxu0 %v38_v48  ;;  %148 = vmatpush.msra.mxu1 %v39_v49  ;;  %v86_v8 = vld [vmem:[%s673_s2] sm:$0xf] }
  0x1a   :  { %190 = vmatpush.msra.mxu2 %v36_v46  ;;  %231 = vmatpush.msra.mxu3 %v37_v47  ;;  %v535_v9 = vperm.slane %v86_v8, 0  ;;  %v537_v10 = vperm.slane %v86_v8, 1  ;;  %v539_v11 = vperm.slane %v86_v8, 2  ;;  %v541_v12 = vperm.slane %v86_v8, 3 }
  0x1b   :  { %108 = vmatpush.msra.mxu0 %v34_v52  ;;  %149 = vmatpush.msra.mxu1 %v35_v53 }
  0x1c   :  { %191 = vmatpush.msra.mxu2 %v32_v50  ;;  %232 = vmatpush.msra.mxu3 %v33_v51 }
  0x1d   :  { %109 = vmatpush.msra.mxu0 %v30_v56  ;;  %150 = vmatpush.msra.mxu1 %v31_v57 }
  0x1e   :  { %192 = vmatpush.msra.mxu2 %v28_v54  ;;  %233 = vmatpush.msra.mxu3 %v29_v55 }
  0x1f   :  { %110 = vmatpush.msra.mxu0 %v26_v61  ;;  %151 = vmatpush.msra.mxu1 %v27_v62 }
  0x20   :  { %193 = vmatpush.msra.mxu2 %v24_v58  ;;  %234 = vmatpush.msra.mxu3 %v25_v59 }
  0x21   :  { %194 = vmatmul.f32.vlgmr.msra.gmra.mxu2 %v14_v60  ;;  %235 = vmatmul.f32.vlgmr.msra.gmra.mxu3 %v14_v60 }
  0x22   :  { %111 = vmatpush.msra.mxu0 %v22_v63  ;;  %152 = vmatpush.msra.mxu1 %v23_v0 }
  0x23   :  { %112 = vmatmul.f32.vlgmr.msra.gmra.mxu0 %v14_v60  ;;  %153 = vmatmul.f32.vlgmr.msra.gmra.mxu1 %v14_v60 }
  0x29   :  { %197 = vmatmul.f32.gmra.mxu2 %v15_v1  ;;  %238 = vmatmul.f32.gmra.mxu3 %v15_v1 }
  0x2b   :  { %115 = vmatmul.f32.gmra.mxu0 %v15_v1  ;;  %156 = vmatmul.f32.gmra.mxu1 %v15_v1 }
  0x31   :  { %200 = vmatmul.f32.gmra.mxu2 %v16_v2  ;;  %241 = vmatmul.f32.gmra.mxu3 %v16_v2 }
  0x33   :  { %118 = vmatmul.f32.gmra.mxu0 %v16_v2  ;;  %159 = vmatmul.f32.gmra.mxu1 %v16_v2 }
  0x39   :  { %203 = vmatmul.f32.gmra.mxu2 %v17_v3  ;;  %244 = vmatmul.f32.gmra.mxu3 %v17_v3 }
  0x3b   :  { %121 = vmatmul.f32.gmra.mxu0 %v17_v3  ;;  %162 = vmatmul.f32.gmra.mxu1 %v17_v3 }
  0x41   :  { %206 = vmatmul.f32.gmra.mxu2 %v18_v4  ;;  %247 = vmatmul.f32.gmra.mxu3 %v18_v4 }
  0x43   :  { %124 = vmatmul.f32.gmra.mxu0 %v18_v4  ;;  %165 = vmatmul.f32.gmra.mxu1 %v18_v4 }
  0x49   :  { %209 = vmatmul.f32.gmra.mxu2 %v19_v5  ;;  %250 = vmatmul.f32.gmra.mxu3 %v19_v5 }
  0x4b   :  { %127 = vmatmul.f32.gmra.mxu0 %v19_v5  ;;  %168 = vmatmul.f32.gmra.mxu1 %v19_v5 }
  0x51   :  { %212 = vmatmul.f32.gmra.mxu2 %v20_v6  ;;  %253 = vmatmul.f32.gmra.mxu3 %v20_v6 }
  0x53   :  { %130 = vmatmul.f32.gmra.mxu0 %v20_v6  ;;  %171 = vmatmul.f32.gmra.mxu1 %v20_v6 }
  0x59   :  { %215 = vmatmul.f32.gmra.mxu2 %v21_v7  ;;  %256 = vmatmul.f32.gmra.mxu3 %v21_v7 }
  0x5b   :  { %133 = vmatmul.f32.gmra.mxu0 %v21_v7  ;;  %174 = vmatmul.f32.gmra.mxu1 %v21_v7 }
  0xa0   :  { %v113_v13 = vpop.f32.mrf.mxu0  ;;  %v154_v14 = vpop.f32.mrf.mxu1 }
  0xa1   :  { %v114_v15 = vadd.f32 %v113_v13, %v535_v9  ;;  %v155_v16 = vadd.f32 %v154_v14, %v537_v10 }
  0xa3   :  { %260 = vst [vmem:[%s674_s3] sm:$0xff] %v114_v15 }
  0xa4   :  { %v195_v17 = vpop.f32.mrf.mxu2  ;;  %v236_v18 = vpop.f32.mrf.mxu3  ;;  %261 = vst [vmem:[%s674_s3 + $0x8] sm:$0xff] %v155_v16 }
  0xa5   :  { %v196_v19 = vadd.f32 %v195_v17, %v539_v11  ;;  %v237_v20 = vadd.f32 %v236_v18, %v541_v12 }
  0xa7   :  { %262 = vst [vmem:[%s674_s3 + $0x10] sm:$0xff] %v196_v19 }
  0xa8   :  { %263 = vst [vmem:[%s674_s3 + $0x18] sm:$0xff] %v237_v20  ;;  %v116_v21 = vpop.f32.mrf.mxu0  ;;  %v157_v22 = vpop.f32.mrf.mxu1 }
  0xa9   :  { %v117_v23 = vadd.f32 %v116_v21, %v535_v9  ;;  %v158_v24 = vadd.f32 %v157_v22, %v537_v10 }
  0xab   :  { %264 = vst [vmem:[%s674_s3 + $0x20] sm:$0xff] %v117_v23 }
  0xac   :  { %v198_v25 = vpop.f32.mrf.mxu2  ;;  %v239_v26 = vpop.f32.mrf.mxu3  ;;  %265 = vst [vmem:[%s674_s3 + $0x28] sm:$0xff] %v158_v24 }
  0xad   :  { %v199_v27 = vadd.f32 %v198_v25, %v539_v11  ;;  %v240_v28 = vadd.f32 %v239_v26, %v541_v12 }
  0xaf   :  { %266 = vst [vmem:[%s674_s3 + $0x30] sm:$0xff] %v199_v27 }
  0xb0   :  { %267 = vst [vmem:[%s674_s3 + $0x38] sm:$0xff] %v240_v28  ;;  %v119_v29 = vpop.f32.mrf.mxu0  ;;  %v160_v30 = vpop.f32.mrf.mxu1 }
  0xb1   :  { %v120_v31 = vadd.f32 %v119_v29, %v535_v9  ;;  %v161_v32 = vadd.f32 %v160_v30, %v537_v10 }
  0xb3   :  { %268 = vst [vmem:[%s674_s3 + $0x40] sm:$0xff] %v120_v31 }
  0xb4   :  { %v201_v33 = vpop.f32.mrf.mxu2  ;;  %v242_v34 = vpop.f32.mrf.mxu3  ;;  %269 = vst [vmem:[%s674_s3 + $0x48] sm:$0xff] %v161_v32 }
  0xb5   :  { %v202_v35 = vadd.f32 %v201_v33, %v539_v11  ;;  %v243_v36 = vadd.f32 %v242_v34, %v541_v12 }
  0xb7   :  { %270 = vst [vmem:[%s674_s3 + $0x50] sm:$0xff] %v202_v35 }
  0xb8   :  { %271 = vst [vmem:[%s674_s3 + $0x58] sm:$0xff] %v243_v36  ;;  %v122_v37 = vpop.f32.mrf.mxu0  ;;  %v163_v38 = vpop.f32.mrf.mxu1 }
  0xb9   :  { %v123_v39 = vadd.f32 %v122_v37, %v535_v9  ;;  %v164_v40 = vadd.f32 %v163_v38, %v537_v10 }
  0xbb   :  { %272 = vst [vmem:[%s674_s3 + $0x60] sm:$0xff] %v123_v39 }
  0xbc   :  { %v204_v41 = vpop.f32.mrf.mxu2  ;;  %v245_v42 = vpop.f32.mrf.mxu3  ;;  %273 = vst [vmem:[%s674_s3 + $0x68] sm:$0xff] %v164_v40 }
  0xbd   :  { %v205_v43 = vadd.f32 %v204_v41, %v539_v11  ;;  %v246_v44 = vadd.f32 %v245_v42, %v541_v12 }
  0xbf   :  { %274 = vst [vmem:[%s674_s3 + $0x70] sm:$0xff] %v205_v43 }
  0xc0   :  { %275 = vst [vmem:[%s674_s3 + $0x78] sm:$0xff] %v246_v44  ;;  %v125_v45 = vpop.f32.mrf.mxu0  ;;  %v166_v46 = vpop.f32.mrf.mxu1 }
  0xc1   :  { %v126_v47 = vadd.f32 %v125_v45, %v535_v9  ;;  %v167_v48 = vadd.f32 %v166_v46, %v537_v10 }
  0xc3   :  { %276 = vst [vmem:[%s674_s3 + $0x80] sm:$0xff] %v126_v47 }
  0xc4   :  { %v207_v49 = vpop.f32.mrf.mxu2  ;;  %v248_v50 = vpop.f32.mrf.mxu3  ;;  %277 = vst [vmem:[%s674_s3 + $0x88] sm:$0xff] %v167_v48 }
  0xc5   :  { %v208_v51 = vadd.f32 %v207_v49, %v539_v11  ;;  %v249_v52 = vadd.f32 %v248_v50, %v541_v12 }
  0xc7   :  { %278 = vst [vmem:[%s674_s3 + $0x90] sm:$0xff] %v208_v51 }
  0xc8   :  { %279 = vst [vmem:[%s674_s3 + $0x98] sm:$0xff] %v249_v52  ;;  %v128_v53 = vpop.f32.mrf.mxu0  ;;  %v169_v54 = vpop.f32.mrf.mxu1 }
  0xc9   :  { %v129_v55 = vadd.f32 %v128_v53, %v535_v9  ;;  %v170_v56 = vadd.f32 %v169_v54, %v537_v10 }
  0xcb   :  { %280 = vst [vmem:[%s674_s3 + $0xa0] sm:$0xff] %v129_v55 }
  0xcc   :  { %v210_v57 = vpop.f32.mrf.mxu2  ;;  %v251_v58 = vpop.f32.mrf.mxu3  ;;  %281 = vst [vmem:[%s674_s3 + $0xa8] sm:$0xff] %v170_v56 }
  0xcd   :  { %v211_v59 = vadd.f32 %v210_v57, %v539_v11  ;;  %v252_v60 = vadd.f32 %v251_v58, %v541_v12 }
  0xcf   :  { %282 = vst [vmem:[%s674_s3 + $0xb0] sm:$0xff] %v211_v59 }
  0xd0   :  { %283 = vst [vmem:[%s674_s3 + $0xb8] sm:$0xff] %v252_v60  ;;  %v131_v61 = vpop.f32.mrf.mxu0  ;;  %v172_v62 = vpop.f32.mrf.mxu1 }
  0xd1   :  { %v132_v63 = vadd.f32 %v131_v61, %v535_v9  ;;  %v173_v0 = vadd.f32 %v172_v62, %v537_v10 }
  0xd3   :  { %284 = vst [vmem:[%s674_s3 + $0xc0] sm:$0xff] %v132_v63 }
  0xd4   :  { %v213_v1 = vpop.f32.mrf.mxu2  ;;  %v254_v2 = vpop.f32.mrf.mxu3  ;;  %285 = vst [vmem:[%s674_s3 + $0xc8] sm:$0xff] %v173_v0 }
  0xd5   :  { %v214_v3 = vadd.f32 %v213_v1, %v539_v11  ;;  %v255_v4 = vadd.f32 %v254_v2, %v541_v12 }
  0xd7   :  { %286 = vst [vmem:[%s674_s3 + $0xd0] sm:$0xff] %v214_v3 }
  0xd8   :  { %287 = vst [vmem:[%s674_s3 + $0xd8] sm:$0xff] %v255_v4  ;;  %v134_v5 = vpop.f32.mrf.mxu0  ;;  %v175_v6 = vpop.f32.mrf.mxu1 }
  0xd9   :  { %v135_v7 = vadd.f32 %v134_v5, %v535_v9  ;;  %v176_v8 = vadd.f32 %v175_v6, %v537_v10 }
  0xdb   :  { %288 = vst [vmem:[%s674_s3 + $0xe0] sm:$0xff] %v135_v7 }
  0xdc   :  { %v216_v13 = vpop.f32.mrf.mxu2  ;;  %v257_v14 = vpop.f32.mrf.mxu3  ;;  %289 = vst [vmem:[%s674_s3 + $0xe8] sm:$0xff] %v176_v8 }
  0xdd   :  { %v217_v15 = vadd.f32 %v216_v13, %v539_v11  ;;  %v258_v16 = vadd.f32 %v257_v14, %v541_v12 }
  0xdf   :  { %290 = vst [vmem:[%s674_s3 + $0xf0] sm:$0xff] %v217_v15 }
  0xe0   :  { %291 = vst [vmem:[%s674_s3 + $0xf8] sm:$0xff] %v258_v16 }

// kernel: decoder_forward.3
= control target key start
LH: loop header
LB: loop body
LE: loop exit
PB: predicated region body
PF: predicated region fallthrough
CT: control target
= control target key end

     0   :  { %s3145_s0 = inlined_call_operand.vmem [shape: f32[8,8,512], index: 0, kind: input, shape index: {}]   ;;  %s3146_s1 = inlined_call_operand.vmem [shape: f32[128,512], index: 1, kind: input, shape index: {}]   ;;  %s3147_s2 = inlined_call_operand.vmem [shape: f32[128,128], index: 2, kind: input, shape index: {}]   ;;  %s3148_s3 = inlined_call_operand.vmem [shape: f32[1,128], index: 3, kind: input, shape index: {}]   ;;  %s3149_s4 = inlined_call_operand.hbm [shape: f32[8,8,128], index: 4, kind: output, shape index: {0}]   ;;  %s3150_s5 = inlined_call_operand.vmem [shape: f32[8,128], index: 5, kind: output, shape index: {1}]   ;;  %s3151_s6 = inlined_call_operand.vmem [shape: f32[8,128], index: 6, kind: output, shape index: {2}]  }
   0x1   :  { %v1750_v0 = vld [vmem:[%s3146_s1 + $0x1e0] sm:$0xff]  ;;  %v1774_v4 = vld [vmem:[%s3146_s1 + $0x1f8] sm:$0xff]  ;;  %v1779_v5 = vld [vmem:[%s3146_s1 + $0x1f0] sm:$0xff] }
   0x2   :  { %3246 = vst [vmem:[#allocation8_spill] sm:$0xff] %v1750_v0  ;;  %v1755_v1 = vld [vmem:[%s3146_s1 + $0x1c0] sm:$0xff]  ;;  %97 = vmatpush.msra.mxu1 %v1750_v0  ;;  %404 = vmatpush.msra.mxu0 %v1750_v0  ;;  %v1786_v6 = vld [vmem:[%s3146_s1 + $0x1d8] sm:$0xff]  ;;  %v1791_v7 = vld [vmem:[%s3146_s1 + $0x1d0] sm:$0xff] }
   0x3   :  { %3247 = vst [vmem:[#allocation9_spill] sm:$0xff] %v1755_v1  ;;  %v1762_v2 = vld [vmem:[%s3146_s1 + $0x1a0] sm:$0xff]  ;;  %157 = vmatpush.msra.mxu3 %v1774_v4  ;;  %137 = vmatpush.msra.mxu2 %v1779_v5  ;;  %v1802_v9 = vld [vmem:[%s3146_s1 + $0x1b8] sm:$0xff]  ;;  %v1810_v10 = vld [vmem:[%s3146_s1 + $0x1b0] sm:$0xff] }
   0x4   :  { %3248 = vst [vmem:[#allocation10_spill] sm:$0xff] %v1762_v2  ;;  %98 = vmatpush.msra.mxu1 %v1755_v1  ;;  %405 = vmatpush.msra.mxu0 %v1755_v1  ;;  %v1769_v3 = vld [vmem:[%s3146_s1 + $0x180] sm:$0xff]  ;;  %v1821_v12 = vld [vmem:[%s3146_s1 + $0x198] sm:$0xff]  ;;  %v1829_v13 = vld [vmem:[%s3146_s1 + $0x190] sm:$0xff] }
   0x5   :  { %3249 = vst [vmem:[#allocation11_spill] sm:$0xff] %v1769_v3  ;;  %v1796_v8 = vld [vmem:[%s3146_s1 + $0x160] sm:$0xff]  ;;  %158 = vmatpush.msra.mxu3 %v1786_v6  ;;  %138 = vmatpush.msra.mxu2 %v1791_v7  ;;  %v1840_v15 = vld [vmem:[%s3146_s1 + $0x178] sm:$0xff]  ;;  %v1848_v16 = vld [vmem:[%s3146_s1 + $0x170] sm:$0xff] }
   0x6   :  { %99 = vmatpush.msra.mxu1 %v1762_v2  ;;  %3250 = vst [vmem:[#allocation12_spill] sm:$0xff] %v1796_v8  ;;  %406 = vmatpush.msra.mxu0 %v1762_v2  ;;  %v1815_v11 = vld [vmem:[%s3146_s1 + $0x140] sm:$0xff]  ;;  %v1859_v18 = vld [vmem:[%s3146_s1 + $0x158] sm:$0xff]  ;;  %v1867_v19 = vld [vmem:[%s3146_s1 + $0x150] sm:$0xff] }
   0x7   :  { %3251 = vst [vmem:[#allocation13_spill] sm:$0xff] %v1815_v11  ;;  %159 = vmatpush.msra.mxu3 %v1802_v9  ;;  %v1834_v14 = vld [vmem:[%s3146_s1 + $0x120] sm:$0xff]  ;;  %139 = vmatpush.msra.mxu2 %v1810_v10  ;;  %v1878_v21 = vld [vmem:[%s3146_s1 + $0x138] sm:$0xff]  ;;  %v1886_v22 = vld [vmem:[%s3146_s1 + $0x130] sm:$0xff] }
   0x8   :  { %100 = vmatpush.msra.mxu1 %v1769_v3  ;;  %407 = vmatpush.msra.mxu0 %v1769_v3  ;;  %3252 = vst [vmem:[#allocation14_spill] sm:$0xff] %v1834_v14  ;;  %v1853_v17 = vld [vmem:[%s3146_s1 + $0x100] sm:$0xff]  ;;  %v1897_v24 = vld [vmem:[%s3146_s1 + $0x118] sm:$0xff]  ;;  %v1905_v25 = vld [vmem:[%s3146_s1 + $0x110] sm:$0xff] }
   0x9   :  { %160 = vmatpush.msra.mxu3 %v1821_v12  ;;  %3253 = vst [vmem:[#allocation15_spill] sm:$0xff] %v1853_v17  ;;  %140 = vmatpush.msra.mxu2 %v1829_v13  ;;  %v1872_v20 = vld [vmem:[%s3146_s1 + $0xe0] sm:$0xff]  ;;  %v1916_v27 = vld [vmem:[%s3146_s1 + $0xf8] sm:$0xff] }
   0xa   :  { %101 = vmatpush.msra.mxu1 %v1796_v8  ;;  %408 = vmatpush.msra.mxu0 %v1796_v8  ;;  %3254 = vst [vmem:[#allocation16_spill] sm:$0xff] %v1872_v20  ;;  %v1891_v23 = vld [vmem:[%s3146_s1 + $0xc0] sm:$0xff] }
   0xb   :  { %161 = vmatpush.msra.mxu3 %v1840_v15  ;;  %141 = vmatpush.msra.mxu2 %v1848_v16  ;;  %3255 = vst [vmem:[#allocation17_spill] sm:$0xff] %v1891_v23  ;;  %v1910_v26 = vld [vmem:[%s3146_s1 + $0xa0] sm:$0xff] }
   0xc   :  { %102 = vmatpush.msra.mxu1 %v1815_v11  ;;  %409 = vmatpush.msra.mxu0 %v1815_v11  ;;  %3256 = vst [vmem:[#allocation18_spill] sm:$0xff] %v1910_v26 }
   0xd   :  { %162 = vmatpush.msra.mxu3 %v1859_v18  ;;  %142 = vmatpush.msra.mxu2 %v1867_v19 }
   0xe   :  { %103 = vmatpush.msra.mxu1 %v1834_v14  ;;  %410 = vmatpush.msra.mxu0 %v1834_v14 }
   0xf   :  { %163 = vmatpush.msra.mxu3 %v1878_v21  ;;  %143 = vmatpush.msra.mxu2 %v1886_v22 }
  0x10   :  { %104 = vmatpush.msra.mxu1 %v1853_v17  ;;  %411 = vmatpush.msra.mxu0 %v1853_v17 }
  0x12   :  { %105 = vmatpush.msra.mxu1 %v1872_v20  ;;  %412 = vmatpush.msra.mxu0 %v1872_v20 }
  0x13   :  { %12 = vsyncpa [#allocation6], 0  ;;  %164 = vmatpush.msra.mxu3 %v1897_v24  ;;  %v1924_v28 = vld [vmem:[%s3146_s1 + $0xf0] sm:$0xff]  ;;  %v1929_v29 = vld [vmem:[%s3146_s1 + $0x80] sm:$0xff]  ;;  %144 = vmatpush.msra.mxu2 %v1905_v25  ;;  %v3152_v50 = vmov 0.0   ;;  %s1413_s16 = sshll.u32 %s3149_s4, 4  ;;  %s1414_s16 = int_to_ptr.hbm [resolvable:$true] %s1413_s16 }
  0x14   :  { %106 = vmatpush.msra.mxu1 %v1891_v23  ;;  %3257 = vst [vmem:[#allocation19_spill] sm:$0xff] %v1929_v29  ;;  %v1935_v30 = vld [vmem:[%s3146_s1 + $0xd8] sm:$0xff]  ;;  %413 = vmatpush.msra.mxu0 %v1891_v23  ;;  %v1943_v31 = vld [vmem:[%s3146_s1 + $0xd0] sm:$0xff]  ;;  %v1948_v32 = vld [vmem:[%s3146_s1 + $0x60] sm:$0xff]  ;;  %s1711_s17 = smov 8  }
  0x15   :  { %165 = vmatpush.msra.mxu3 %v1916_v27  ;;  %3258 = vst [vmem:[#allocation20_spill] sm:$0xff] %v1948_v32  ;;  %145 = vmatpush.msra.mxu2 %v1924_v28  ;;  %v1954_v33 = vld [vmem:[%s3146_s1 + $0xb8] sm:$0xff]  ;;  %v1962_v34 = vld [vmem:[%s3146_s1 + $0xb0] sm:$0xff]  ;;  %v1967_v35 = vld [vmem:[%s3146_s1 + $0x40] sm:$0xff] }
  0x16   :  { %107 = vmatpush.msra.mxu1 %v1910_v26  ;;  %414 = vmatpush.msra.mxu0 %v1910_v26  ;;  %3259 = vst [vmem:[#allocation21_spill] sm:$0xff] %v1967_v35  ;;  %v1973_v36 = vld [vmem:[%s3146_s1 + $0x98] sm:$0xff]  ;;  %v1981_v37 = vld [vmem:[%s3146_s1 + $0x90] sm:$0xff]  ;;  %v1986_v38 = vld [vmem:[%s3146_s1 + $0x20] sm:$0xff] }
  0x17   :  { %166 = vmatpush.msra.mxu3 %v1935_v30  ;;  %146 = vmatpush.msra.mxu2 %v1943_v31  ;;  %3260 = vst [vmem:[#allocation22_spill] sm:$0xff] %v1986_v38  ;;  %v1992_v39 = vld [vmem:[%s3146_s1 + $0x78] sm:$0xff]  ;;  %v2000_v40 = vld [vmem:[%s3146_s1 + $0x70] sm:$0xff]  ;;  %v2005_v41 = vld [vmem:[%s3146_s1] sm:$0xff] }
  0x18   :  { %108 = vmatpush.msra.mxu1 %v1929_v29  ;;  %415 = vmatpush.msra.mxu0 %v1929_v29  ;;  %3261 = vst [vmem:[#allocation23_spill] sm:$0xff] %v1992_v39  ;;  %v2011_v42 = vld [vmem:[%s3146_s1 + $0x58] sm:$0xff]  ;;  %v2018_v43 = vld [vmem:[%s3146_s1 + $0x1e8] sm:$0xff]  ;;  %v2024_v44 = vld [vmem:[%s3146_s1 + $0x50] sm:$0xff] }
  0x19   :  { %167 = vmatpush.msra.mxu3 %v1954_v33  ;;  %147 = vmatpush.msra.mxu2 %v1962_v34  ;;  %3262 = vst [vmem:[#allocation24_spill] sm:$0xff] %v2005_v41  ;;  %v2030_v45 = vld [vmem:[%s3146_s1 + $0x38] sm:$0xff]  ;;  %v2037_v46 = vld [vmem:[%s3146_s1 + $0x1c8] sm:$0xff]  ;;  %v2043_v47 = vld [vmem:[%s3146_s1 + $0x30] sm:$0xff] }
  0x1a   :  { %109 = vmatpush.msra.mxu1 %v1948_v32  ;;  %416 = vmatpush.msra.mxu0 %v1948_v32  ;;  %3263 = vst [vmem:[#allocation25_spill] sm:$0xff] %v2011_v42  ;;  %v2050_v48 = vld [vmem:[%s3146_s1 + $0x18] sm:$0xff]  ;;  %v2055_v49 = vld [vmem:[%s3146_s1 + $0x1a8] sm:$0xff]  ;;  %v2064_v51 = vld [vmem:[%s3146_s1 + $0x10] sm:$0xff] }
  0x1b   :  { %168 = vmatpush.msra.mxu3 %v1973_v36  ;;  %148 = vmatpush.msra.mxu2 %v1981_v37  ;;  %3264 = vst [vmem:[#allocation26_spill] sm:$0xff] %v2024_v44  ;;  %v2069_v52 = vld [vmem:[%s3146_s1 + $0x188] sm:$0xff] }
  0x1c   :  { %110 = vmatpush.msra.mxu1 %v1967_v35  ;;  %417 = vmatpush.msra.mxu0 %v1967_v35  ;;  %3265 = vst [vmem:[#allocation27_spill] sm:$0xff] %v2030_v45  ;;  %v2078_v53 = vld [vmem:[%s3146_s1 + $0x168] sm:$0xff] }
  0x1d   :  { %169 = vmatpush.msra.mxu3 %v1992_v39  ;;  %149 = vmatpush.msra.mxu2 %v2000_v40  ;;  %3266 = vst [vmem:[#allocation28_spill] sm:$0xff] %v2043_v47  ;;  %v2087_v54 = vld [vmem:[%s3146_s1 + $0x148] sm:$0xff] }
  0x1e   :  { %111 = vmatpush.msra.mxu1 %v1986_v38  ;;  %418 = vmatpush.msra.mxu0 %v1986_v38  ;;  %3267 = vst [vmem:[#allocation29_spill] sm:$0xff] %v2050_v48  ;;  %v2096_v55 = vld [vmem:[%s3146_s1 + $0x128] sm:$0xff] }
  0x1f   :  { %170 = vmatpush.msra.mxu3 %v2011_v42  ;;  %150 = vmatpush.msra.mxu2 %v2024_v44  ;;  %3268 = vst [vmem:[#allocation30_spill] sm:$0xff] %v2064_v51  ;;  %v2105_v56 = vld [vmem:[%s3146_s1 + $0x108] sm:$0xff] }
  0x20   :  { %112 = vmatpush.msra.mxu1 %v2005_v41  ;;  %419 = vmatpush.msra.mxu0 %v2005_v41  ;;  %v2114_v57 = vld [vmem:[%s3146_s1 + $0xe8] sm:$0xff] }
  0x21   :  { %113 = vmatmul.f32.vlgmr.msra.gmra.mxu1 %v3152_v50  ;;  %171 = vmatpush.msra.mxu3 %v2030_v45  ;;  %v2123_v58 = vld [vmem:[%s3146_s1 + $0xc8] sm:$0xff] }
  0x22   :  { %117 = vmatpush.msrb.mxu1 %v2018_v43  ;;  %151 = vmatpush.msra.mxu2 %v2043_v47  ;;  %v2132_v59 = vld [vmem:[%s3146_s1 + $0xa8] sm:$0xff] }
  0x23   :  { %172 = vmatpush.msra.mxu3 %v2050_v48  ;;  %558 = vmatpush.msrb.mxu0 %v1750_v0  ;;  %v2141_v60 = vld [vmem:[%s3146_s1 + $0x88] sm:$0xff] }
  0x24   :  { %118 = vmatpush.msrb.mxu1 %v2037_v46  ;;  %173 = vmatmul.f32.vlgmr.msra.gmra.mxu3 %v3152_v50  ;;  %v2150_v61 = vld [vmem:[%s3146_s1 + $0x68] sm:$0xff] }
  0x25   :  { %152 = vmatpush.msra.mxu2 %v2064_v51  ;;  %310 = vmatpush.msrb.mxu3 %v1774_v4  ;;  %v2159_v62 = vld [vmem:[%s3146_s1 + $0x48] sm:$0xff] }
  0x26   :  { %119 = vmatpush.msrb.mxu1 %v2055_v49  ;;  %153 = vmatmul.f32.vlgmr.msra.gmra.mxu2 %v3152_v50  ;;  %3269 = vst [vmem:[#allocation31_spill] sm:$0xff] %v2159_v62  ;;  %v2168_v63 = vld [vmem:[%s3146_s1 + $0x28] sm:$0xff] }
  0x27   :  { %250 = vmatpush.msrb.mxu2 %v1750_v0  ;;  %311 = vmatpush.msrb.mxu3 %v1786_v6  ;;  %3270 = vst [vmem:[#allocation32_spill] sm:$0xff] %v2168_v63  ;;  %v2177_v50 = vld [vmem:[%s3146_s1 + $0x8] sm:$0xff] }
  0x28   :  { %120 = vmatpush.msrb.mxu1 %v2069_v52  ;;  %559 = vmatpush.msrb.mxu0 %v1755_v1  ;;  %3271 = vst [vmem:[#allocation33_spill] sm:$0xff] %v2177_v50 }
  0x29   :  { %251 = vmatpush.msrb.mxu2 %v1755_v1  ;;  %312 = vmatpush.msrb.mxu3 %v1802_v9 }
  0x2a   :  { %121 = vmatpush.msrb.mxu1 %v2078_v53  ;;  %560 = vmatpush.msrb.mxu0 %v1762_v2 }
  0x2b   :  { %252 = vmatpush.msrb.mxu2 %v1762_v2  ;;  %313 = vmatpush.msrb.mxu3 %v1821_v12 }
  0x2c   :  { %122 = vmatpush.msrb.mxu1 %v2087_v54  ;;  %561 = vmatpush.msrb.mxu0 %v1769_v3 }
  0x2d   :  { %253 = vmatpush.msrb.mxu2 %v1769_v3  ;;  %314 = vmatpush.msrb.mxu3 %v1840_v15 }
  0x2e   :  { %123 = vmatpush.msrb.mxu1 %v2096_v55  ;;  %562 = vmatpush.msrb.mxu0 %v1796_v8 }
  0x2f   :  { %254 = vmatpush.msrb.mxu2 %v1796_v8  ;;  %315 = vmatpush.msrb.mxu3 %v1859_v18 }
  0x30   :  { %124 = vmatpush.msrb.mxu1 %v2105_v56  ;;  %563 = vmatpush.msrb.mxu0 %v1815_v11 }
  0x31   :  { %255 = vmatpush.msrb.mxu2 %v1815_v11  ;;  %316 = vmatpush.msrb.mxu3 %v1878_v21  ;;  %v94_v11 = vld [vmem:[%s3145_s0 + $0x8] sm:$0xff] }
  0x32   :  { %125 = vmatpush.msrb.mxu1 %v2114_v57  ;;  %564 = vmatpush.msrb.mxu0 %v1834_v14 }
  0x33   :  { %256 = vmatpush.msrb.mxu2 %v1834_v14  ;;  %317 = vmatpush.msrb.mxu3 %v1897_v24 }
  0x34   :  { %126 = vmatpush.msrb.mxu1 %v2123_v58  ;;  %565 = vmatpush.msrb.mxu0 %v1853_v17 }
  0x35   :  { %257 = vmatpush.msrb.mxu2 %v1853_v17  ;;  %318 = vmatpush.msrb.mxu3 %v1916_v27 }
  0x36   :  { %127 = vmatpush.msrb.mxu1 %v2132_v59  ;;  %566 = vmatpush.msrb.mxu0 %v1872_v20 }
  0x37   :  { %258 = vmatpush.msrb.mxu2 %v1872_v20  ;;  %319 = vmatpush.msrb.mxu3 %v1935_v30 }
  0x38   :  { %128 = vmatpush.msrb.mxu1 %v2141_v60  ;;  %567 = vmatpush.msrb.mxu0 %v1891_v23 }
  0x39   :  { %259 = vmatpush.msrb.mxu2 %v1891_v23  ;;  %320 = vmatpush.msrb.mxu3 %v1954_v33  ;;  %v3272_v23 = vmov 0.0  }
  0x3a   :  { %129 = vmatpush.msrb.mxu1 %v2150_v61  ;;  %568 = vmatpush.msrb.mxu0 %v1910_v26 }
  0x3b   :  { %260 = vmatpush.msrb.mxu2 %v1910_v26  ;;  %321 = vmatpush.msrb.mxu3 %v1973_v36 }
  0x3c   :  { %130 = vmatpush.msrb.mxu1 %v2159_v62  ;;  %569 = vmatpush.msrb.mxu0 %v1929_v29 }
  0x3d   :  { %261 = vmatpush.msrb.mxu2 %v1929_v29  ;;  %322 = vmatpush.msrb.mxu3 %v1992_v39 }
  0x3e   :  { %131 = vmatpush.msrb.mxu1 %v2168_v63  ;;  %570 = vmatpush.msrb.mxu0 %v1948_v32 }
  0x3f   :  { %262 = vmatpush.msrb.mxu2 %v1948_v32  ;;  %323 = vmatpush.msrb.mxu3 %v2011_v42  ;;  %v96_v32 = vld [vmem:[%s3145_s0 + $0x18] sm:$0xff] }
  0x40   :  { %132 = vmatpush.msrb.mxu1 %v2177_v50  ;;  %571 = vmatpush.msrb.mxu0 %v1967_v35 }
  0x41   :  { %133 = vmatmul.f32.vlgmr.msrb.gmra.mxu1 %v3272_v23  ;;  %263 = vmatpush.msrb.mxu2 %v1967_v35  ;;  %v93_v23 = vld [vmem:[%s3145_s0] sm:$0xff] }
  0x42   :  { %270 = vmatpush.msra.mxu1 %v2018_v43  ;;  %324 = vmatpush.msrb.mxu3 %v2030_v45 }
  0x43   :  { %264 = vmatpush.msrb.mxu2 %v1986_v38  ;;  %572 = vmatpush.msrb.mxu0 %v1986_v38 }
  0x44   :  { %271 = vmatpush.msra.mxu1 %v2037_v46  ;;  %325 = vmatpush.msrb.mxu3 %v2050_v48 }
  0x45   :  { %265 = vmatpush.msrb.mxu2 %v2005_v41  ;;  %573 = vmatpush.msrb.mxu0 %v2005_v41 }
  0x46   :  { %272 = vmatpush.msra.mxu1 %v2055_v49  ;;  %464 = vmatpush.msra.mxu3 %v1774_v4 }
  0x47   :  { %290 = vmatpush.msra.mxu2 %v1779_v5 }
  0x48   :  { %273 = vmatpush.msra.mxu1 %v2069_v52  ;;  %465 = vmatpush.msra.mxu3 %v1786_v6 }
  0x49   :  { %291 = vmatpush.msra.mxu2 %v1791_v7 }
  0x4a   :  { %274 = vmatpush.msra.mxu1 %v2078_v53  ;;  %466 = vmatpush.msra.mxu3 %v1802_v9 }
  0x4b   :  { %292 = vmatpush.msra.mxu2 %v1810_v10 }
  0x4c   :  { %275 = vmatpush.msra.mxu1 %v2087_v54  ;;  %467 = vmatpush.msra.mxu3 %v1821_v12 }
  0x4d   :  { %293 = vmatpush.msra.mxu2 %v1829_v13 }
  0x4e   :  { %276 = vmatpush.msra.mxu1 %v2096_v55  ;;  %468 = vmatpush.msra.mxu3 %v1840_v15 }
  0x4f   :  { %294 = vmatpush.msra.mxu2 %v1848_v16 }
  0x50   :  { %277 = vmatpush.msra.mxu1 %v2105_v56  ;;  %469 = vmatpush.msra.mxu3 %v1859_v18 }
  0x51   :  { %295 = vmatpush.msra.mxu2 %v1867_v19 }
  0x52   :  { %278 = vmatpush.msra.mxu1 %v2114_v57  ;;  %470 = vmatpush.msra.mxu3 %v1878_v21 }
  0x53   :  { %296 = vmatpush.msra.mxu2 %v1886_v22 }
  0x54   :  { %279 = vmatpush.msra.mxu1 %v2123_v58  ;;  %471 = vmatpush.msra.mxu3 %v1897_v24 }
  0x55   :  { %297 = vmatpush.msra.mxu2 %v1905_v25 }
  0x56   :  { %280 = vmatpush.msra.mxu1 %v2132_v59  ;;  %472 = vmatpush.msra.mxu3 %v1916_v27 }
  0x57   :  { %298 = vmatpush.msra.mxu2 %v1924_v28 }
  0x58   :  { %281 = vmatpush.msra.mxu1 %v2141_v60  ;;  %473 = vmatpush.msra.mxu3 %v1935_v30 }
  0x59   :  { %299 = vmatpush.msra.mxu2 %v1943_v31 }
  0x5a   :  { %282 = vmatpush.msra.mxu1 %v2150_v61  ;;  %474 = vmatpush.msra.mxu3 %v1954_v33 }
  0x5b   :  { %300 = vmatpush.msra.mxu2 %v1962_v34 }
  0x5c   :  { %283 = vmatpush.msra.mxu1 %v2159_v62  ;;  %475 = vmatpush.msra.mxu3 %v1973_v36 }
  0x5d   :  { %301 = vmatpush.msra.mxu2 %v1981_v37 }
  0x5e   :  { %284 = vmatpush.msra.mxu1 %v2168_v63  ;;  %476 = vmatpush.msra.mxu3 %v1992_v39 }
  0x5f   :  { %302 = vmatpush.msra.mxu2 %v2000_v40 }
  0x60   :  { %285 = vmatpush.msra.mxu1 %v2177_v50  ;;  %477 = vmatpush.msra.mxu3 %v2011_v42 }
  0x61   :  { %303 = vmatpush.msra.mxu2 %v2024_v44 }
  0x62   :  { %424 = vmatpush.msrb.mxu1 %v2018_v43  ;;  %478 = vmatpush.msra.mxu3 %v2030_v45 }
  0x63   :  { %304 = vmatpush.msra.mxu2 %v2043_v47 }
  0x64   :  { %425 = vmatpush.msrb.mxu1 %v2037_v46  ;;  %479 = vmatpush.msra.mxu3 %v2050_v48 }
  0x65   :  { %305 = vmatpush.msra.mxu2 %v2064_v51 }
  0x66   :  { %426 = vmatpush.msrb.mxu1 %v2055_v49 }
  0x68   :  { %427 = vmatpush.msrb.mxu1 %v2069_v52 }
  0x6a   :  { %428 = vmatpush.msrb.mxu1 %v2078_v53 }
  0x6c   :  { %429 = vmatpush.msrb.mxu1 %v2087_v54 }
  0x6e   :  { %430 = vmatpush.msrb.mxu1 %v2096_v55 }
  0x70   :  { %431 = vmatpush.msrb.mxu1 %v2105_v56 }
  0x72   :  { %432 = vmatpush.msrb.mxu1 %v2114_v57 }
  0x74   :  { %433 = vmatpush.msrb.mxu1 %v2123_v58 }
  0x76   :  { %434 = vmatpush.msrb.mxu1 %v2132_v59 }
  0x78   :  { %435 = vmatpush.msrb.mxu1 %v2141_v60 }
  0x7a   :  { %436 = vmatpush.msrb.mxu1 %v2150_v61 }
  0x7c   :  { %437 = vmatpush.msrb.mxu1 %v2159_v62 }
  0x7e   :  { %438 = vmatpush.msrb.mxu1 %v2168_v63 }
  0x80   :  { %439 = vmatpush.msrb.mxu1 %v2177_v50 }
  0x9e   :  { %v114_v41 = vpop.f32.mrf.mxu1 }
  0x9f   :  { %v177_v38 = vadd.f32 %v114_v41, %v93_v23 }
  0xa1   :  { %v1433_v35 = vmul.f32 -1.442695, %v177_v38 }
  0xa3   :  { %1490 = vpow2.f32 %v1433_v35 }
  0xa7   :  { %v174_v29 = vpop.f32.mrf.mxu3 }
  0xa8   :  { %v180_v20 = vadd.f32 %v174_v29, %v96_v32 }
  0xa9   :  { %v1491_v26 = vpop.eup %1490 }
  0xaa   :  { %v184_v17 = vadd.f32 1.0, %v1491_v26  ;;  %v1435_v14 = vmul.f32 -1.442695, %v180_v20  ;;  %v95_v20 = vld [vmem:[%s3145_s0 + $0x10] sm:$0xff]  ;;  %v154_v26 = vpop.f32.mrf.mxu2 }
  0xac   :  { %1492 = vrcp.f32 %v184_v17  ;;  %vm190_vm0 = vweird.f32 %v184_v17 }
  0xad   :  { %1494 = vpow2.f32 %v1435_v14  ;;  %v179_v14 = vadd.f32 %v154_v26, %v95_v20 }
  0xb2   :  { %v1493_v38 = vpop.eup %1492 }
  0xb3   :  { %v1495_v35 = vpop.eup %1494  ;;  %v186_v23 = vmul.f32 %v1493_v38, %v184_v17  ;;  %vm191_vm1 = vweird.f32 %v1493_v38 }
  0xb4   :  { %v223_v2 = vadd.f32 1.0, %v1495_v35  ;;  %vm2275_vm2 = vmor %vm190_vm0, %vm191_vm1 }
  0xb5   :  { %v187_v48 = vsub.f32 1.0, %v186_v23 }
  0xb6   :  { %vm229_vm8 = vweird.f32 %v223_v2 }
  0xb7   :  { %v188_v29 = vmul.f32 %v1493_v38, %v187_v48 }
  0xb9   :  { %v189_v35 = vadd.f32 %v1493_v38, %v188_v29 }
  0xbb   :  { %v193_v20 = vsel %vm2275_vm2, %v1493_v38, %v189_v35  ;;  %v233_v35 = vand.u32 2147483647, %v223_v2 }
  0xbd   :  { %vm234_vm11 = vcmp.eq.f32.partialorder %v233_v35, 8.507059e+37 }
  0xbe   :  { %v134_v8 = vpop.f32.mrf.mxu1 }
  0xbf   :  { %v178_v3 = vadd.f32 %v134_v8, %v94_v11  ;;  %v194_v8 = vand.u32 2147483647, %v184_v17  ;;  %v196_v11 = vand.u32 2147483648, %v184_v17 }
  0xc1   :  { %v1434_v41 = vmul.f32 -1.442695, %v178_v3  ;;  %vm195_vm3 = vcmp.eq.f32.partialorder %v194_v8, 8.507059e+37  ;;  %v197_v51 = vor.u32 1.1754944e-38, %v196_v11  ;;  %v235_v11 = vand.u32 2147483648, %v223_v2 }
  0xc3   :  { %1496 = vpow2.f32 %v1434_v41  ;;  %v198_v47 = vsel %vm195_vm3, %v197_v51, %v193_v20  ;;  %v1437_v20 = vld [vmem:[%s3145_s0 + $0x28] sm:$0xff] }
  0xc4   :  { %1498 = vrcp.f32 %v223_v2 }
  0xc9   :  { %v1497_v1 = vpop.eup %1496 }
  0xca   :  { %v203_v0 = vadd.f32 1.0, %v1497_v1  ;;  %v1499_v32 = vpop.eup %1498 }
  0xcb   :  { %v225_v50 = vmul.f32 %v1499_v32, %v223_v2  ;;  %vm230_vm9 = vweird.f32 %v1499_v32  ;;  %v3276_v2 = vld [vmem:[#allocation23_spill] sm:$0xff] }
  0xcc   :  { %1500 = vrcp.f32 %v203_v0  ;;  %v215_v45 = vand.u32 2147483648, %v203_v0  ;;  %v213_v26 = vand.u32 2147483647, %v203_v0  ;;  %vm209_vm5 = vweird.f32 %v203_v0  ;;  %vm231_vm10 = vmor %vm229_vm8, %vm230_vm9 }
  0xcd   :  { %1502 = vtanh.f32 %v179_v14  ;;  %v226_v63 = vsub.f32 1.0, %v225_v50 }
  0xce   :  { %v216_v42 = vor.u32 1.1754944e-38, %v215_v45  ;;  %vm214_vm7 = vcmp.eq.f32.partialorder %v213_v26, 8.507059e+37 }
  0xcf   :  { %v227_v14 = vmul.f32 %v1499_v32, %v226_v63  ;;  %v3281_v63 = vld [vmem:[#allocation30_spill] sm:$0xff] }
  0xd1   :  { %v228_v38 = vadd.f32 %v1499_v32, %v227_v14  ;;  %v1436_v14 = vld [vmem:[%s3145_s0 + $0x20] sm:$0xff] }
  0xd2   :  { %v1501_v3 = vpop.eup %1500 }
  0xd3   :  { %v205_v41 = vmul.f32 %v1501_v3, %v203_v0  ;;  %vm210_vm4 = vweird.f32 %v1501_v3  ;;  %v1503_v29 = vpop.eup %1502  ;;  %v236_v0 = vor.u32 1.1754944e-38, %v235_v11  ;;  %v232_v45 = vsel %vm231_vm10, %v1499_v32, %v228_v38  ;;  %v3282_v32 = vld [vmem:[#allocation27_spill] sm:$0xff] }
  0xd4   :  { %vm211_vm6 = vmor %vm209_vm5, %vm210_vm4  ;;  %v240_v8 = vmul.f32 %v1503_v29, %v198_v47  ;;  %v3279_v47 = vld [vmem:[#allocation25_spill] sm:$0xff] }
  0xd5   :  { %v206_v23 = vsub.f32 1.0, %v205_v41  ;;  %v237_v51 = vsel %vm234_vm11, %v236_v0, %v232_v45 }
  0xd7   :  { %v207_v48 = vmul.f32 %v1501_v3, %v206_v23  ;;  %v3283_v23 = vld [vmem:[#allocation33_spill] sm:$0xff] }
  0xd9   :  { %v208_v17 = vadd.f32 %v1501_v3, %v207_v48  ;;  %v3284_v48 = vld [vmem:[#allocation29_spill] sm:$0xff] }
  0xdb   :  { %v212_v62 = vsel %vm211_vm6, %v1501_v3, %v208_v17 }
  0xdc   :  { %v217_v41 = vsel %vm214_vm7, %v216_v42, %v212_v62  ;;  %v3278_v42 = vld [vmem:[#allocation28_spill] sm:$0xff] }
  0xdd   :  { %v239_v39 = vmul.f32 0.0, %v217_v41  ;;  %v3280_v62 = vld [vmem:[#allocation32_spill] sm:$0xff]  ;;  %v1439_v41 = vld [vmem:[%s3145_s0 + $0x38] sm:$0xff] }
  0xdf   :  { %v2281_v1 = vadd.f32 %v240_v8, %v239_v39  ;;  %v3277_v39 = vld [vmem:[#allocation31_spill] sm:$0xff] }
  0xe1   :  { %1504 = vtanh.f32 %v2281_v1 }
  0xe7   :  { %v1505_v50 = vpop.eup %1504 }
  0xe8   :  { %v2284_v3 = vmul.f32 %v1505_v50, %v237_v51 }
  0xea   :  { %3275 = vst [vmem:[#allocation34_spill] sm:$0xff] %v2284_v3  ;;  %266 = vmatmul.f32.vlgmr.msrb.gmra.mxu2 %v2284_v3  ;;  %286 = vmatmul.f32.vlgmr.msra.gmra.mxu1 %v2284_v3 }
  0xeb   :  { %326 = vmatmul.f32.vlgmr.msrb.gmra.mxu3 %v2284_v3  ;;  %444 = vmatpush.msrb.mxu2 %v1779_v5 }
  0xec   :  { %578 = vmatpush.msra.mxu1 %v2018_v43  ;;  %618 = vmatpush.msrb.mxu3 %v1774_v4 }
  0xed   :  { %445 = vmatpush.msrb.mxu2 %v1791_v7 }
  0xee   :  { %579 = vmatpush.msra.mxu1 %v2037_v46  ;;  %619 = vmatpush.msrb.mxu3 %v1786_v6 }
  0xef   :  { %446 = vmatpush.msrb.mxu2 %v1810_v10 }
  0xf0   :  { %580 = vmatpush.msra.mxu1 %v2055_v49  ;;  %620 = vmatpush.msrb.mxu3 %v1802_v9 }
  0xf1   :  { %447 = vmatpush.msrb.mxu2 %v1829_v13 }
  0xf2   :  { %306 = vmatmul.f32.vlgmr.msra.gmra.mxu2 %v2284_v3  ;;  %581 = vmatpush.msra.mxu1 %v2069_v52 }
  0xf3   :  { %448 = vmatpush.msrb.mxu2 %v1848_v16  ;;  %621 = vmatpush.msrb.mxu3 %v1821_v12 }
  0xf4   :  { %582 = vmatpush.msra.mxu1 %v2078_v53 }
  0xf5   :  { %449 = vmatpush.msrb.mxu2 %v1867_v19  ;;  %622 = vmatpush.msrb.mxu3 %v1840_v15 }
  0xf6   :  { %583 = vmatpush.msra.mxu1 %v2087_v54 }
  0xf7   :  { %450 = vmatpush.msrb.mxu2 %v1886_v22  ;;  %623 = vmatpush.msrb.mxu3 %v1859_v18 }
  0xf8   :  { %584 = vmatpush.msra.mxu1 %v2096_v55 }
  0xf9   :  { %451 = vmatpush.msrb.mxu2 %v1905_v25  ;;  %624 = vmatpush.msrb.mxu3 %v1878_v21 }
  0xfa   :  { %585 = vmatpush.msra.mxu1 %v2105_v56 }
  0xfb   :  { %452 = vmatpush.msrb.mxu2 %v1924_v28  ;;  %625 = vmatpush.msrb.mxu3 %v1897_v24 }
  0xfc   :  { %586 = vmatpush.msra.mxu1 %v2114_v57 }
  0xfd   :  { %453 = vmatpush.msrb.mxu2 %v1943_v31  ;;  %626 = vmatpush.msrb.mxu3 %v1916_v27 }
  0xfe   :  { %587 = vmatpush.msra.mxu1 %v2123_v58 }
  0xff   :  { %454 = vmatpush.msrb.mxu2 %v1962_v34  ;;  %627 = vmatpush.msrb.mxu3 %v1935_v30 }
 0x100   :  { %588 = vmatpush.msra.mxu1 %v2132_v59 }
 0x101   :  { %455 = vmatpush.msrb.mxu2 %v1981_v37  ;;  %628 = vmatpush.msrb.mxu3 %v1954_v33 }
 0x102   :  { %589 = vmatpush.msra.mxu1 %v2141_v60 }
 0x103   :  { %456 = vmatpush.msrb.mxu2 %v2000_v40  ;;  %629 = vmatpush.msrb.mxu3 %v1973_v36 }
 0x104   :  { %590 = vmatpush.msra.mxu1 %v2150_v61 }
 0x105   :  { %457 = vmatpush.msrb.mxu2 %v2024_v44  ;;  %630 = vmatpush.msrb.mxu3 %v3276_v2 }
 0x106   :  { %591 = vmatpush.msra.mxu1 %v3277_v39 }
 0x107   :  { %458 = vmatpush.msrb.mxu2 %v3278_v42  ;;  %631 = vmatpush.msrb.mxu3 %v3279_v47 }
 0x108   :  { %592 = vmatpush.msra.mxu1 %v3280_v62 }
 0x109   :  { %459 = vmatpush.msrb.mxu2 %v3281_v63  ;;  %632 = vmatpush.msrb.mxu3 %v3282_v32 }
 0x10a   :  { %593 = vmatpush.msra.mxu1 %v3283_v23 }
 0x10b   :  { %598 = vmatpush.msra.mxu2 %v1779_v5  ;;  %633 = vmatpush.msrb.mxu3 %v3284_v48 }
 0x10d   :  { %599 = vmatpush.msra.mxu2 %v1791_v7 }
 0x10f   :  { %600 = vmatpush.msra.mxu2 %v1810_v10 }
 0x111   :  { %601 = vmatpush.msra.mxu2 %v1829_v13 }
 0x113   :  { %602 = vmatpush.msra.mxu2 %v1848_v16 }
 0x115   :  { %603 = vmatpush.msra.mxu2 %v1867_v19 }
 0x117   :  { %604 = vmatpush.msra.mxu2 %v1886_v22 }
 0x119   :  { %605 = vmatpush.msra.mxu2 %v1905_v25 }
 0x11b   :  { %606 = vmatpush.msra.mxu2 %v1924_v28 }
 0x11d   :  { %607 = vmatpush.msra.mxu2 %v1943_v31 }
 0x11f   :  { %608 = vmatpush.msra.mxu2 %v1962_v34 }
 0x121   :  { %609 = vmatpush.msra.mxu2 %v1981_v37 }
 0x123   :  { %610 = vmatpush.msra.mxu2 %v2000_v40 }
 0x125   :  { %611 = vmatpush.msra.mxu2 %v2024_v44 }
 0x127   :  { %612 = vmatpush.msra.mxu2 %v3278_v42 }
 0x129   :  { %613 = vmatpush.msra.mxu2 %v3281_v63 }
 0x167   :  { %v287_v26 = vpop.f32.mrf.mxu1 }
 0x168   :  { %v331_v17 = vadd.f32 %v1437_v20, %v287_v26 }
 0x16a   :  { %v1441_v29 = vmul.f32 -1.442695, %v331_v17 }
 0x16c   :  { %1506 = vpow2.f32 %v1441_v29 }
 0x16d   :  { %v267_v8 = vpop.f32.mrf.mxu2 }
 0x16e   :  { %v330_v11 = vadd.f32 %v1436_v14, %v267_v8  ;;  %v327_v38 = vpop.f32.mrf.mxu3  ;;  %v1438_v14 = vld [vmem:[%s3145_s0 + $0x30] sm:$0xff] }
 0x16f   :  { %v333_v35 = vadd.f32 %v1439_v41, %v327_v38 }
 0x170   :  { %v1440_v0 = vmul.f32 -1.442695, %v330_v11 }
 0x171   :  { %v1442_v45 = vmul.f32 -1.442695, %v333_v35 }
 0x172   :  { %v1507_v50 = vpop.eup %1506  ;;  %1508 = vpow2.f32 %v1440_v0 }
 0x173   :  { %v356_v51 = vadd.f32 1.0, %v1507_v50  ;;  %1510 = vpow2.f32 %v1442_v45 }
 0x175   :  { %1512 = vrcp.f32 %v356_v51  ;;  %v307_v41 = vpop.f32.mrf.mxu2  ;;  %v368_v50 = vand.u32 2147483648, %v356_v51  ;;  %vm362_vm13 = vweird.f32 %v356_v51  ;;  %v366_v23 = vand.u32 2147483647, %v356_v51 }
 0x176   :  { %v332_v38 = vadd.f32 %v1438_v14, %v307_v41 }
 0x177   :  { %v369_v47 = vor.u32 1.1754944e-38, %v368_v50  ;;  %vm367_vm1 = vcmp.eq.f32.partialorder %v366_v23, 8.507059e+37 }
 0x178   :  { %v1509_v20 = vpop.eup %1508 }
 0x179   :  { %v1511_v26 = vpop.eup %1510  ;;  %v337_v17 = vadd.f32 1.0, %v1509_v20 }
 0x17a   :  { %v376_v3 = vadd.f32 1.0, %v1511_v26 }
 0x17b   :  { %v1513_v29 = vpop.eup %1512  ;;  %1514 = vrcp.f32 %v337_v17  ;;  %v349_v32 = vand.u32 2147483648, %v337_v17  ;;  %v347_v42 = vand.u32 2147483647, %v337_v17  ;;  %vm343_vm0 = vweird.f32 %v337_v17 }
 0x17c   :  { %v358_v48 = vmul.f32 %v1513_v29, %v356_v51  ;;  %1516 = vrcp.f32 %v376_v3  ;;  %vm363_vm12 = vweird.f32 %v1513_v29  ;;  %vm382_vm5 = vweird.f32 %v376_v3 }
 0x17d   :  { %vm364_vm14 = vmor %vm362_vm13, %vm363_vm12  ;;  %1518 = vtanh.f32 %v332_v38  ;;  %v350_v14 = vor.u32 1.1754944e-38, %v349_v32  ;;  %vm348_vm3 = vcmp.eq.f32.partialorder %v347_v42, 8.507059e+37  ;;  %v386_v23 = vand.u32 2147483647, %v376_v3 }
 0x17e   :  { %v359_v63 = vsub.f32 1.0, %v358_v48 }
 0x17f   :  { %vm387_vm7 = vcmp.eq.f32.partialorder %v386_v23, 8.507059e+37 }
 0x180   :  { %v360_v8 = vmul.f32 %v1513_v29, %v359_v63 }
 0x181   :  { %v1515_v11 = vpop.eup %1514 }
 0x182   :  { %v1517_v35 = vpop.eup %1516  ;;  %v339_v0 = vmul.f32 %v1515_v11, %v337_v17  ;;  %v361_v45 = vadd.f32 %v1513_v29, %v360_v8  ;;  %vm344_vm15 = vweird.f32 %v1515_v11  ;;  %v1445_v17 = vld [vmem:[%s3145_s0 + $0x50] sm:$0xff] }
 0x183   :  { %v378_v20 = vmul.f32 %v1517_v35, %v376_v3  ;;  %vm345_vm2 = vmor %vm343_vm0, %vm344_vm15  ;;  %v1519_v39 = vpop.eup %1518  ;;  %vm383_vm4 = vweird.f32 %v1517_v35 }
 0x184   :  { %v340_v26 = vsub.f32 1.0, %v339_v0  ;;  %v365_v62 = vsel %vm364_vm14, %v1513_v29, %v361_v45  ;;  %v388_v45 = vand.u32 2147483648, %v376_v3  ;;  %vm384_vm6 = vmor %vm382_vm5, %vm383_vm4  ;;  %v3287_v3 = vld [vmem:[#allocation9_spill] sm:$0xff] }
 0x185   :  { %v379_v63 = vsub.f32 1.0, %v378_v20  ;;  %v370_v41 = vsel %vm367_vm1, %v369_v47, %v365_v62 }
 0x186   :  { %v341_v48 = vmul.f32 %v1515_v11, %v340_v26  ;;  %v392_v2 = vmul.f32 %v370_v41, %v2281_v1  ;;  %v389_v47 = vor.u32 1.1754944e-38, %v388_v45  ;;  %v3286_v1 = vld [vmem:[#allocation8_spill] sm:$0xff] }
 0x187   :  { %v380_v0 = vmul.f32 %v1517_v35, %v379_v63 }
 0x188   :  { %v342_v44 = vadd.f32 %v1515_v11, %v341_v48 }
 0x189   :  { %v381_v29 = vadd.f32 %v1517_v35, %v380_v0 }
 0x18a   :  { %v346_v8 = vsel %vm345_vm2, %v1515_v11, %v342_v44 }
 0x18b   :  { %v351_v51 = vsel %vm348_vm3, %v350_v14, %v346_v8  ;;  %v385_v32 = vsel %vm384_vm6, %v1517_v35, %v381_v29 }
 0x18c   :  { %v393_v38 = vmul.f32 %v1519_v39, %v351_v51  ;;  %v390_v42 = vsel %vm387_vm7, %v389_v47, %v385_v32 }
 0x18e   :  { %v2367_v26 = vadd.f32 %v393_v38, %v392_v2  ;;  %v3288_v2 = vld [vmem:[#allocation10_spill] sm:$0xff] }
 0x190   :  { %1520 = vtanh.f32 %v2367_v26 }
 0x196   :  { %v1521_v44 = vpop.eup %1520 }
 0x197   :  { %v2370_v62 = vmul.f32 %v1521_v44, %v390_v42 }
 0x199   :  { %3285 = vst [vmem:[#allocation35_spill] sm:$0xff] %v2370_v62  ;;  %420 = vmatmul.f32.vlgmr.msra.gmra.mxu0 %v2370_v62  ;;  %440 = vmatmul.f32.vlgmr.msrb.gmra.mxu1 %v2370_v62 }
 0x19a   :  { %460 = vmatmul.f32.vlgmr.msrb.gmra.mxu2 %v2370_v62  ;;  %480 = vmatmul.f32.vlgmr.msra.gmra.mxu3 %v2370_v62  ;;  %v2837_v62 = vld [vmem:[%s3146_s1 + $0x10] sm:$0xff] }
 0x19b   :  { %712 = vmatpush.msra.mxu0 %v3286_v1  ;;  %732 = vmatpush.msrb.mxu1 %v2018_v43  ;;  %v3289_v43 = vld [vmem:[#allocation11_spill] sm:$0xff] }
 0x19c   :  { %752 = vmatpush.msrb.mxu2 %v1779_v5  ;;  %772 = vmatpush.msra.mxu3 %v1774_v4  ;;  %v3290_v4 = vld [vmem:[#allocation12_spill] sm:$0xff]  ;;  %v3291_v5 = vld [vmem:[#allocation13_spill] sm:$0xff] }
 0x19d   :  { %713 = vmatpush.msra.mxu0 %v3287_v3  ;;  %733 = vmatpush.msrb.mxu1 %v2037_v46 }
 0x19e   :  { %753 = vmatpush.msrb.mxu2 %v1791_v7  ;;  %773 = vmatpush.msra.mxu3 %v1786_v6  ;;  %v3292_v6 = vld [vmem:[#allocation14_spill] sm:$0xff]  ;;  %v3293_v7 = vld [vmem:[#allocation15_spill] sm:$0xff] }
 0x19f   :  { %714 = vmatpush.msra.mxu0 %v3288_v2  ;;  %734 = vmatpush.msrb.mxu1 %v2055_v49 }
 0x1a0   :  { %754 = vmatpush.msrb.mxu2 %v1810_v10  ;;  %774 = vmatpush.msra.mxu3 %v1802_v9  ;;  %v3294_v9 = vld [vmem:[#allocation16_spill] sm:$0xff]  ;;  %v3295_v10 = vld [vmem:[#allocation17_spill] sm:$0xff] }
 0x1a1   :  { %715 = vmatpush.msra.mxu0 %v3289_v43  ;;  %735 = vmatpush.msrb.mxu1 %v2069_v52 }
 0x1a2   :  { %755 = vmatpush.msrb.mxu2 %v1829_v13  ;;  %775 = vmatpush.msra.mxu3 %v1821_v12  ;;  %v3296_v12 = vld [vmem:[#allocation18_spill] sm:$0xff]  ;;  %v3297_v13 = vld [vmem:[#allocation19_spill] sm:$0xff] }
 0x1a3   :  { %716 = vmatpush.msra.mxu0 %v3290_v4  ;;  %736 = vmatpush.msrb.mxu1 %v2078_v53 }
 0x1a4   :  { %756 = vmatpush.msrb.mxu2 %v1848_v16  ;;  %776 = vmatpush.msra.mxu3 %v1840_v15  ;;  %v3298_v15 = vld [vmem:[#allocation20_spill] sm:$0xff]  ;;  %v3299_v16 = vld [vmem:[#allocation23_spill] sm:$0xff] }
 0x1a5   :  { %717 = vmatpush.msra.mxu0 %v3291_v5  ;;  %737 = vmatpush.msrb.mxu1 %v2087_v54 }
 0x1a6   :  { %757 = vmatpush.msrb.mxu2 %v1867_v19  ;;  %777 = vmatpush.msra.mxu3 %v1859_v18  ;;  %v3300_v18 = vld [vmem:[#allocation21_spill] sm:$0xff]  ;;  %v3301_v19 = vld [vmem:[#allocation31_spill] sm:$0xff] }
 0x1a7   :  { %718 = vmatpush.msra.mxu0 %v3292_v6  ;;  %738 = vmatpush.msrb.mxu1 %v2096_v55  ;;  %v1446_v55 = vld [vmem:[%s3145_s0 + $0x58] sm:$0xff] }
 0x1a8   :  { %758 = vmatpush.msrb.mxu2 %v1886_v22  ;;  %778 = vmatpush.msra.mxu3 %v1878_v21  ;;  %v3302_v21 = vld [vmem:[#allocation26_spill] sm:$0xff]  ;;  %v3303_v22 = vld [vmem:[#allocation25_spill] sm:$0xff] }
 0x1a9   :  { %719 = vmatpush.msra.mxu0 %v3293_v7  ;;  %739 = vmatpush.msrb.mxu1 %v2105_v56 }
 0x1aa   :  { %759 = vmatpush.msrb.mxu2 %v1905_v25  ;;  %779 = vmatpush.msra.mxu3 %v1897_v24  ;;  %v3304_v24 = vld [vmem:[#allocation22_spill] sm:$0xff]  ;;  %v3305_v25 = vld [vmem:[#allocation32_spill] sm:$0xff] }
 0x1ab   :  { %720 = vmatpush.msra.mxu0 %v3294_v9  ;;  %740 = vmatpush.msrb.mxu1 %v2114_v57 }
 0x1ac   :  { %760 = vmatpush.msrb.mxu2 %v1924_v28  ;;  %780 = vmatpush.msra.mxu3 %v1916_v27  ;;  %v3306_v27 = vld [vmem:[#allocation28_spill] sm:$0xff]  ;;  %v3307_v28 = vld [vmem:[#allocation27_spill] sm:$0xff] }
 0x1ad   :  { %721 = vmatpush.msra.mxu0 %v3295_v10  ;;  %741 = vmatpush.msrb.mxu1 %v2123_v58 }
 0x1ae   :  { %761 = vmatpush.msrb.mxu2 %v1943_v31  ;;  %781 = vmatpush.msra.mxu3 %v1935_v30  ;;  %v3308_v30 = vld [vmem:[#allocation24_spill] sm:$0xff]  ;;  %v3309_v31 = vld [vmem:[#allocation33_spill] sm:$0xff] }
 0x1af   :  { %722 = vmatpush.msra.mxu0 %v3296_v12  ;;  %742 = vmatpush.msrb.mxu1 %v2132_v59 }
 0x1b0   :  { %762 = vmatpush.msrb.mxu2 %v1962_v34  ;;  %782 = vmatpush.msra.mxu3 %v1954_v33  ;;  %v3310_v33 = vld [vmem:[#allocation30_spill] sm:$0xff]  ;;  %v3311_v34 = vld [vmem:[#allocation29_spill] sm:$0xff] }
 0x1b1   :  { %723 = vmatpush.msra.mxu0 %v3297_v13  ;;  %743 = vmatpush.msrb.mxu1 %v2141_v60  ;;  %3337 = vst [vmem:[#allocation29_spill] sm:$0xff] %v2837_v62 }
 0x1b2   :  { %763 = vmatpush.msrb.mxu2 %v1981_v37  ;;  %783 = vmatpush.msra.mxu3 %v1973_v36  ;;  %v1443_v36 = vld [vmem:[%s3145_s0 + $0x40] sm:$0xff]  ;;  %v1444_v37 = vld [vmem:[%s3145_s0 + $0x48] sm:$0xff] }
 0x1b3   :  { %724 = vmatpush.msra.mxu0 %v3298_v15  ;;  %744 = vmatpush.msrb.mxu1 %v2150_v61 }
 0x1b4   :  { %764 = vmatpush.msrb.mxu2 %v2000_v40  ;;  %784 = vmatpush.msra.mxu3 %v3299_v16 }
 0x1b5   :  { %725 = vmatpush.msra.mxu0 %v3300_v18  ;;  %745 = vmatpush.msrb.mxu1 %v3301_v19 }
 0x1b6   :  { %765 = vmatpush.msrb.mxu2 %v3302_v21  ;;  %785 = vmatpush.msra.mxu3 %v3303_v22 }
 0x1b7   :  { %726 = vmatpush.msra.mxu0 %v3304_v24  ;;  %746 = vmatpush.msrb.mxu1 %v3305_v25 }
 0x1b8   :  { %766 = vmatpush.msrb.mxu2 %v3306_v27  ;;  %786 = vmatpush.msra.mxu3 %v3307_v28  ;;  %v2471_v28 = vld [vmem:[%s3146_s1 + $0x1e8] sm:$0xff] }
 0x1b9   :  { %727 = vmatpush.msra.mxu0 %v3308_v30  ;;  %747 = vmatpush.msrb.mxu1 %v3309_v31  ;;  %v2477_v30 = vld [vmem:[%s3146_s1 + $0x1f0] sm:$0xff]  ;;  %v2483_v31 = vld [vmem:[%s3146_s1 + $0x1f8] sm:$0xff] }
 0x1ba   :  { %767 = vmatpush.msrb.mxu2 %v3310_v33  ;;  %787 = vmatpush.msra.mxu3 %v3311_v34  ;;  %v2489_v33 = vld [vmem:[%s3146_s1 + $0x1c0] sm:$0xff]  ;;  %v2495_v34 = vld [vmem:[%s3146_s1 + $0x1c8] sm:$0xff] }
 0x216   :  { %v421_v40 = vpop.f32.mrf.mxu0  ;;  %v441_v46 = vpop.f32.mrf.mxu1 }
 0x217   :  { %v484_v49 = vadd.f32 %v1443_v36, %v421_v40  ;;  %v485_v52 = vadd.f32 %v1444_v37, %v441_v46  ;;  %v2501_v36 = vld [vmem:[%s3146_s1 + $0x1d0] sm:$0xff]  ;;  %v2507_v37 = vld [vmem:[%s3146_s1 + $0x1d8] sm:$0xff]  ;;  %v2513_v40 = vld [vmem:[%s3146_s1 + $0x1a0] sm:$0xff] }
 0x218   :  { %v2519_v46 = vld [vmem:[%s3146_s1 + $0x1a8] sm:$0xff] }
 0x219   :  { %v1447_v53 = vmul.f32 -1.442695, %v484_v49  ;;  %v1448_v54 = vmul.f32 -1.442695, %v485_v52  ;;  %v2525_v49 = vld [vmem:[%s3146_s1 + $0x1b0] sm:$0xff]  ;;  %v2531_v52 = vld [vmem:[%s3146_s1 + $0x1b8] sm:$0xff] }
 0x21b   :  { %1522 = vpow2.f32 %v1447_v53  ;;  %v2537_v53 = vld [vmem:[%s3146_s1 + $0x180] sm:$0xff] }
 0x21c   :  { %1524 = vpow2.f32 %v1448_v54  ;;  %v2543_v54 = vld [vmem:[%s3146_s1 + $0x188] sm:$0xff] }
 0x21d   :  { %v481_v56 = vpop.f32.mrf.mxu3  ;;  %v461_v11 = vpop.f32.mrf.mxu2 }
 0x21e   :  { %v487_v57 = vadd.f32 %v1446_v55, %v481_v56  ;;  %v486_v48 = vadd.f32 %v1445_v17, %v461_v11  ;;  %v2549_v55 = vld [vmem:[%s3146_s1 + $0x190] sm:$0xff]  ;;  %v2555_v56 = vld [vmem:[%s3146_s1 + $0x198] sm:$0xff] }
 0x21f   :  { %v2597_v17 = vld [vmem:[%s3146_s1 + $0x150] sm:$0xff]  ;;  %v2603_v11 = vld [vmem:[%s3146_s1 + $0x158] sm:$0xff] }
 0x220   :  { %v1449_v58 = vmul.f32 -1.442695, %v487_v57  ;;  %v2561_v57 = vld [vmem:[%s3146_s1 + $0x160] sm:$0xff] }
 0x221   :  { %v1523_v59 = vpop.eup %1522 }
 0x222   :  { %v1525_v60 = vpop.eup %1524  ;;  %v491_v61 = vadd.f32 1.0, %v1523_v59  ;;  %1526 = vpow2.f32 %v1449_v58  ;;  %v2567_v58 = vld [vmem:[%s3146_s1 + $0x168] sm:$0xff]  ;;  %v2573_v59 = vld [vmem:[%s3146_s1 + $0x170] sm:$0xff] }
 0x223   :  { %v510_v39 = vadd.f32 1.0, %v1525_v60  ;;  %v2579_v60 = vld [vmem:[%s3146_s1 + $0x178] sm:$0xff] }
 0x224   :  { %1528 = vrcp.f32 %v491_v61  ;;  %v503_v51 = vand.u32 2147483648, %v491_v61  ;;  %v501_v45 = vand.u32 2147483647, %v491_v61  ;;  %vm497_vm10 = vweird.f32 %v491_v61 }
 0x225   :  { %1530 = vrcp.f32 %v510_v39  ;;  %v522_v38 = vand.u32 2147483648, %v510_v39  ;;  %v520_v32 = vand.u32 2147483647, %v510_v39  ;;  %vm516_vm11 = vweird.f32 %v510_v39 }
 0x226   :  { %v504_v42 = vor.u32 1.1754944e-38, %v503_v51  ;;  %vm502_vm14 = vcmp.eq.f32.partialorder %v501_v45, 8.507059e+37  ;;  %v2663_v51 = vld [vmem:[%s3146_s1 + $0xe8] sm:$0xff]  ;;  %v2681_v45 = vld [vmem:[%s3146_s1 + $0xc0] sm:$0xff] }
 0x227   :  { %v523_v2 = vor.u32 1.1754944e-38, %v522_v38  ;;  %vm521_vm15 = vcmp.eq.f32.partialorder %v520_v32, 8.507059e+37  ;;  %v2669_v38 = vld [vmem:[%s3146_s1 + $0xf0] sm:$0xff] }
 0x228   :  { %v1527_v35 = vpop.eup %1526  ;;  %v2693_v32 = vld [vmem:[%s3146_s1 + $0xd0] sm:$0xff] }
 0x229   :  { %v530_v50 = vadd.f32 1.0, %v1527_v35  ;;  %v2609_v35 = vld [vmem:[%s3146_s1 + $0x120] sm:$0xff]  ;;  %3313 = vst [vmem:[#allocation9_spill] sm:$0xff] %v2693_v32 }
 0x22a   :  { %v1529_v20 = vpop.eup %1528 }
 0x22b   :  { %v1531_v63 = vpop.eup %1530  ;;  %v493_v14 = vmul.f32 %v1529_v20, %v491_v61  ;;  %1532 = vrcp.f32 %v530_v50  ;;  %vm498_vm8 = vweird.f32 %v1529_v20  ;;  %v542_v18 = vand.u32 2147483648, %v530_v50  ;;  %v2585_v61 = vld [vmem:[%s3146_s1 + $0x140] sm:$0xff] }
 0x22c   :  { %v512_v41 = vmul.f32 %v1531_v63, %v510_v39  ;;  %1534 = vtanh.f32 %v486_v48  ;;  %vm517_vm9 = vweird.f32 %v1531_v63  ;;  %vm499_vm12 = vmor %vm497_vm10, %vm498_vm8  ;;  %vm536_vm1 = vweird.f32 %v530_v50  ;;  %v2591_v39 = vld [vmem:[%s3146_s1 + $0x148] sm:$0xff]  ;;  %v2627_v48 = vld [vmem:[%s3146_s1 + $0x138] sm:$0xff] }
 0x22d   :  { %v494_v8 = vsub.f32 1.0, %v493_v14  ;;  %vm518_vm13 = vmor %vm516_vm11, %vm517_vm9  ;;  %v540_v19 = vand.u32 2147483647, %v530_v50  ;;  %v543_v22 = vor.u32 1.1754944e-38, %v542_v18  ;;  %v2639_v14 = vld [vmem:[%s3146_s1 + $0x108] sm:$0xff]  ;;  %v2795_v18 = vld [vmem:[%s3146_s1 + $0x58] sm:$0xff] }
 0x22e   :  { %v513_v0 = vsub.f32 1.0, %v512_v41  ;;  %v2645_v41 = vld [vmem:[%s3146_s1 + $0x110] sm:$0xff]  ;;  %3330 = vst [vmem:[#allocation22_spill] sm:$0xff] %v2795_v18 }
 0x22f   :  { %v495_v29 = vmul.f32 %v1529_v20, %v494_v8  ;;  %vm541_vm3 = vcmp.eq.f32.partialorder %v540_v19, 8.507059e+37  ;;  %v2651_v8 = vld [vmem:[%s3146_s1 + $0x118] sm:$0xff]  ;;  %v2801_v19 = vld [vmem:[%s3146_s1 + $0x20] sm:$0xff] }
 0x230   :  { %v514_v23 = vmul.f32 %v1531_v63, %v513_v0  ;;  %v2657_v0 = vld [vmem:[%s3146_s1 + $0xe0] sm:$0xff]  ;;  %3331 = vst [vmem:[#allocation32_spill] sm:$0xff] %v2801_v19 }
 0x231   :  { %v1533_v47 = vpop.eup %1532  ;;  %v496_v44 = vadd.f32 %v1529_v20, %v495_v29  ;;  %v2675_v29 = vld [vmem:[%s3146_s1 + $0xf8] sm:$0xff] }
 0x232   :  { %v515_v1 = vadd.f32 %v1531_v63, %v514_v23  ;;  %v532_v3 = vmul.f32 %v1533_v47, %v530_v50  ;;  %v1535_v4 = vpop.eup %1534  ;;  %vm537_vm0 = vweird.f32 %v1533_v47  ;;  %v2615_v50 = vld [vmem:[%s3146_s1 + $0x128] sm:$0xff] }
 0x233   :  { %v500_v43 = vsel %vm499_vm12, %v1529_v20, %v496_v44  ;;  %vm538_vm2 = vmor %vm536_vm1, %vm537_vm0  ;;  %v2621_v20 = vld [vmem:[%s3146_s1 + $0x130] sm:$0xff]  ;;  %v2687_v23 = vld [vmem:[%s3146_s1 + $0xc8] sm:$0xff] }
 0x234   :  { %v505_v5 = vsel %vm502_vm14, %v504_v42, %v500_v43  ;;  %v519_v6 = vsel %vm518_vm13, %v1531_v63, %v515_v1  ;;  %v533_v7 = vsub.f32 1.0, %v532_v3  ;;  %v2633_v63 = vld [vmem:[%s3146_s1 + $0x100] sm:$0xff]  ;;  %v2711_v42 = vld [vmem:[%s3146_s1 + $0xa8] sm:$0xff]  ;;  %v2717_v1 = vld [vmem:[%s3146_s1 + $0xb0] sm:$0xff] }
 0x235   :  { %v524_v9 = vsel %vm521_vm15, %v523_v2, %v519_v6  ;;  %v547_v10 = vmul.f32 %v1535_v4, %v505_v5  ;;  %v2705_v44 = vld [vmem:[%s3146_s1 + $0xa0] sm:$0xff]  ;;  %3316 = vst [vmem:[#allocation12_spill] sm:$0xff] %v2711_v42  ;;  %v2723_v3 = vld [vmem:[%s3146_s1 + $0xb8] sm:$0xff]  ;;  %v2735_v43 = vld [vmem:[%s3146_s1 + $0x88] sm:$0xff] }
 0x236   :  { %v546_v12 = vmul.f32 %v524_v9, %v2367_v26  ;;  %v534_v13 = vmul.f32 %v1533_v47, %v533_v7  ;;  %v2465_v26 = vld [vmem:[%s3146_s1 + $0x1e0] sm:$0xff]  ;;  %3315 = vst [vmem:[#allocation11_spill] sm:$0xff] %v2705_v44  ;;  %v2741_v4 = vld [vmem:[%s3146_s1 + $0x90] sm:$0xff]  ;;  %v2747_v5 = vld [vmem:[%s3146_s1 + $0x98] sm:$0xff] }
 0x237   :  { %3317 = vst [vmem:[#allocation13_spill] sm:$0xff] %v2717_v1  ;;  %v2729_v2 = vld [vmem:[%s3146_s1 + $0x80] sm:$0xff]  ;;  %v2759_v7 = vld [vmem:[%s3146_s1 + $0x68] sm:$0xff]  ;;  %v2765_v9 = vld [vmem:[%s3146_s1 + $0x70] sm:$0xff] }
 0x238   :  { %v2453_v15 = vadd.f32 %v547_v10, %v546_v12  ;;  %v535_v16 = vadd.f32 %v1533_v47, %v534_v13  ;;  %3318 = vst [vmem:[#allocation14_spill] sm:$0xff] %v2723_v3  ;;  %v2753_v6 = vld [vmem:[%s3146_s1 + $0x60] sm:$0xff]  ;;  %v2771_v10 = vld [vmem:[%s3146_s1 + $0x78] sm:$0xff]  ;;  %v2783_v13 = vld [vmem:[%s3146_s1 + $0x48] sm:$0xff] }
 0x239   :  { %3319 = vst [vmem:[#allocation15_spill] sm:$0xff] %v2729_v2  ;;  %v2777_v12 = vld [vmem:[%s3146_s1 + $0x40] sm:$0xff] }
 0x23a   :  { %1536 = vtanh.f32 %v2453_v15  ;;  %v539_v21 = vsel %vm538_vm2, %v1533_v47, %v535_v16  ;;  %v2699_v47 = vld [vmem:[%s3146_s1 + $0xd8] sm:$0xff]  ;;  %3320 = vst [vmem:[#allocation16_spill] sm:$0xff] %v2735_v43  ;;  %v2789_v16 = vld [vmem:[%s3146_s1 + $0x50] sm:$0xff] }
 0x23b   :  { %v544_v25 = vsel %vm541_vm3, %v543_v22, %v539_v21  ;;  %3314 = vst [vmem:[#allocation10_spill] sm:$0xff] %v2699_v47  ;;  %v2807_v21 = vld [vmem:[%s3146_s1 + $0x28] sm:$0xff]  ;;  %v2813_v22 = vld [vmem:[%s3146_s1 + $0x30] sm:$0xff] }
 0x23c   :  { %3321 = vst [vmem:[#allocation17_spill] sm:$0xff] %v2741_v4 }
 0x23d   :  { %3322 = vst [vmem:[#allocation18_spill] sm:$0xff] %v2747_v5 }
 0x23e   :  { %3323 = vst [vmem:[#allocation19_spill] sm:$0xff] %v2753_v6 }
 0x23f   :  { %3324 = vst [vmem:[#allocation20_spill] sm:$0xff] %v2759_v7 }
 0x240   :  { %v1537_v24 = vpop.eup %1536  ;;  %3325 = vst [vmem:[#allocation23_spill] sm:$0xff] %v2765_v9 }
 0x241   :  { %v2456_v27 = vmul.f32 %v1537_v24, %v544_v25  ;;  %3326 = vst [vmem:[#allocation21_spill] sm:$0xff] %v2771_v10  ;;  %v2819_v24 = vld [vmem:[%s3146_s1 + $0x38] sm:$0xff]  ;;  %v2825_v25 = vld [vmem:[%s3146_s1] sm:$0xff] }
 0x242   :  { %3327 = vst [vmem:[#allocation31_spill] sm:$0xff] %v2777_v12 }
 0x243   :  { %3312 = vst [vmem:[#allocation8_spill] sm:$0xff] %v2456_v27  ;;  %574 = vmatmul.f32.vlgmr.msrb.gmra.mxu0 %v2456_v27  ;;  %594 = vmatmul.f32.vlgmr.msra.gmra.mxu1 %v2456_v27 }
 0x244   :  { %614 = vmatmul.f32.vlgmr.msra.gmra.mxu2 %v2456_v27  ;;  %634 = vmatmul.f32.vlgmr.msrb.gmra.mxu3 %v2456_v27  ;;  %3328 = vst [vmem:[#allocation26_spill] sm:$0xff] %v2783_v13  ;;  %v2831_v27 = vld [vmem:[%s3146_s1 + $0x8] sm:$0xff] }
 0x245   :  { %866 = vmatpush.msrb.mxu0 %v2465_v26  ;;  %886 = vmatpush.msra.mxu1 %v2471_v28  ;;  %3329 = vst [vmem:[#allocation25_spill] sm:$0xff] %v2789_v16 }
 0x246   :  { %906 = vmatpush.msra.mxu2 %v2477_v30  ;;  %926 = vmatpush.msrb.mxu3 %v2483_v31  ;;  %3332 = vst [vmem:[#allocation28_spill] sm:$0xff] %v2807_v21 }
 0x247   :  { %867 = vmatpush.msrb.mxu0 %v2489_v33  ;;  %887 = vmatpush.msra.mxu1 %v2495_v34  ;;  %3333 = vst [vmem:[#allocation27_spill] sm:$0xff] %v2813_v22 }
 0x248   :  { %907 = vmatpush.msra.mxu2 %v2501_v36  ;;  %927 = vmatpush.msrb.mxu3 %v2507_v37  ;;  %3334 = vst [vmem:[#allocation24_spill] sm:$0xff] %v2819_v24 }
 0x249   :  { %868 = vmatpush.msrb.mxu0 %v2513_v40  ;;  %888 = vmatpush.msra.mxu1 %v2519_v46  ;;  %3335 = vst [vmem:[#allocation33_spill] sm:$0xff] %v2825_v25 }
 0x24a   :  { %908 = vmatpush.msra.mxu2 %v2525_v49  ;;  %928 = vmatpush.msrb.mxu3 %v2531_v52  ;;  %3336 = vst [vmem:[#allocation30_spill] sm:$0xff] %v2831_v27 }
 0x24b   :  { %869 = vmatpush.msrb.mxu0 %v2537_v53  ;;  %889 = vmatpush.msra.mxu1 %v2543_v54 }
 0x24c   :  { %909 = vmatpush.msra.mxu2 %v2549_v55  ;;  %929 = vmatpush.msrb.mxu3 %v2555_v56 }
 0x24d   :  { %870 = vmatpush.msrb.mxu0 %v2561_v57  ;;  %890 = vmatpush.msra.mxu1 %v2567_v58 }
 0x24e   :  { %910 = vmatpush.msra.mxu2 %v2573_v59  ;;  %930 = vmatpush.msrb.mxu3 %v2579_v60 }
 0x24f   :  { %871 = vmatpush.msrb.mxu0 %v2585_v61  ;;  %891 = vmatpush.msra.mxu1 %v2591_v39 }
 0x250   :  { %911 = vmatpush.msra.mxu2 %v2597_v17  ;;  %931 = vmatpush.msrb.mxu3 %v2603_v11 }
 0x251   :  { %872 = vmatpush.msrb.mxu0 %v2609_v35  ;;  %892 = vmatpush.msra.mxu1 %v2615_v50 }
 0x252   :  { %912 = vmatpush.msra.mxu2 %v2621_v20  ;;  %932 = vmatpush.msrb.mxu3 %v2627_v48 }
 0x253   :  { %873 = vmatpush.msrb.mxu0 %v2633_v63  ;;  %893 = vmatpush.msra.mxu1 %v2639_v14 }
 0x254   :  { %913 = vmatpush.msra.mxu2 %v2645_v41  ;;  %933 = vmatpush.msrb.mxu3 %v2651_v8 }
 0x255   :  { %874 = vmatpush.msrb.mxu0 %v2657_v0  ;;  %894 = vmatpush.msra.mxu1 %v2663_v51 }
 0x256   :  { %914 = vmatpush.msra.mxu2 %v2669_v38  ;;  %934 = vmatpush.msrb.mxu3 %v2675_v29 }
 0x257   :  { %875 = vmatpush.msrb.mxu0 %v2681_v45  ;;  %895 = vmatpush.msra.mxu1 %v2687_v23 }
 0x258   :  { %915 = vmatpush.msra.mxu2 %v2693_v32  ;;  %935 = vmatpush.msrb.mxu3 %v2699_v47 }
 0x259   :  { %876 = vmatpush.msrb.mxu0 %v2705_v44  ;;  %896 = vmatpush.msra.mxu1 %v2711_v42 }
 0x25a   :  { %916 = vmatpush.msra.mxu2 %v2717_v1  ;;  %936 = vmatpush.msrb.mxu3 %v2723_v3 }
 0x25b   :  { %877 = vmatpush.msrb.mxu0 %v2729_v2  ;;  %897 = vmatpush.msra.mxu1 %v2735_v43 }
 0x25c   :  { %917 = vmatpush.msra.mxu2 %v2741_v4  ;;  %937 = vmatpush.msrb.mxu3 %v2747_v5 }
 0x25d   :  { %878 = vmatpush.msrb.mxu0 %v2753_v6  ;;  %898 = vmatpush.msra.mxu1 %v2759_v7 }
 0x25e   :  { %918 = vmatpush.msra.mxu2 %v2765_v9  ;;  %938 = vmatpush.msrb.mxu3 %v2771_v10 }
 0x25f   :  { %879 = vmatpush.msrb.mxu0 %v2777_v12  ;;  %899 = vmatpush.msra.mxu1 %v2783_v13  ;;  %v1453_v13 = vld [vmem:[%s3145_s0 + $0x78] sm:$0xff] }
 0x260   :  { %919 = vmatpush.msra.mxu2 %v2789_v16  ;;  %939 = vmatpush.msrb.mxu3 %v2795_v18 }
 0x261   :  { %880 = vmatpush.msrb.mxu0 %v2801_v19  ;;  %900 = vmatpush.msra.mxu1 %v2807_v21 }
 0x262   :  { %920 = vmatpush.msra.mxu2 %v2813_v22  ;;  %940 = vmatpush.msrb.mxu3 %v2819_v24  ;;  %v2843_v24 = vld [vmem:[%s3146_s1 + $0x18] sm:$0xff] }
 0x263   :  { %881 = vmatpush.msrb.mxu0 %v2825_v25  ;;  %901 = vmatpush.msra.mxu1 %v2831_v27  ;;  %3338 = vst [vmem:[#allocation36_spill] sm:$0xff] %v2843_v24  ;;  %v1450_v25 = vld [vmem:[%s3145_s0 + $0x60] sm:$0xff]  ;;  %v1451_v27 = vld [vmem:[%s3145_s0 + $0x68] sm:$0xff] }
 0x264   :  { %921 = vmatpush.msra.mxu2 %v2837_v62  ;;  %941 = vmatpush.msrb.mxu3 %v2843_v24 }
 0x2c0   :  { %v575_v22 = vpop.f32.mrf.mxu0  ;;  %v595_v21 = vpop.f32.mrf.mxu1 }
 0x2c1   :  { %v638_v19 = vadd.f32 %v1450_v25, %v575_v22  ;;  %v639_v18 = vadd.f32 %v1451_v27, %v595_v21  ;;  %v1452_v27 = vld [vmem:[%s3145_s0 + $0x70] sm:$0xff] }
 0x2c3   :  { %v1454_v62 = vmul.f32 -1.442695, %v638_v19  ;;  %v1455_v16 = vmul.f32 -1.442695, %v639_v18 }
 0x2c5   :  { %1538 = vpow2.f32 %v1454_v62 }
 0x2c6   :  { %1540 = vpow2.f32 %v1455_v16 }
 0x2c7   :  { %v635_v24 = vpop.f32.mrf.mxu3  ;;  %v615_v62 = vpop.f32.mrf.mxu2 }
 0x2c8   :  { %v641_v12 = vadd.f32 %v1453_v13, %v635_v24  ;;  %v640_v22 = vadd.f32 %v1452_v27, %v615_v62 }
 0x2ca   :  { %v1456_v10 = vmul.f32 -1.442695, %v641_v12 }
 0x2cb   :  { %v1539_v9 = vpop.eup %1538 }
 0x2cc   :  { %v1541_v7 = vpop.eup %1540  ;;  %v645_v6 = vadd.f32 1.0, %v1539_v9  ;;  %1542 = vpow2.f32 %v1456_v10 }
 0x2cd   :  { %v664_v5 = vadd.f32 1.0, %v1541_v7 }
 0x2ce   :  { %1544 = vrcp.f32 %v645_v6  ;;  %v657_v9 = vand.u32 2147483648, %v645_v6  ;;  %v655_v4 = vand.u32 2147483647, %v645_v6  ;;  %vm651_vm6 = vweird.f32 %v645_v6 }
 0x2cf   :  { %1546 = vrcp.f32 %v664_v5  ;;  %v676_v7 = vand.u32 2147483648, %v664_v5  ;;  %v674_v2 = vand.u32 2147483647, %v664_v5  ;;  %vm670_vm7 = vweird.f32 %v664_v5 }
 0x2d0   :  { %v658_v27 = vor.u32 1.1754944e-38, %v657_v9  ;;  %vm656_vm10 = vcmp.eq.f32.partialorder %v655_v4, 8.507059e+37 }
 0x2d1   :  { %vm675_vm11 = vcmp.eq.f32.partialorder %v674_v2, 8.507059e+37 }
 0x2d2   :  { %v1543_v18 = vpop.eup %1542 }
 0x2d3   :  { %v684_v19 = vadd.f32 1.0, %v1543_v18 }
 0x2d4   :  { %v1545_v21 = vpop.eup %1544 }
 0x2d5   :  { %v1547_v16 = vpop.eup %1546  ;;  %v647_v25 = vmul.f32 %v1545_v21, %v645_v6  ;;  %1548 = vrcp.f32 %v684_v19  ;;  %vm652_vm4 = vweird.f32 %v1545_v21  ;;  %vm690_vm13 = vweird.f32 %v684_v19 }
 0x2d6   :  { %v666_v12 = vmul.f32 %v1547_v16, %v664_v5  ;;  %1550 = vtanh.f32 %v640_v22  ;;  %vm671_vm5 = vweird.f32 %v1547_v16  ;;  %vm653_vm8 = vmor %vm651_vm6, %vm652_vm4 }
 0x2d7   :  { %v648_v13 = vsub.f32 1.0, %v647_v25  ;;  %vm672_vm9 = vmor %vm670_vm7, %vm671_vm5  ;;  %v677_v25 = vor.u32 1.1754944e-38, %v676_v7  ;;  %v3347_v7 = vld [vmem:[#allocation16_spill] sm:$0xff] }
 0x2d8   :  { %v667_v24 = vsub.f32 1.0, %v666_v12 }
 0x2d9   :  { %v649_v10 = vmul.f32 %v1545_v21, %v648_v13 }
 0x2da   :  { %v668_v43 = vmul.f32 %v1547_v16, %v667_v24 }
 0x2db   :  { %v1549_v3 = vpop.eup %1548  ;;  %v650_v1 = vadd.f32 %v1545_v21, %v649_v10 }
 0x2dc   :  { %v669_v62 = vadd.f32 %v1547_v16, %v668_v43  ;;  %v686_v18 = vmul.f32 %v1549_v3, %v684_v19  ;;  %v1551_v22 = vpop.eup %1550  ;;  %vm691_vm12 = vweird.f32 %v1549_v3  ;;  %v696_v43 = vand.u32 2147483648, %v684_v19 }
 0x2dd   :  { %v654_v12 = vsel %vm653_vm8, %v1545_v21, %v650_v1  ;;  %v694_v1 = vand.u32 2147483647, %v684_v19  ;;  %vm692_vm14 = vmor %vm690_vm13, %vm691_vm12  ;;  %v3346_v19 = vld [vmem:[#allocation15_spill] sm:$0xff] }
 0x2de   :  { %v659_v42 = vsel %vm656_vm10, %v658_v27, %v654_v12  ;;  %v673_v13 = vsel %vm672_vm9, %v1547_v16, %v669_v62  ;;  %v687_v44 = vsub.f32 1.0, %v686_v18  ;;  %v697_v21 = vor.u32 1.1754944e-38, %v696_v43  ;;  %v3348_v27 = vld [vmem:[#allocation17_spill] sm:$0xff]  ;;  %v3349_v62 = vld [vmem:[#allocation18_spill] sm:$0xff]  ;;  %v3350_v18 = vld [vmem:[#allocation19_spill] sm:$0xff] }
 0x2df   :  { %v678_v24 = vsel %vm675_vm11, %v677_v25, %v673_v13  ;;  %v701_v47 = vmul.f32 %v1551_v22, %v659_v42  ;;  %vm695_vm15 = vcmp.eq.f32.partialorder %v694_v1, 8.507059e+37  ;;  %v3344_v42 = vld [vmem:[#allocation13_spill] sm:$0xff]  ;;  %v3351_v25 = vld [vmem:[#allocation20_spill] sm:$0xff]  ;;  %v3352_v12 = vld [vmem:[#allocation23_spill] sm:$0xff] }
 0x2e0   :  { %v700_v32 = vmul.f32 %v678_v24, %v2453_v15  ;;  %v688_v10 = vmul.f32 %v1549_v3, %v687_v44  ;;  %v3340_v15 = vld [vmem:[#allocation9_spill] sm:$0xff]  ;;  %v3343_v44 = vld [vmem:[#allocation12_spill] sm:$0xff]  ;;  %v3354_v13 = vld [vmem:[#allocation31_spill] sm:$0xff] }
 0x2e1   :  { %v3353_v22 = vld [vmem:[#allocation21_spill] sm:$0xff]  ;;  %v3355_v24 = vld [vmem:[#allocation26_spill] sm:$0xff]  ;;  %v3358_v43 = vld [vmem:[#allocation32_spill] sm:$0xff] }
 0x2e2   :  { %v2859_v6 = vadd.f32 %v701_v47, %v700_v32  ;;  %v689_v5 = vadd.f32 %v1549_v3, %v688_v10  ;;  %v3341_v32 = vld [vmem:[#allocation10_spill] sm:$0xff]  ;;  %v3342_v47 = vld [vmem:[#allocation11_spill] sm:$0xff]  ;;  %v3356_v10 = vld [vmem:[#allocation25_spill] sm:$0xff] }
 0x2e3   :  { %v3359_v1 = vld [vmem:[#allocation28_spill] sm:$0xff] }
 0x2e4   :  { %1552 = vtanh.f32 %v2859_v6  ;;  %v693_v4 = vsel %vm692_vm14, %v1549_v3, %v689_v5  ;;  %v3345_v3 = vld [vmem:[#allocation14_spill] sm:$0xff] }
 0x2e5   :  { %v698_v16 = vsel %vm695_vm15, %v697_v21, %v693_v4  ;;  %v3357_v5 = vld [vmem:[#allocation22_spill] sm:$0xff]  ;;  %v3360_v4 = vld [vmem:[#allocation27_spill] sm:$0xff]  ;;  %v3361_v21 = vld [vmem:[#allocation24_spill] sm:$0xff] }
 0x2ea   :  { %v1553_v2 = vpop.eup %1552 }
 0x2eb   :  { %v2862_v9 = vmul.f32 %v1553_v2, %v698_v16  ;;  %v3362_v2 = vld [vmem:[#allocation33_spill] sm:$0xff]  ;;  %v3363_v16 = vld [vmem:[#allocation30_spill] sm:$0xff] }
 0x2ed   :  { %3339 = vst [vmem:[#allocation37_spill] sm:$0xff] %v2862_v9  ;;  %728 = vmatmul.f32.vlgmr.msra.gmra.mxu0 %v2862_v9  ;;  %748 = vmatmul.f32.vlgmr.msrb.gmra.mxu1 %v2862_v9 }
 0x2ee   :  { %768 = vmatmul.f32.vlgmr.msrb.gmra.mxu2 %v2862_v9  ;;  %788 = vmatmul.f32.vlgmr.msra.gmra.mxu3 %v2862_v9  ;;  %v3364_v9 = vld [vmem:[#allocation29_spill] sm:$0xff] }
 0x2ef   :  { %1020 = vmatpush.msra.mxu0 %v2465_v26  ;;  %1040 = vmatpush.msrb.mxu1 %v2471_v28 }
 0x2f0   :  { %1060 = vmatpush.msrb.mxu2 %v2477_v30  ;;  %1080 = vmatpush.msra.mxu3 %v2483_v31 }
 0x2f1   :  { %1021 = vmatpush.msra.mxu0 %v2489_v33  ;;  %1041 = vmatpush.msrb.mxu1 %v2495_v34 }
 0x2f2   :  { %1061 = vmatpush.msrb.mxu2 %v2501_v36  ;;  %1081 = vmatpush.msra.mxu3 %v2507_v37 }
 0x2f3   :  { %1022 = vmatpush.msra.mxu0 %v2513_v40  ;;  %1042 = vmatpush.msrb.mxu1 %v2519_v46 }
 0x2f4   :  { %1062 = vmatpush.msrb.mxu2 %v2525_v49  ;;  %1082 = vmatpush.msra.mxu3 %v2531_v52 }
 0x2f5   :  { %1023 = vmatpush.msra.mxu0 %v2537_v53  ;;  %1043 = vmatpush.msrb.mxu1 %v2543_v54 }
 0x2f6   :  { %1063 = vmatpush.msrb.mxu2 %v2549_v55  ;;  %1083 = vmatpush.msra.mxu3 %v2555_v56 }
 0x2f7   :  { %1024 = vmatpush.msra.mxu0 %v2561_v57  ;;  %1044 = vmatpush.msrb.mxu1 %v2567_v58 }
 0x2f8   :  { %1064 = vmatpush.msrb.mxu2 %v2573_v59  ;;  %1084 = vmatpush.msra.mxu3 %v2579_v60 }
 0x2f9   :  { %1025 = vmatpush.msra.mxu0 %v2585_v61  ;;  %1045 = vmatpush.msrb.mxu1 %v2591_v39 }
 0x2fa   :  { %1065 = vmatpush.msrb.mxu2 %v2597_v17  ;;  %1085 = vmatpush.msra.mxu3 %v2603_v11 }
 0x2fb   :  { %1026 = vmatpush.msra.mxu0 %v2609_v35  ;;  %1046 = vmatpush.msrb.mxu1 %v2615_v50 }
 0x2fc   :  { %1066 = vmatpush.msrb.mxu2 %v2621_v20  ;;  %1086 = vmatpush.msra.mxu3 %v2627_v48 }
 0x2fd   :  { %1027 = vmatpush.msra.mxu0 %v2633_v63  ;;  %1047 = vmatpush.msrb.mxu1 %v2639_v14 }
 0x2fe   :  { %1067 = vmatpush.msrb.mxu2 %v2645_v41  ;;  %1087 = vmatpush.msra.mxu3 %v2651_v8 }
 0x2ff   :  { %1028 = vmatpush.msra.mxu0 %v2657_v0  ;;  %1048 = vmatpush.msrb.mxu1 %v2663_v51 }
 0x300   :  { %1068 = vmatpush.msrb.mxu2 %v2669_v38  ;;  %1088 = vmatpush.msra.mxu3 %v2675_v29 }
 0x301   :  { %1029 = vmatpush.msra.mxu0 %v2681_v45  ;;  %1049 = vmatpush.msrb.mxu1 %v2687_v23 }
 0x302   :  { %1069 = vmatpush.msrb.mxu2 %v3340_v15  ;;  %1089 = vmatpush.msra.mxu3 %v3341_v32 }
 0x303   :  { %1030 = vmatpush.msra.mxu0 %v3342_v47  ;;  %1050 = vmatpush.msrb.mxu1 %v3343_v44 }
 0x304   :  { %1070 = vmatpush.msrb.mxu2 %v3344_v42  ;;  %1090 = vmatpush.msra.mxu3 %v3345_v3 }
 0x305   :  { %1031 = vmatpush.msra.mxu0 %v3346_v19  ;;  %1051 = vmatpush.msrb.mxu1 %v3347_v7 }
 0x306   :  { %1071 = vmatpush.msrb.mxu2 %v3348_v27  ;;  %1091 = vmatpush.msra.mxu3 %v3349_v62 }
 0x307   :  { %1032 = vmatpush.msra.mxu0 %v3350_v18  ;;  %1052 = vmatpush.msrb.mxu1 %v3351_v25 }
 0x308   :  { %1072 = vmatpush.msrb.mxu2 %v3352_v12  ;;  %1092 = vmatpush.msra.mxu3 %v3353_v22 }
 0x309   :  { %1033 = vmatpush.msra.mxu0 %v3354_v13  ;;  %1053 = vmatpush.msrb.mxu1 %v3355_v24  ;;  %v3365_v13 = vld [vmem:[#allocation36_spill] sm:$0xff] }
 0x30a   :  { %1073 = vmatpush.msrb.mxu2 %v3356_v10  ;;  %1093 = vmatpush.msra.mxu3 %v3357_v5  ;;  %v1457_v5 = vld [vmem:[%s3145_s0 + $0x80] sm:$0xff] }
 0x30b   :  { %1034 = vmatpush.msra.mxu0 %v3358_v43  ;;  %1054 = vmatpush.msrb.mxu1 %v3359_v1  ;;  %v1458_v1 = vld [vmem:[%s3145_s0 + $0x88] sm:$0xff] }
 0x30c   :  { %1074 = vmatpush.msrb.mxu2 %v3360_v4  ;;  %1094 = vmatpush.msra.mxu3 %v3361_v21 }
 0x30d   :  { %1035 = vmatpush.msra.mxu0 %v3362_v2  ;;  %1055 = vmatpush.msrb.mxu1 %v3363_v16 }
 0x30e   :  { %1075 = vmatpush.msrb.mxu2 %v3364_v9  ;;  %1095 = vmatpush.msra.mxu3 %v3365_v13  ;;  %v1460_v9 = vld [vmem:[%s3145_s0 + $0x98] sm:$0xff] }
 0x36a   :  { %v729_v43 = vpop.f32.mrf.mxu0  ;;  %v749_v4 = vpop.f32.mrf.mxu1 }
 0x36b   :  { %v792_v10 = vadd.f32 %v1457_v5, %v729_v43  ;;  %v793_v21 = vadd.f32 %v1458_v1, %v749_v4 }
 0x36d   :  { %v1461_v24 = vmul.f32 -1.442695, %v792_v10  ;;  %v1462_v2 = vmul.f32 -1.442695, %v793_v21  ;;  %v1459_v10 = vld [vmem:[%s3145_s0 + $0x90] sm:$0xff] }
 0x36f   :  { %1554 = vpow2.f32 %v1461_v24 }
 0x370   :  { %1556 = vpow2.f32 %v1462_v2 }
 0x371   :  { %v789_v13 = vpop.f32.mrf.mxu3  ;;  %v769_v24 = vpop.f32.mrf.mxu2 }
 0x372   :  { %v795_v16 = vadd.f32 %v1460_v9, %v789_v13  ;;  %v794_v4 = vadd.f32 %v1459_v10, %v769_v24 }
 0x374   :  { %v1463_v22 = vmul.f32 -1.442695, %v795_v16 }
 0x375   :  { %v1555_v12 = vpop.eup %1554 }
 0x376   :  { %v1557_v25 = vpop.eup %1556  ;;  %v799_v18 = vadd.f32 1.0, %v1555_v12  ;;  %1558 = vpow2.f32 %v1463_v22 }
 0x377   :  { %v818_v62 = vadd.f32 1.0, %v1557_v25 }
 0x378   :  { %1560 = vrcp.f32 %v799_v18  ;;  %v811_v12 = vand.u32 2147483648, %v799_v18  ;;  %v809_v27 = vand.u32 2147483647, %v799_v18  ;;  %vm805_vm2 = vweird.f32 %v799_v18 }
 0x379   :  { %1562 = vrcp.f32 %v818_v62  ;;  %v830_v25 = vand.u32 2147483648, %v818_v62  ;;  %v828_v19 = vand.u32 2147483647, %v818_v62  ;;  %vm824_vm3 = vweird.f32 %v818_v62 }
 0x37a   :  { %v812_v10 = vor.u32 1.1754944e-38, %v811_v12  ;;  %vm810_vm6 = vcmp.eq.f32.partialorder %v809_v27, 8.507059e+37 }
 0x37b   :  { %vm829_vm7 = vcmp.eq.f32.partialorder %v828_v19, 8.507059e+37 }
 0x37c   :  { %v1559_v5 = vpop.eup %1558 }
 0x37d   :  { %v838_v43 = vadd.f32 1.0, %v1559_v5 }
 0x37e   :  { %v1561_v1 = vpop.eup %1560 }
 0x37f   :  { %v1563_v21 = vpop.eup %1562  ;;  %v801_v2 = vmul.f32 %v1561_v1, %v799_v18  ;;  %1564 = vrcp.f32 %v838_v43  ;;  %vm806_vm0 = vweird.f32 %v1561_v1  ;;  %vm844_vm9 = vweird.f32 %v838_v43 }
 0x380   :  { %v820_v9 = vmul.f32 %v1563_v21, %v818_v62  ;;  %1566 = vtanh.f32 %v794_v4  ;;  %vm825_vm1 = vweird.f32 %v1563_v21  ;;  %vm807_vm4 = vmor %vm805_vm2, %vm806_vm0 }
 0x381   :  { %v802_v13 = vsub.f32 1.0, %v801_v2  ;;  %vm826_vm5 = vmor %vm824_vm3, %vm825_vm1  ;;  %v831_v2 = vor.u32 1.1754944e-38, %v830_v25 }
 0x382   :  { %v821_v16 = vsub.f32 1.0, %v820_v9 }
 0x383   :  { %v803_v22 = vmul.f32 %v1561_v1, %v802_v13 }
 0x384   :  { %v822_v7 = vmul.f32 %v1563_v21, %v821_v16 }
 0x385   :  { %v1565_v3 = vpop.eup %1564  ;;  %v804_v42 = vadd.f32 %v1561_v1, %v803_v22 }
 0x386   :  { %v823_v24 = vadd.f32 %v1563_v21, %v822_v7  ;;  %v840_v5 = vmul.f32 %v1565_v3, %v838_v43  ;;  %v1567_v4 = vpop.eup %1566  ;;  %vm845_vm8 = vweird.f32 %v1565_v3  ;;  %v850_v7 = vand.u32 2147483648, %v838_v43 }
 0x387   :  { %v808_v9 = vsel %vm807_vm4, %v1561_v1, %v804_v42  ;;  %v848_v42 = vand.u32 2147483647, %v838_v43  ;;  %vm846_vm10 = vmor %vm844_vm9, %vm845_vm8 }
 0x388   :  { %v813_v44 = vsel %vm810_vm6, %v812_v10, %v808_v9  ;;  %v827_v13 = vsel %vm826_vm5, %v1563_v21, %v823_v24  ;;  %v841_v47 = vsub.f32 1.0, %v840_v5  ;;  %v851_v1 = vor.u32 1.1754944e-38, %v850_v7 }
 0x389   :  { %v832_v16 = vsel %vm829_vm7, %v831_v2, %v827_v13  ;;  %v855_v32 = vmul.f32 %v1567_v4, %v813_v44  ;;  %vm849_vm11 = vcmp.eq.f32.partialorder %v848_v42, 8.507059e+37  ;;  %v1466_v44 = vld [vmem:[%s3145_s0 + $0xb0] sm:$0xff] }
 0x38a   :  { %v854_v15 = vmul.f32 %v832_v16, %v2859_v6  ;;  %v842_v22 = vmul.f32 %v1565_v3, %v841_v47 }
 0x38c   :  { %v2945_v18 = vadd.f32 %v855_v32, %v854_v15  ;;  %v843_v62 = vadd.f32 %v1565_v3, %v842_v22 }
 0x38e   :  { %1568 = vtanh.f32 %v2945_v18  ;;  %v847_v27 = vsel %vm846_vm10, %v1565_v3, %v843_v62 }
 0x38f   :  { %v852_v21 = vsel %vm849_vm11, %v851_v1, %v847_v27 }
 0x394   :  { %v1569_v19 = vpop.eup %1568 }
 0x395   :  { %v2948_v12 = vmul.f32 %v1569_v19, %v852_v21 }
 0x397   :  { %882 = vmatmul.f32.vlgmr.msrb.gmra.mxu0 %v2948_v12  ;;  %902 = vmatmul.f32.vlgmr.msra.gmra.mxu1 %v2948_v12 }
 0x398   :  { %922 = vmatmul.f32.vlgmr.msra.gmra.mxu2 %v2948_v12  ;;  %942 = vmatmul.f32.vlgmr.msrb.gmra.mxu3 %v2948_v12 }
 0x399   :  { %1174 = vmatpush.msrb.mxu0 %v2465_v26  ;;  %1194 = vmatpush.msra.mxu1 %v2471_v28  ;;  %v3366_v26 = vld [vmem:[#allocation9_spill] sm:$0xff]  ;;  %v3367_v28 = vld [vmem:[#allocation10_spill] sm:$0xff] }
 0x39a   :  { %1214 = vmatpush.msra.mxu2 %v2477_v30  ;;  %1234 = vmatpush.msrb.mxu3 %v2483_v31  ;;  %v3368_v30 = vld [vmem:[#allocation11_spill] sm:$0xff]  ;;  %v3369_v31 = vld [vmem:[#allocation12_spill] sm:$0xff] }
 0x39b   :  { %1175 = vmatpush.msrb.mxu0 %v2489_v33  ;;  %1195 = vmatpush.msra.mxu1 %v2495_v34  ;;  %v3370_v33 = vld [vmem:[#allocation13_spill] sm:$0xff]  ;;  %v3371_v34 = vld [vmem:[#allocation14_spill] sm:$0xff] }
 0x39c   :  { %1215 = vmatpush.msra.mxu2 %v2501_v36  ;;  %1235 = vmatpush.msrb.mxu3 %v2507_v37  ;;  %v3372_v36 = vld [vmem:[#allocation15_spill] sm:$0xff]  ;;  %v3373_v37 = vld [vmem:[#allocation16_spill] sm:$0xff] }
 0x39d   :  { %1176 = vmatpush.msrb.mxu0 %v2513_v40  ;;  %1196 = vmatpush.msra.mxu1 %v2519_v46  ;;  %v3374_v40 = vld [vmem:[#allocation17_spill] sm:$0xff]  ;;  %v3375_v46 = vld [vmem:[#allocation18_spill] sm:$0xff] }
 0x39e   :  { %1216 = vmatpush.msra.mxu2 %v2525_v49  ;;  %1236 = vmatpush.msrb.mxu3 %v2531_v52  ;;  %v3376_v49 = vld [vmem:[#allocation19_spill] sm:$0xff]  ;;  %v3377_v52 = vld [vmem:[#allocation20_spill] sm:$0xff] }
 0x39f   :  { %1177 = vmatpush.msrb.mxu0 %v2537_v53  ;;  %1197 = vmatpush.msra.mxu1 %v2543_v54  ;;  %v3378_v53 = vld [vmem:[#allocation23_spill] sm:$0xff]  ;;  %v3379_v54 = vld [vmem:[#allocation21_spill] sm:$0xff] }
 0x3a0   :  { %1217 = vmatpush.msra.mxu2 %v2549_v55  ;;  %1237 = vmatpush.msrb.mxu3 %v2555_v56  ;;  %v3380_v55 = vld [vmem:[#allocation31_spill] sm:$0xff]  ;;  %v3381_v56 = vld [vmem:[#allocation26_spill] sm:$0xff] }
 0x3a1   :  { %1178 = vmatpush.msrb.mxu0 %v2561_v57  ;;  %1198 = vmatpush.msra.mxu1 %v2567_v58  ;;  %v3382_v57 = vld [vmem:[#allocation25_spill] sm:$0xff]  ;;  %v3383_v58 = vld [vmem:[#allocation22_spill] sm:$0xff] }
 0x3a2   :  { %1218 = vmatpush.msra.mxu2 %v2573_v59  ;;  %1238 = vmatpush.msrb.mxu3 %v2579_v60  ;;  %v3384_v59 = vld [vmem:[#allocation32_spill] sm:$0xff] }
 0x3a3   :  { %1179 = vmatpush.msrb.mxu0 %v2585_v61  ;;  %1199 = vmatpush.msra.mxu1 %v2591_v39  ;;  %v3385_v60 = vld [vmem:[#allocation28_spill] sm:$0xff]  ;;  %v3386_v61 = vld [vmem:[#allocation27_spill] sm:$0xff] }
 0x3a4   :  { %1219 = vmatpush.msra.mxu2 %v2597_v17  ;;  %1239 = vmatpush.msrb.mxu3 %v2603_v11  ;;  %v3387_v39 = vld [vmem:[#allocation24_spill] sm:$0xff]  ;;  %v3388_v17 = vld [vmem:[#allocation33_spill] sm:$0xff]  ;;  %v3389_v11 = vld [vmem:[#allocation30_spill] sm:$0xff] }
 0x3a5   :  { %1180 = vmatpush.msrb.mxu0 %v2609_v35  ;;  %1200 = vmatpush.msra.mxu1 %v2615_v50  ;;  %v3390_v35 = vld [vmem:[#allocation29_spill] sm:$0xff]  ;;  %v3391_v50 = vld [vmem:[#allocation36_spill] sm:$0xff] }
 0x3a6   :  { %1220 = vmatpush.msra.mxu2 %v2621_v20  ;;  %1240 = vmatpush.msrb.mxu3 %v2627_v48  ;;  %v1464_v20 = vld [vmem:[%s3145_s0 + $0xa0] sm:$0xff]  ;;  %v1465_v48 = vld [vmem:[%s3145_s0 + $0xa8] sm:$0xff] }
 0x3a7   :  { %1181 = vmatpush.msrb.mxu0 %v2633_v63  ;;  %1201 = vmatpush.msra.mxu1 %v2639_v14 }
 0x3a8   :  { %1221 = vmatpush.msra.mxu2 %v2645_v41  ;;  %1241 = vmatpush.msrb.mxu3 %v2651_v8 }
 0x3a9   :  { %1182 = vmatpush.msrb.mxu0 %v2657_v0  ;;  %1202 = vmatpush.msra.mxu1 %v2663_v51 }
 0x3aa   :  { %1222 = vmatpush.msra.mxu2 %v2669_v38  ;;  %1242 = vmatpush.msrb.mxu3 %v2675_v29  ;;  %v1467_v38 = vld [vmem:[%s3145_s0 + $0xb8] sm:$0xff] }
 0x3ab   :  { %1183 = vmatpush.msrb.mxu0 %v2681_v45  ;;  %1203 = vmatpush.msra.mxu1 %v2687_v23 }
 0x3ac   :  { %1223 = vmatpush.msra.mxu2 %v3366_v26  ;;  %1243 = vmatpush.msrb.mxu3 %v3367_v28 }
 0x3ad   :  { %1184 = vmatpush.msrb.mxu0 %v3368_v30  ;;  %1204 = vmatpush.msra.mxu1 %v3369_v31 }
 0x3ae   :  { %1224 = vmatpush.msra.mxu2 %v3370_v33  ;;  %1244 = vmatpush.msrb.mxu3 %v3371_v34 }
 0x3af   :  { %1185 = vmatpush.msrb.mxu0 %v3372_v36  ;;  %1205 = vmatpush.msra.mxu1 %v3373_v37 }
 0x3b0   :  { %1225 = vmatpush.msra.mxu2 %v3374_v40  ;;  %1245 = vmatpush.msrb.mxu3 %v3375_v46 }
 0x3b1   :  { %1186 = vmatpush.msrb.mxu0 %v3376_v49  ;;  %1206 = vmatpush.msra.mxu1 %v3377_v52 }
 0x3b2   :  { %1226 = vmatpush.msra.mxu2 %v3378_v53  ;;  %1246 = vmatpush.msrb.mxu3 %v3379_v54 }
 0x3b3   :  { %1187 = vmatpush.msrb.mxu0 %v3380_v55  ;;  %1207 = vmatpush.msra.mxu1 %v3381_v56 }
 0x3b4   :  { %1227 = vmatpush.msra.mxu2 %v3382_v57  ;;  %1247 = vmatpush.msrb.mxu3 %v3383_v58 }
 0x3b5   :  { %1188 = vmatpush.msrb.mxu0 %v3384_v59  ;;  %1208 = vmatpush.msra.mxu1 %v3385_v60 }
 0x3b6   :  { %1228 = vmatpush.msra.mxu2 %v3386_v61  ;;  %1248 = vmatpush.msrb.mxu3 %v3387_v39  ;;  %v1352_v39 = vld [vmem:[%s3147_s2 + $0x70] sm:$0xff] }
 0x3b7   :  { %1189 = vmatpush.msrb.mxu0 %v3388_v17  ;;  %1209 = vmatpush.msra.mxu1 %v3389_v11  ;;  %v1351_v17 = vld [vmem:[%s3147_s2 + $0x68] sm:$0xff]  ;;  %v1350_v11 = vld [vmem:[%s3147_s2 + $0x60] sm:$0xff] }
 0x3b8   :  { %1229 = vmatpush.msra.mxu2 %v3390_v35  ;;  %1249 = vmatpush.msrb.mxu3 %v3391_v50  ;;  %v1471_v35 = vld [vmem:[%s3145_s0 + $0xc0] sm:$0xff]  ;;  %v1472_v50 = vld [vmem:[%s3145_s0 + $0xc8] sm:$0xff] }
 0x414   :  { %v883_v63 = vpop.f32.mrf.mxu0  ;;  %v903_v14 = vpop.f32.mrf.mxu1 }
 0x415   :  { %v946_v41 = vadd.f32 %v1464_v20, %v883_v63  ;;  %v947_v8 = vadd.f32 %v1465_v48, %v903_v14  ;;  %v1349_v20 = vld [vmem:[%s3147_s2 + $0x58] sm:$0xff]  ;;  %v1348_v14 = vld [vmem:[%s3147_s2 + $0x50] sm:$0xff] }
 0x417   :  { %v1468_v0 = vmul.f32 -1.442695, %v946_v41  ;;  %v1469_v51 = vmul.f32 -1.442695, %v947_v8 }
 0x419   :  { %1570 = vpow2.f32 %v1468_v0  ;;  %v1347_v0 = vld [vmem:[%s3147_s2 + $0x48] sm:$0xff] }
 0x41a   :  { %1572 = vpow2.f32 %v1469_v51 }
 0x41b   :  { %v943_v29 = vpop.f32.mrf.mxu3  ;;  %v923_v3 = vpop.f32.mrf.mxu2 }
 0x41c   :  { %v949_v45 = vadd.f32 %v1467_v38, %v943_v29  ;;  %v948_v24 = vadd.f32 %v1466_v44, %v923_v3  ;;  %v1346_v29 = vld [vmem:[%s3147_s2 + $0x40] sm:$0xff] }
 0x41d   :  { %v1342_v3 = vld [vmem:[%s3147_s2 + $0x20] sm:$0xff] }
 0x41e   :  { %v1470_v23 = vmul.f32 -1.442695, %v949_v45  ;;  %v1345_v45 = vld [vmem:[%s3147_s2 + $0x38] sm:$0xff] }
 0x41f   :  { %v1571_v6 = vpop.eup %1570 }
 0x420   :  { %v1573_v15 = vpop.eup %1572  ;;  %v953_v32 = vadd.f32 1.0, %v1571_v6  ;;  %1574 = vpow2.f32 %v1470_v23  ;;  %v1474_v23 = vld [vmem:[%s3145_s0 + $0xd8] sm:$0xff]  ;;  %v1344_v6 = vld [vmem:[%s3147_s2 + $0x30] sm:$0xff] }
 0x421   :  { %v972_v47 = vadd.f32 1.0, %v1573_v15 }
 0x422   :  { %1576 = vrcp.f32 %v953_v32  ;;  %v965_v16 = vand.u32 2147483648, %v953_v32  ;;  %v963_v7 = vand.u32 2147483647, %v953_v32  ;;  %vm959_vm14 = vweird.f32 %v953_v32 }
 0x423   :  { %1578 = vrcp.f32 %v972_v47  ;;  %v984_v22 = vand.u32 2147483648, %v972_v47  ;;  %v982_v27 = vand.u32 2147483647, %v972_v47  ;;  %vm978_vm15 = vweird.f32 %v972_v47 }
 0x424   :  { %v966_v21 = vor.u32 1.1754944e-38, %v965_v16  ;;  %vm964_vm2 = vcmp.eq.f32.partialorder %v963_v7, 8.507059e+37 }
 0x425   :  { %v985_v30 = vor.u32 1.1754944e-38, %v984_v22  ;;  %vm983_vm3 = vcmp.eq.f32.partialorder %v982_v27, 8.507059e+37  ;;  %v1338_v22 = vld [vmem:[%s3147_s2] sm:$0xff] }
 0x426   :  { %v1575_v43 = vpop.eup %1574 }
 0x427   :  { %v992_v25 = vadd.f32 1.0, %v1575_v43 }
 0x428   :  { %v1577_v10 = vpop.eup %1576 }
 0x429   :  { %v1579_v5 = vpop.eup %1578  ;;  %v955_v2 = vmul.f32 %v1577_v10, %v953_v32  ;;  %1580 = vrcp.f32 %v992_v25  ;;  %vm960_vm12 = vweird.f32 %v1577_v10  ;;  %v1004_v55 = vand.u32 2147483648, %v992_v25 }
 0x42a   :  { %v974_v9 = vmul.f32 %v1579_v5, %v972_v47  ;;  %1582 = vtanh.f32 %v948_v24  ;;  %vm979_vm13 = vweird.f32 %v1579_v5  ;;  %vm961_vm0 = vmor %vm959_vm14, %vm960_vm12  ;;  %vm998_vm5 = vweird.f32 %v992_v25  ;;  %v1343_v47 = vld [vmem:[%s3147_s2 + $0x28] sm:$0xff] }
 0x42b   :  { %v956_v4 = vsub.f32 1.0, %v955_v2  ;;  %vm980_vm1 = vmor %vm978_vm15, %vm979_vm13  ;;  %v1002_v56 = vand.u32 2147483647, %v992_v25  ;;  %v1005_v58 = vor.u32 1.1754944e-38, %v1004_v55  ;;  %v1340_v2 = vld [vmem:[%s3147_s2 + $0x10] sm:$0xff] }
 0x42c   :  { %v975_v13 = vsub.f32 1.0, %v974_v9  ;;  %v1339_v9 = vld [vmem:[%s3147_s2 + $0x8] sm:$0xff] }
 0x42d   :  { %v957_v62 = vmul.f32 %v1577_v10, %v956_v4  ;;  %vm1003_vm7 = vcmp.eq.f32.partialorder %v1002_v56, 8.507059e+37  ;;  %v1473_v4 = vld [vmem:[%s3145_s0 + $0xd0] sm:$0xff] }
 0x42e   :  { %v976_v42 = vmul.f32 %v1579_v5, %v975_v13 }
 0x42f   :  { %v1581_v1 = vpop.eup %1580  ;;  %v958_v19 = vadd.f32 %v1577_v10, %v957_v62 }
 0x430   :  { %v977_v26 = vadd.f32 %v1579_v5, %v976_v42  ;;  %v994_v28 = vmul.f32 %v1581_v1, %v992_v25  ;;  %v1583_v33 = vpop.eup %1582  ;;  %vm999_vm4 = vweird.f32 %v1581_v1 }
 0x431   :  { %v962_v31 = vsel %vm961_vm0, %v1577_v10, %v958_v19  ;;  %vm1000_vm6 = vmor %vm998_vm5, %vm999_vm4 }
 0x432   :  { %v967_v34 = vsel %vm964_vm2, %v966_v21, %v962_v31  ;;  %v981_v36 = vsel %vm980_vm1, %v1579_v5, %v977_v26  ;;  %v995_v37 = vsub.f32 1.0, %v994_v28  ;;  %v1341_v5 = vld [vmem:[%s3147_s2 + $0x18] sm:$0xff] }
 0x433   :  { %v986_v40 = vsel %vm983_vm3, %v985_v30, %v981_v36  ;;  %v1009_v46 = vmul.f32 %v1583_v33, %v967_v34 }
 0x434   :  { %v1008_v49 = vmul.f32 %v986_v40, %v2945_v18  ;;  %v996_v52 = vmul.f32 %v1581_v1, %v995_v37  ;;  %v1353_v18 = vld [vmem:[%s3147_s2 + $0x78] sm:$0xff] }
 0x436   :  { %v3031_v53 = vadd.f32 %v1009_v46, %v1008_v49  ;;  %v997_v54 = vadd.f32 %v1581_v1, %v996_v52 }
 0x438   :  { %1584 = vtanh.f32 %v3031_v53  ;;  %v1001_v57 = vsel %vm1000_vm6, %v1581_v1, %v997_v54 }
 0x439   :  { %v1006_v60 = vsel %vm1003_vm7, %v1005_v58, %v1001_v57 }
 0x43e   :  { %v1585_v59 = vpop.eup %1584 }
 0x43f   :  { %v3034_v61 = vmul.f32 %v1585_v59, %v1006_v60 }
 0x441   :  { %1036 = vmatmul.f32.vlgmr.msra.gmra.mxu0 %v3034_v61  ;;  %1056 = vmatmul.f32.vlgmr.msrb.gmra.mxu1 %v3034_v61 }
 0x442   :  { %1076 = vmatmul.f32.vlgmr.msrb.gmra.mxu2 %v3034_v61  ;;  %1096 = vmatmul.f32.vlgmr.msra.gmra.mxu3 %v3034_v61 }
 0x443   :  { %1358 = vmatpush.msra.mxu0 %v1353_v18 }
 0x445   :  { %1359 = vmatpush.msra.mxu0 %v1352_v39 }
 0x447   :  { %1360 = vmatpush.msra.mxu0 %v1351_v17 }
 0x449   :  { %1361 = vmatpush.msra.mxu0 %v1350_v11 }
 0x44b   :  { %1362 = vmatpush.msra.mxu0 %v1349_v20 }
 0x44d   :  { %1363 = vmatpush.msra.mxu0 %v1348_v14 }
 0x44f   :  { %1364 = vmatpush.msra.mxu0 %v1347_v0  ;;  %v3393_v0 = vld [vmem:[#allocation35_spill] sm:$0xff] }
 0x451   :  { %1365 = vmatpush.msra.mxu0 %v1346_v29  ;;  %v1478_v29 = vld [vmem:[%s3145_s0 + $0xe0] sm:$0xff] }
 0x453   :  { %1366 = vmatpush.msra.mxu0 %v1345_v45  ;;  %v1479_v45 = vld [vmem:[%s3145_s0 + $0xe8] sm:$0xff] }
 0x455   :  { %1367 = vmatpush.msra.mxu0 %v1344_v6 }
 0x457   :  { %1368 = vmatpush.msra.mxu0 %v1343_v47 }
 0x459   :  { %1369 = vmatpush.msra.mxu0 %v1342_v3 }
 0x45b   :  { %1370 = vmatpush.msra.mxu0 %v1341_v5 }
 0x45d   :  { %1371 = vmatpush.msra.mxu0 %v1340_v2 }
 0x45f   :  { %1372 = vmatpush.msra.mxu0 %v1339_v9 }
 0x461   :  { %1373 = vmatpush.msra.mxu0 %v1338_v22 }
 0x4be   :  { %v1037_v48 = vpop.f32.mrf.mxu0  ;;  %v1057_v63 = vpop.f32.mrf.mxu1 }
 0x4bf   :  { %v1100_v41 = vadd.f32 %v1471_v35, %v1037_v48  ;;  %v1101_v8 = vadd.f32 %v1472_v50, %v1057_v63 }
 0x4c1   :  { %v1475_v51 = vmul.f32 -1.442695, %v1100_v41  ;;  %v1476_v38 = vmul.f32 -1.442695, %v1101_v8 }
 0x4c3   :  { %1586 = vpow2.f32 %v1475_v51  ;;  %v3394_v51 = vld [vmem:[#allocation8_spill] sm:$0xff] }
 0x4c4   :  { %1588 = vpow2.f32 %v1476_v38  ;;  %v3395_v38 = vld [vmem:[#allocation37_spill] sm:$0xff] }
 0x4c5   :  { %v1097_v15 = vpop.f32.mrf.mxu3  ;;  %v1077_v13 = vpop.f32.mrf.mxu2 }
 0x4c6   :  { %v1103_v32 = vadd.f32 %v1474_v23, %v1097_v15  ;;  %v1102_v42 = vadd.f32 %v1473_v4, %v1077_v13 }
 0x4c8   :  { %v1477_v44 = vmul.f32 -1.442695, %v1103_v32 }
 0x4c9   :  { %v1587_v43 = vpop.eup %1586 }
 0x4ca   :  { %v1589_v25 = vpop.eup %1588  ;;  %v1107_v10 = vadd.f32 1.0, %v1587_v43  ;;  %1590 = vpow2.f32 %v1477_v44 }
 0x4cb   :  { %v1126_v24 = vadd.f32 1.0, %v1589_v25 }
 0x4cc   :  { %1592 = vrcp.f32 %v1107_v10  ;;  %v1119_v28 = vand.u32 2147483648, %v1107_v10  ;;  %v1117_v33 = vand.u32 2147483647, %v1107_v10  ;;  %vm1113_vm10 = vweird.f32 %v1107_v10 }
 0x4cd   :  { %1594 = vrcp.f32 %v1126_v24  ;;  %v1138_v30 = vand.u32 2147483648, %v1126_v24  ;;  %v1136_v36 = vand.u32 2147483647, %v1126_v24  ;;  %vm1132_vm11 = vweird.f32 %v1126_v24 }
 0x4ce   :  { %v1120_v46 = vor.u32 1.1754944e-38, %v1119_v28  ;;  %vm1118_vm14 = vcmp.eq.f32.partialorder %v1117_v33, 8.507059e+37 }
 0x4cf   :  { %v1139_v54 = vor.u32 1.1754944e-38, %v1138_v30  ;;  %vm1137_vm15 = vcmp.eq.f32.partialorder %v1136_v36, 8.507059e+37 }
 0x4d0   :  { %v1591_v16 = vpop.eup %1590 }
 0x4d1   :  { %v1146_v62 = vadd.f32 1.0, %v1591_v16  ;;  %v1480_v16 = vld [vmem:[%s3145_s0 + $0xf0] sm:$0xff] }
 0x4d2   :  { %v1593_v7 = vpop.eup %1592 }
 0x4d3   :  { %v1595_v27 = vpop.eup %1594  ;;  %v1109_v1 = vmul.f32 %v1593_v7, %v1107_v10  ;;  %1596 = vrcp.f32 %v1146_v62  ;;  %vm1114_vm8 = vweird.f32 %v1593_v7  ;;  %v1158_v50 = vand.u32 2147483648, %v1146_v62 }
 0x4d4   :  { %v1128_v19 = vmul.f32 %v1595_v27, %v1126_v24  ;;  %1598 = vtanh.f32 %v1102_v42  ;;  %vm1133_vm9 = vweird.f32 %v1595_v27  ;;  %vm1115_vm12 = vmor %vm1113_vm10, %vm1114_vm8  ;;  %vm1152_vm1 = vweird.f32 %v1146_v62 }
 0x4d5   :  { %v1110_v21 = vsub.f32 1.0, %v1109_v1  ;;  %vm1134_vm13 = vmor %vm1132_vm11, %vm1133_vm9  ;;  %v1156_v20 = vand.u32 2147483647, %v1146_v62  ;;  %v1159_v63 = vor.u32 1.1754944e-38, %v1158_v50 }
 0x4d6   :  { %v1129_v26 = vsub.f32 1.0, %v1128_v19 }
 0x4d7   :  { %v1111_v31 = vmul.f32 %v1593_v7, %v1110_v21  ;;  %vm1157_vm3 = vcmp.eq.f32.partialorder %v1156_v20, 8.507059e+37 }
 0x4d8   :  { %v1130_v34 = vmul.f32 %v1595_v27, %v1129_v26 }
 0x4d9   :  { %v1597_v37 = vpop.eup %1596  ;;  %v1112_v40 = vadd.f32 %v1593_v7, %v1111_v31 }
 0x4da   :  { %v1131_v49 = vadd.f32 %v1595_v27, %v1130_v34  ;;  %v1148_v52 = vmul.f32 %v1597_v37, %v1146_v62  ;;  %v1599_v56 = vpop.eup %1598  ;;  %vm1153_vm0 = vweird.f32 %v1597_v37 }
 0x4db   :  { %v1116_v55 = vsel %vm1115_vm12, %v1593_v7, %v1112_v40  ;;  %vm1154_vm2 = vmor %vm1152_vm1, %vm1153_vm0 }
 0x4dc   :  { %v1121_v57 = vsel %vm1118_vm14, %v1120_v46, %v1116_v55  ;;  %v1135_v58 = vsel %vm1134_vm13, %v1595_v27, %v1131_v49  ;;  %v1149_v59 = vsub.f32 1.0, %v1148_v52 }
 0x4dd   :  { %v1140_v60 = vsel %vm1137_vm15, %v1139_v54, %v1135_v58  ;;  %v1163_v18 = vmul.f32 %v1599_v56, %v1121_v57 }
 0x4de   :  { %v1162_v39 = vmul.f32 %v1140_v60, %v3031_v53  ;;  %v1150_v17 = vmul.f32 %v1597_v37, %v1149_v59  ;;  %v3392_v53 = vld [vmem:[#allocation34_spill] sm:$0xff] }
 0x4e0   :  { %v3101_v11 = vadd.f32 %v1163_v18, %v1162_v39  ;;  %v1151_v35 = vadd.f32 %v1597_v37, %v1150_v17 }
 0x4e2   :  { %1600 = vtanh.f32 %v3101_v11  ;;  %v1155_v48 = vsel %vm1154_vm2, %v1597_v37, %v1151_v35 }
 0x4e3   :  { %v1160_v41 = vsel %vm1157_vm3, %v1159_v63, %v1155_v48 }
 0x4e8   :  { %v1601_v14 = vpop.eup %1600 }
 0x4e9   :  { %v1166_v8 = vmul.f32 %v1601_v14, %v1160_v41 }
 0x4eb   :  { %1190 = vmatmul.f32.vlgmr.msrb.gmra.mxu0 %v1166_v8  ;;  %1210 = vmatmul.f32.vlgmr.msra.gmra.mxu1 %v1166_v8 }
 0x4ec   :  { %1230 = vmatmul.f32.vlgmr.msra.gmra.mxu2 %v1166_v8  ;;  %1250 = vmatmul.f32.vlgmr.msrb.gmra.mxu3 %v1166_v8 }
 0x4f3   :  { %1374 = vmatmul.f32.vlgmr.msra.gmra.mxu0 %v3392_v53 }
 0x4fb   :  { %1377 = vmatmul.f32.gmra.mxu0 %v3393_v0 }
 0x503   :  { %1380 = vmatmul.f32.gmra.mxu0 %v3394_v51 }
 0x50b   :  { %1383 = vmatmul.f32.gmra.mxu0 %v3395_v38 }
 0x513   :  { %1386 = vmatmul.f32.gmra.mxu0 %v2948_v12  ;;  %v1481_v12 = vld [vmem:[%s3145_s0 + $0xf8] sm:$0xff] }
 0x51b   :  { %1389 = vmatmul.f32.gmra.mxu0 %v3034_v61  ;;  %v3122_v61 = vld [vmem:[%s3148_s3] ss:$0 sm:$0xff] }
 0x523   :  { %1392 = vmatmul.f32.gmra.mxu0 %v1166_v8 }
 0x568   :  { %v1191_v23 = vpop.f32.mrf.mxu0  ;;  %v1211_v6 = vpop.f32.mrf.mxu1 }
 0x569   :  { %v1254_v15 = vadd.f32 %v1478_v29, %v1191_v23  ;;  %v1255_v32 = vadd.f32 %v1479_v45, %v1211_v6 }
 0x56b   :  { %v1482_v47 = vmul.f32 -1.442695, %v1254_v15  ;;  %v1483_v44 = vmul.f32 -1.442695, %v1255_v32 }
 0x56d   :  { %1602 = vpow2.f32 %v1482_v47 }
 0x56e   :  { %1604 = vpow2.f32 %v1483_v44 }
 0x56f   :  { %v1251_v3 = vpop.f32.mrf.mxu3  ;;  %v1231_v22 = vpop.f32.mrf.mxu2 }
 0x570   :  { %v1257_v43 = vadd.f32 %v1481_v12, %v1251_v3  ;;  %v1375_v25 = vpop.f32.mrf.mxu0  ;;  %v1256_v1 = vadd.f32 %v1480_v16, %v1231_v22 }
 0x571   :  { %v1376_v10 = vadd.f32 %v3122_v61, %v1375_v25 }
 0x572   :  { %v1484_v24 = vmul.f32 -1.442695, %v1257_v43 }
 0x573   :  { %v1603_v5 = vpop.eup %1602  ;;  %1399 = vst [vmem:[#allocation5] sm:$0xff] %v1376_v10 }
 0x574   :  { %v1605_v2 = vpop.eup %1604  ;;  %v1261_v9 = vadd.f32 1.0, %v1603_v5  ;;  %1606 = vpow2.f32 %v1484_v24 }
 0x575   :  { %v1280_v4 = vadd.f32 1.0, %v1605_v2 }
 0x576   :  { %1608 = vrcp.f32 %v1261_v9  ;;  %v1271_v31 = vand.u32 2147483647, %v1261_v9  ;;  %v1273_v33 = vand.u32 2147483648, %v1261_v9  ;;  %vm1267_vm6 = vweird.f32 %v1261_v9 }
 0x577   :  { %1610 = vrcp.f32 %v1280_v4  ;;  %v1292_v36 = vand.u32 2147483648, %v1280_v4  ;;  %v1290_v49 = vand.u32 2147483647, %v1280_v4  ;;  %vm1286_vm7 = vweird.f32 %v1280_v4 }
 0x578   :  { %v1378_v13 = vpop.f32.mrf.mxu0  ;;  %v1274_v55 = vor.u32 1.1754944e-38, %v1273_v33  ;;  %vm1272_vm10 = vcmp.eq.f32.partialorder %v1271_v31, 8.507059e+37 }
 0x579   :  { %v1379_v62 = vadd.f32 %v3122_v61, %v1378_v13  ;;  %v1293_v58 = vor.u32 1.1754944e-38, %v1292_v36  ;;  %vm1291_vm11 = vcmp.eq.f32.partialorder %v1290_v49, 8.507059e+37 }
 0x57a   :  { %v1607_v7 = vpop.eup %1606 }
 0x57b   :  { %v1300_v42 = vadd.f32 1.0, %v1607_v7  ;;  %1400 = vst [vmem:[#allocation5 + $0x8] sm:$0xff] %v1379_v62 }
 0x57c   :  { %v1609_v27 = vpop.eup %1608 }
 0x57d   :  { %v1611_v19 = vpop.eup %1610  ;;  %v1263_v21 = vmul.f32 %v1609_v27, %v1261_v9  ;;  %1612 = vrcp.f32 %v1300_v42  ;;  %vm1268_vm4 = vweird.f32 %v1609_v27  ;;  %v1312_v53 = vand.u32 2147483648, %v1300_v42 }
 0x57e   :  { %v1282_v26 = vmul.f32 %v1611_v19, %v1280_v4  ;;  %1614 = vtanh.f32 %v1256_v1  ;;  %vm1287_vm5 = vweird.f32 %v1611_v19  ;;  %vm1269_vm8 = vmor %vm1267_vm6, %vm1268_vm4  ;;  %vm1306_vm13 = vweird.f32 %v1300_v42 }
 0x57f   :  { %v1264_v28 = vsub.f32 1.0, %v1263_v21  ;;  %vm1288_vm9 = vmor %vm1286_vm7, %vm1287_vm5  ;;  %v1310_v0 = vand.u32 2147483647, %v1300_v42 }
 0x580   :  { %v1283_v30 = vsub.f32 1.0, %v1282_v26  ;;  %v1381_v34 = vpop.f32.mrf.mxu0 }
 0x581   :  { %v1265_v37 = vmul.f32 %v1609_v27, %v1264_v28  ;;  %v1382_v40 = vadd.f32 %v3122_v61, %v1381_v34  ;;  %vm1311_vm15 = vcmp.eq.f32.partialorder %v1310_v0, 8.507059e+37 }
 0x582   :  { %v1284_v46 = vmul.f32 %v1611_v19, %v1283_v30 }
 0x583   :  { %v1613_v52 = vpop.eup %1612  ;;  %v1266_v54 = vadd.f32 %v1609_v27, %v1265_v37  ;;  %1401 = vst [vmem:[#allocation5 + $0x10] sm:$0xff] %v1382_v40 }
 0x584   :  { %v1285_v56 = vadd.f32 %v1611_v19, %v1284_v46  ;;  %v1302_v57 = vmul.f32 %v1613_v52, %v1300_v42  ;;  %v1615_v60 = vpop.eup %1614  ;;  %vm1307_vm12 = vweird.f32 %v1613_v52 }
 0x585   :  { %v1270_v59 = vsel %vm1269_vm8, %v1609_v27, %v1266_v54  ;;  %vm1308_vm14 = vmor %vm1306_vm13, %vm1307_vm12 }
 0x586   :  { %v1275_v18 = vsel %vm1272_vm10, %v1274_v55, %v1270_v59  ;;  %v1289_v39 = vsel %vm1288_vm9, %v1611_v19, %v1285_v56  ;;  %v1303_v17 = vsub.f32 1.0, %v1302_v57 }
 0x587   :  { %v1294_v35 = vsel %vm1291_vm11, %v1293_v58, %v1289_v39  ;;  %v1317_v50 = vmul.f32 %v1615_v60, %v1275_v18 }
 0x588   :  { %v1316_v20 = vmul.f32 %v1294_v35, %v3101_v11  ;;  %v1384_v48 = vpop.f32.mrf.mxu0  ;;  %v1304_v63 = vmul.f32 %v1613_v52, %v1303_v17  ;;  %v1313_v11 = vor.u32 1.1754944e-38, %v1312_v53 }
 0x589   :  { %v1385_v14 = vadd.f32 %v3122_v61, %v1384_v48 }
 0x58a   :  { %v1318_v41 = vadd.f32 %v1317_v50, %v1316_v20  ;;  %v1305_v8 = vadd.f32 %v1613_v52, %v1304_v63 }
 0x58b   :  { %1402 = vst [vmem:[#allocation5 + $0x18] sm:$0xff] %v1385_v14 }
 0x58c   :  { %1329 = vst [vmem:[%s3151_s6] sm:$0xff] %v1318_v41  ;;  %1616 = vtanh.f32 %v1318_v41  ;;  %v1309_v51 = vsel %vm1308_vm14, %v1613_v52, %v1305_v8  ;;  %s1709_s6 = smov [#allocation5]  }
 0x58d   :  { %v1314_v23 = vsel %vm1311_vm15, %v1313_v11, %v1309_v51  ;;  %s1411_s13 = sshll.u32 %s1709_s6, 4  ;;  %s1412_s13 = int_to_ptr.vmem [resolvable:$true] %s1411_s13 }
 0x590   :  { %v1387_v38 = vpop.f32.mrf.mxu0 }
 0x591   :  { %v1388_v29 = vadd.f32 %v3122_v61, %v1387_v38 }
 0x592   :  { %v1617_v45 = vpop.eup %1616 }
 0x593   :  { %1403 = vst [vmem:[#allocation5 + $0x20] sm:$0xff] %v1388_v29  ;;  %v1320_v6 = vmul.f32 %v1617_v45, %v1314_v23 }
 0x595   :  { %1328 = vst [vmem:[%s3150_s5] sm:$0xff] %v1320_v6  ;;  %1395 = vmatmul.f32.gmra.mxu0 %v1320_v6  ;;  %s1710_s5 = smov 128  }
 0x598   :  { %v1390_v15 = vpop.f32.mrf.mxu0 }
 0x599   :  { %v1391_v32 = vadd.f32 %v3122_v61, %v1390_v15 }
 0x59b   :  { %1404 = vst [vmem:[#allocation5 + $0x28] sm:$0xff] %v1391_v32 }
 0x5a0   :  { %v1393_v47 = vpop.f32.mrf.mxu0 }
 0x5a1   :  { %v1394_v44 = vadd.f32 %v3122_v61, %v1393_v47 }
 0x5a3   :  { %1405 = vst [vmem:[#allocation5 + $0x30] sm:$0xff] %v1394_v44 }
 0x612   :  { %v1396_v12 = vpop.f32.mrf.mxu0 }
 0x613   :  { %v1397_v3 = vadd.f32 %v3122_v61, %v1396_v12 }
 0x615   :  { %1406 = vst [vmem:[#allocation5 + $0x38] sm:$0xff] %v1397_v3 }
 0x616   :  { %1419 = dma.vmem_to_hbm [thread:$0]  %s1412_s13, 1024, %s1414_s16, [#allocation6], %s1710_s5, %s1710_s5, %s1711_s17  }
 0x617   :  { %1706 = dma.done.wait [#allocation6], 1024  }
 0x618   :  { %1707 = vsyncadd [#allocation6], 4294966272 }
 0x619   :  { %1432 = vsyncpa [#allocation6], 1 }

</bundles_post_ra>
